<compile_context>
chip_gen: v5e
topology: v5e:2x2
jax: 0.10.0
libtpu: 0.0.40
codegen_flags: <defaults>
</compile_context>

<pallas_src>
import jax
import jax.numpy as jnp
from jax.experimental import pallas as pl
from jax.experimental.pallas import tpu as pltpu


_VMEM_LIMIT = 48 * 1024 * 1024


def _round_up(x, m):
    return ((x + m - 1) // m) * m


# ----------------------------------------------------------------------------
# Pallas kernel bodies
# ----------------------------------------------------------------------------
def _conv_relu_pool_kernel(pt_ref, w_ref, b_ref, o_ref):
    """Fused conv(matmul) + 2x2 maxpool + bias + ReLU.

    pt_ref: (4, Kp, Mt)  bf16  im2col patches, one slab per pool-window corner
    w_ref : (Coutp, Kp)  bf16
    b_ref : (Coutp, 1)   f32
    o_ref : (Coutp, Mt)  bf16  pooled activations (lane-dense in M)
    """
    w = w_ref[...]
    acc = jnp.dot(w, pt_ref[0], preferred_element_type=jnp.float32)
    for q in range(1, 4):        # statically unrolled: one matmul per corner
        acc = jnp.maximum(
            acc, jnp.dot(w, pt_ref[q], preferred_element_type=jnp.float32))
    # bias + ReLU once, after the corner max (corner-invariant, monotone)
    o_ref[...] = jnp.maximum(acc + b_ref[...], 0.0).astype(o_ref.dtype)


def _mlp_kernel(x_ref, w1_ref, b1_ref, w2_ref, b2_ref, w3_ref, b3_ref, o_ref):
    """Fused fc1+ReLU -> fc2+ReLU -> fc, computed as W @ x (batch on lanes)."""
    h = jnp.dot(w1_ref[...], x_ref[...], preferred_element_type=jnp.float32)
    h = jnp.maximum(h + b1_ref[...], 0.0)
    h = jnp.dot(w2_ref[...], h.astype(jnp.bfloat16),
                preferred_element_type=jnp.float32)
    h = jnp.maximum(h + b2_ref[...], 0.0)
    h = jnp.dot(w3_ref[...], h.astype(jnp.bfloat16),
                preferred_element_type=jnp.float32)
    o_ref[...] = h + b3_ref[...]


# ----------------------------------------------------------------------------
# Wrapper glue (plain JAX): transpose-free im2col per pool-corner
# ----------------------------------------------------------------------------
def _pooled_corner_patches(x_chwb, kh, kw):
    """x: (Cin, H, W, B) -> (4, Cin*kh*kw, Hp*Wp*B) patches, no transposes."""
    Cin, H, W, B = x_chwb.shape
    Ho, Wo = H - kh + 1, W - kw + 1
    Hp, Wp = Ho // 2, Wo // 2
    taps = jnp.stack(
        [x_chwb[:, i:i + Ho, j:j + Wo, :] for i in range(kh) for j in range(kw)],
        axis=1)                                      # (Cin, kh*kw, Ho, Wo, B)
    corners = []
    for di in range(2):
        for dj in range(2):
            c = taps[:, :, di:di + 2 * Hp:2, dj:dj + 2 * Wp:2, :]
            corners.append(c.reshape(Cin * kh * kw, Hp * Wp * B))
    return jnp.stack(corners, axis=0), Hp, Wp


def conv_relu_pool_pallas(x_chwb, wm, bm):
    """valid Conv2d(5x5) + ReLU + MaxPool2d(2,2).

    x_chwb: (Cin, H, W, B) bf16, channel-major / batch-minor
    wm    : (Coutp, Kp)    bf16, zero-padded
    bm    : (Coutp, 1)     f32,  zero-padded
    returns ((Coutp, Mp) bf16, Hp, Wp) with M ordered (hp, wp, b).
    """
    Coutp, Kp = wm.shape
    patches, Hp, Wp = _pooled_corner_patches(x_chwb, 5, 5)
    K, M = patches.shape[1], patches.shape[2]

    # large lane tiles, but keep >= 2 parallel blocks when possible (megacore)
    tile_m = min(4096, max(128, _round_up(pl.cdiv(M, 2), 128)))
    Mp = _round_up(M, tile_m)
    patches = jnp.pad(patches, ((0, 0), (0, Kp - K), (0, Mp - M)))
    grid = (Mp // tile_m,)

    cost = pl.CostEstimate(
        flops=2 * 4 * Coutp * Kp * Mp,
        transcendentals=0,
        bytes_accessed=4 * Kp * Mp * 2 + Coutp * Kp * 2 + Coutp * 4
        + Coutp * Mp * 2)

    out = pl.pallas_call(
        _conv_relu_pool_kernel,
        out_shape=jax.ShapeDtypeStruct((Coutp, Mp), jnp.bfloat16),
        grid_spec=pltpu.PrefetchScalarGridSpec(
            num_scalar_prefetch=0,
            grid=grid,
            in_specs=[
                pl.BlockSpec((4, Kp, tile_m), lambda i: (0, 0, i)),
                pl.BlockSpec((Coutp, Kp), lambda i: (0, 0)),
                pl.BlockSpec((Coutp, 1), lambda i: (0, 0)),
            ],
            out_specs=pl.BlockSpec((Coutp, tile_m), lambda i: (0, i)),
        ),
        compiler_params=pltpu.CompilerParams(
            dimension_semantics=("parallel",),
            vmem_limit_bytes=_VMEM_LIMIT),
        cost_estimate=cost,
    )(patches, wm, bm)
    return out, Hp, Wp


def mlp_pallas(x_mlp, prep, tile_b):
    """Fused fc1+ReLU+fc2+ReLU+fc.  x_mlp: (K1p, Bp) bf16, batch on lanes."""
    K1p, Bp = x_mlp.shape
    w1, b1 = prep["fc1_w"], prep["fc1_b"]
    w2, b2 = prep["fc2_w"], prep["fc2_b"]
    w3, b3 = prep["fc_w"], prep["fc_b"]
    N1p, N2, N3p = w1.shape[0], w2.shape[0], w3.shape[0]
    grid = (Bp // tile_b,)

    cost = pl.CostEstimate(
        flops=2 * Bp * (K1p * N1p + N1p * N2 + N2 * N3p),
        transcendentals=0,
        bytes_accessed=(Bp * K1p * 2 + (K1p * N1p + N1p * N2 + N2 * N3p) * 2
                        + (N1p + N2 + N3p) * 4 + Bp * N3p * 4))

    return pl.pallas_call(
        _mlp_kernel,
        out_shape=jax.ShapeDtypeStruct((N3p, Bp), jnp.float32),
        grid_spec=pltpu.PrefetchScalarGridSpec(
            num_scalar_prefetch=0,
            grid=grid,
            in_specs=[
                pl.BlockSpec((K1p, tile_b), lambda i: (0, i)),
                pl.BlockSpec((N1p, K1p), lambda i: (0, 0)),
                pl.BlockSpec((N1p, 1), lambda i: (0, 0)),
                pl.BlockSpec((N2, N1p), lambda i: (0, 0)),
                pl.BlockSpec((N2, 1), lambda i: (0, 0)),
                pl.BlockSpec((N3p, N2), lambda i: (0, 0)),
                pl.BlockSpec((N3p, 1), lambda i: (0, 0)),
            ],
            out_specs=pl.BlockSpec((N3p, tile_b), lambda i: (0, i)),
        ),
        compiler_params=pltpu.CompilerParams(
            dimension_semantics=("parallel",),
            vmem_limit_bytes=_VMEM_LIMIT),
        cost_estimate=cost,
    )(x_mlp, w1, b1, w2, b2, w3, b3)


# ----------------------------------------------------------------------------
# Parameters (deterministic, PyTorch-default-style uniform init)
# ----------------------------------------------------------------------------
def init_params(key, n_classes):
    ks = jax.random.split(key, 10)

    def u(k, shape, fan_in):
        bound = 1.0 / (fan_in ** 0.5)
        return jax.random.uniform(k, shape, jnp.float32, -bound, bound)

    return {
        "conv1_w": u(ks[0], (6, 3, 5, 5), 3 * 5 * 5),
        "conv1_b": u(ks[1], (6,), 3 * 5 * 5),
        "conv2_w": u(ks[2], (16, 6, 5, 5), 6 * 5 * 5),
        "conv2_b": u(ks[3], (16,), 6 * 5 * 5),
        "fc1_w": u(ks[4], (64, 16 * 5 * 5), 16 * 5 * 5),  # PyTorch Linear (out, in)
        "fc1_b": u(ks[5], (64,), 16 * 5 * 5),
        "fc2_w": u(ks[6], (512, 64), 64),
        "fc2_b": u(ks[7], (512,), 64),
        "fc_w": u(ks[8], (n_classes, 512), 512),
        "fc_b": u(ks[9], (n_classes,), 512),
    }


def prepare_params(params):
    """One-time padding / reshape / bf16 cast of all weights (kernel-ready)."""
    n_classes = params["fc_b"].shape[0]

    def pad_to(a, shape):
        return jnp.pad(a, [(0, s - d) for s, d in zip(shape, a.shape)])

    c1p, k1p = 8, _round_up(3 * 25, 16)     # Cout 6->8, K 75->80
    c2p, k2p = 16, _round_up(6 * 25, 16)    # Cout 16,   K 150->160
    n1p = 128                               # fc1 width 64 -> 128 lanes
    kfc = 512                               # MLP K1 400 -> 512
    n3p = _round_up(n_classes, 128)         # logits width -> 128 lanes

    return {
        "conv1_wm": pad_to(params["conv1_w"].reshape(6, 75),
                           (c1p, k1p)).astype(jnp.bfloat16),
        "conv1_bm": pad_to(params["conv1_b"].reshape(6, 1),
                           (c1p, 1)).astype(jnp.float32),
        "conv2_wm": pad_to(params["conv2_w"].reshape(16, 150),
                           (c2p, k2p)).astype(jnp.bfloat16),
        "conv2_bm": pad_to(params["conv2_b"].reshape(16, 1),
                           (c2p, 1)).astype(jnp.float32),
        # MLP weights in native PyTorch (out, in) orientation; kernel does W @ x.
        # Padded rows/cols are zero so the padded fc1 outputs stay exactly 0.
        "fc1_w": pad_to(params["fc1_w"], (n1p, kfc)).astype(jnp.bfloat16),
        "fc1_b": pad_to(params["fc1_b"].reshape(64, 1),
                        (n1p, 1)).astype(jnp.float32),
        "fc2_w": pad_to(params["fc2_w"], (512, n1p)).astype(jnp.bfloat16),
        "fc2_b": params["fc2_b"].reshape(512, 1).astype(jnp.float32),
        "fc_w": pad_to(params["fc_w"], (n3p, 512)).astype(jnp.bfloat16),
        "fc_b": pad_to(params["fc_b"].reshape(n_classes, 1),
                       (n3p, 1)).astype(jnp.float32),
    }


# ----------------------------------------------------------------------------
# Forward pass (mirrors Net_cifar100.forward exactly)
# ----------------------------------------------------------------------------
def net_cifar100_forward(prep, x, n_classes):
    B = x.shape[0]

    # one small input transpose: NCHW -> (C, H, W, B), channel-major/batch-minor
    xc = jnp.transpose(x, (1, 2, 3, 0)).astype(jnp.bfloat16)

    # conv blocks: fused conv + maxpool(2,2) + bias + ReLU (one kernel each)
    y1, Hp1, Wp1 = conv_relu_pool_pallas(xc, prep["conv1_wm"], prep["conv1_bm"])
    y1 = y1[:6, :Hp1 * Wp1 * B].reshape(6, Hp1, Wp1, B)          # (6, 14, 14, B)
    y2, Hp2, Wp2 = conv_relu_pool_pallas(y1, prep["conv2_wm"], prep["conv2_bm"])
    # channel-major flatten == PyTorch .view(-1, 400) with batch on lanes
    y2 = y2[:16, :Hp2 * Wp2 * B].reshape(16 * Hp2 * Wp2, B)      # (400, B)

    # fused MLP: pad K1 400->512 and batch up to the tile; batch on lanes
    K1p = prep["fc1_w"].shape[1]
    tile_b = min(512, max(128, _round_up(pl.cdiv(_round_up(B, 128), 2), 128)))
    Bp = _round_up(B, tile_b)
    x_mlp = jnp.pad(y2, ((0, K1p - y2.shape[0]), (0, Bp - B)))
    logits_t = mlp_pallas(x_mlp.astype(jnp.bfloat16), prep, tile_b)

    return logits_t[:n_classes, :B].T


# pure-JAX reference (same bf16-input / fp32-accumulate recipe) for sanity check
def _reference_forward(params, x):
    def conv_relu_pool(x, w, b):
        y = jax.lax.conv_general_dilated(
            x.astype(jnp.bfloat16), w.astype(jnp.bfloat16),
            window_strides=(1, 1), padding="VALID",
            dimension_numbers=("NCHW", "OIHW", "NCHW"),
            preferred_element_type=jnp.float32)
        y = jnp.maximum(y + b.reshape(1, -1, 1, 1), 0.0)
        y = jax.lax.reduce_window(y, -jnp.inf, jax.lax.max,
                                  (1, 1, 2, 2), (1, 1, 2, 2), "VALID")
        return y.astype(jnp.bfloat16)

    x1 = conv_relu_pool(x, params["conv1_w"], params["conv1_b"])
    x2 = conv_relu_pool(x1, params["conv2_w"], params["conv2_b"])
    x2f = x2.reshape(x2.shape[0], -1)
    h = jnp.dot(x2f, params["fc1_w"].T.astype(jnp.bfloat16),
                preferred_element_type=jnp.float32) + params["fc1_b"]
    h = jnp.maximum(h, 0.0)
    h = jnp.dot(h.astype(jnp.bfloat16), params["fc2_w"].T.astype(jnp.bfloat16),
                preferred_element_type=jnp.float32) + params["fc2_b"]
    h = jnp.maximum(h, 0.0)
    return jnp.dot(h.astype(jnp.bfloat16), params["fc_w"].T.astype(jnp.bfloat16),
                   preferred_element_type=jnp.float32) + params["fc_b"]


if __name__ == "__main__":
    n_classes = 100
    batch = 2
    key = jax.random.PRNGKey(0)
    k_params, k_x = jax.random.split(key)

    params = init_params(k_params, n_classes)
    prep = prepare_params(params)
    # The 16*5*5 flatten in the module forces CIFAR-sized 3x32x32 inputs.
    x = jax.random.normal(k_x, (batch, 3, 32, 32), dtype=jnp.float32)

    fwd = jax.jit(lambda p, xx: net_cifar100_forward(p, xx, n_classes))
    out = jax.block_until_ready(fwd(prep, x))
    assert out.shape == (batch, n_classes), out.shape
    assert bool(jnp.all(jnp.isfinite(out)))

    ref = jax.block_until_ready(jax.jit(_reference_forward)(params, x))
    max_err = float(jnp.max(jnp.abs(out - ref)))
    assert jnp.allclose(out, ref, rtol=3e-2, atol=3e-2), max_err

    print("KERNEL_OK")
</pallas_src>

<mosaic_0001>
module attributes {stable_mosaic.version = 11 : i64} {
  func.func @_conv_relu_pool_kernel(%arg0: i32, %arg1: memref<4x80x256xbf16, #tpu.memory_space<vmem>>, %arg2: memref<8x80xbf16, #tpu.memory_space<vmem>>, %arg3: memref<8x1xf32, #tpu.memory_space<vmem>>, %arg4: memref<8x256xbf16, #tpu.memory_space<vmem>>) attributes {dimension_semantics = [#tpu.dimension_semantics<parallel>], iteration_bounds = array<i64: 2>, scalar_prefetch = 0 : i64, scratch_operands = 0 : i64, tpu.core_type = #tpu.core_type<tc>, window_params = [{transform_indices = @transform_0, window_bounds = array<i64: 4, 80, 256>}, {pipeline_mode = #tpu.pipeline_mode<synchronous>, transform_indices = @transform_1, window_bounds = array<i64: 8, 80>}, {pipeline_mode = #tpu.pipeline_mode<synchronous>, transform_indices = @transform_2, window_bounds = array<i64: 8, 1>}, {transform_indices = @transform_3, window_bounds = array<i64: 8, 256>}]} {
    %c0 = arith.constant 0 : index
    %c0_0 = arith.constant 0 : index
    %0 = vector.load %arg2[%c0, %c0_0] : memref<8x80xbf16, #tpu.memory_space<vmem>>, vector<8x80xbf16>
    %c0_1 = arith.constant 0 : index
    %c0_2 = arith.constant 0 : index
    %c0_3 = arith.constant 0 : index
    %1 = vector.load %arg1[%c0_1, %c0_2, %c0_3] : memref<4x80x256xbf16, #tpu.memory_space<vmem>>, vector<1x80x256xbf16>
    %2 = vector.shape_cast %1 : vector<1x80x256xbf16> to vector<80x256xbf16>
    %cst = arith.constant dense<0.000000e+00> : vector<8x256xf32>
    %3 = tpu.matmul %0, %2, %cst {dimension_numbers = #tpu.dot_dimension_numbers<[1], [0], [0], [1], [0, 0, 1, 1], [], []>} : vector<8x80xbf16>, vector<80x256xbf16>, vector<8x256xf32> -> vector<8x256xf32>
    %c1 = arith.constant 1 : index
    %c0_4 = arith.constant 0 : index
    %c0_5 = arith.constant 0 : index
    %4 = vector.load %arg1[%c1, %c0_4, %c0_5] : memref<4x80x256xbf16, #tpu.memory_space<vmem>>, vector<1x80x256xbf16>
    %5 = vector.shape_cast %4 : vector<1x80x256xbf16> to vector<80x256xbf16>
    %cst_6 = arith.constant dense<0.000000e+00> : vector<8x256xf32>
    %6 = tpu.matmul %0, %5, %cst_6 {dimension_numbers = #tpu.dot_dimension_numbers<[1], [0], [0], [1], [0, 0, 1, 1], [], []>} : vector<8x80xbf16>, vector<80x256xbf16>, vector<8x256xf32> -> vector<8x256xf32>
    %7 = arith.maximumf %3, %6 : vector<8x256xf32>
    %c2 = arith.constant 2 : index
    %c0_7 = arith.constant 0 : index
    %c0_8 = arith.constant 0 : index
    %8 = vector.load %arg1[%c2, %c0_7, %c0_8] : memref<4x80x256xbf16, #tpu.memory_space<vmem>>, vector<1x80x256xbf16>
    %9 = vector.shape_cast %8 : vector<1x80x256xbf16> to vector<80x256xbf16>
    %cst_9 = arith.constant dense<0.000000e+00> : vector<8x256xf32>
    %10 = tpu.matmul %0, %9, %cst_9 {dimension_numbers = #tpu.dot_dimension_numbers<[1], [0], [0], [1], [0, 0, 1, 1], [], []>} : vector<8x80xbf16>, vector<80x256xbf16>, vector<8x256xf32> -> vector<8x256xf32>
    %11 = arith.maximumf %7, %10 : vector<8x256xf32>
    %c3 = arith.constant 3 : index
    %c0_10 = arith.constant 0 : index
    %c0_11 = arith.constant 0 : index
    %12 = vector.load %arg1[%c3, %c0_10, %c0_11] : memref<4x80x256xbf16, #tpu.memory_space<vmem>>, vector<1x80x256xbf16>
    %13 = vector.shape_cast %12 : vector<1x80x256xbf16> to vector<80x256xbf16>
    %cst_12 = arith.constant dense<0.000000e+00> : vector<8x256xf32>
    %14 = tpu.matmul %0, %13, %cst_12 {dimension_numbers = #tpu.dot_dimension_numbers<[1], [0], [0], [1], [0, 0, 1, 1], [], []>} : vector<8x80xbf16>, vector<80x256xbf16>, vector<8x256xf32> -> vector<8x256xf32>
    %15 = arith.maximumf %11, %14 : vector<8x256xf32>
    %c0_13 = arith.constant 0 : index
    %c0_14 = arith.constant 0 : index
    %16 = vector.load %arg3[%c0_13, %c0_14] : memref<8x1xf32, #tpu.memory_space<vmem>>, vector<8x1xf32>
    %17 = vector.broadcast %16 : vector<8x1xf32> to vector<8x256xf32>
    %18 = arith.addf %15, %17 : vector<8x256xf32>
    %cst_15 = arith.constant 0.000000e+00 : f32
    %19 = vector.broadcast %cst_15 : f32 to vector<8x256xf32>
    %20 = arith.maximumf %18, %19 : vector<8x256xf32>
    %21 = arith.truncf %20 : vector<8x256xf32> to vector<8x256xbf16>
    %c0_16 = arith.constant 0 : index
    %c0_17 = arith.constant 0 : index
    %22 = vector.load %arg4[%c0_16, %c0_17] : memref<8x256xbf16, #tpu.memory_space<vmem>>, vector<8x256xbf16>
    tpu.vector_store %arg4[%c0_16, %c0_17], %21 {strides = array<i32>} : memref<8x256xbf16, #tpu.memory_space<vmem>>, vector<8x256xbf16>,
    return
  }
  func.func @transform_0(%arg0: i32) -> (i32, i32, i32) {
    %c0_i32 = arith.constant 0 : i32
    %c0_i32_0 = arith.constant 0 : i32
    %c0_i32_1 = arith.constant 0 : i32
    return %c0_i32, %c0_i32_0, %arg0 : i32, i32, i32
  }
  func.func @transform_1(%arg0: i32) -> (i32, i32) {
    %c0_i32 = arith.constant 0 : i32
    %c0_i32_0 = arith.constant 0 : i32
    %c0_i32_1 = arith.constant 0 : i32
    return %c0_i32, %c0_i32_0 : i32, i32
  }
  func.func @transform_2(%arg0: i32) -> (i32, i32) {
    %c0_i32 = arith.constant 0 : i32
    %c0_i32_0 = arith.constant 0 : i32
    %c0_i32_1 = arith.constant 0 : i32
    return %c0_i32, %c0_i32_0 : i32, i32
  }
  func.func @transform_3(%arg0: i32) -> (i32, i32) {
    %c0_i32 = arith.constant 0 : i32
    %c0_i32_0 = arith.constant 0 : i32
    return %c0_i32, %arg0 : i32, i32
  }
}

module attributes {stable_mosaic.version = 11 : i64} {
  func.func @_conv_relu_pool_kernel(%arg0: i32, %arg1: memref<4x160x128xbf16, #tpu.memory_space<vmem>>, %arg2: memref<16x160xbf16, #tpu.memory_space<vmem>>, %arg3: memref<16x1xf32, #tpu.memory_space<vmem>>, %arg4: memref<16x128xbf16, #tpu.memory_space<vmem>>) attributes {dimension_semantics = [#tpu.dimension_semantics<parallel>], iteration_bounds = array<i64: 1>, scalar_prefetch = 0 : i64, scratch_operands = 0 : i64, tpu.core_type = #tpu.core_type<tc>, window_params = [{transform_indices = @transform_0, window_bounds = array<i64: 4, 160, 128>}, {pipeline_mode = #tpu.pipeline_mode<synchronous>, transform_indices = @transform_1, window_bounds = array<i64: 16, 160>}, {pipeline_mode = #tpu.pipeline_mode<synchronous>, transform_indices = @transform_2, window_bounds = array<i64: 16, 1>}, {transform_indices = @transform_3, window_bounds = array<i64: 16, 128>}]} {
    %c0 = arith.constant 0 : index
    %c0_0 = arith.constant 0 : index
    %0 = vector.load %arg2[%c0, %c0_0] : memref<16x160xbf16, #tpu.memory_space<vmem>>, vector<16x160xbf16>
    %c0_1 = arith.constant 0 : index
    %c0_2 = arith.constant 0 : index
    %c0_3 = arith.constant 0 : index
    %1 = vector.load %arg1[%c0_1, %c0_2, %c0_3] : memref<4x160x128xbf16, #tpu.memory_space<vmem>>, vector<1x160x128xbf16>
    %2 = vector.shape_cast %1 : vector<1x160x128xbf16> to vector<160x128xbf16>
    %cst = arith.constant dense<0.000000e+00> : vector<16x128xf32>
    %3 = tpu.matmul %0, %2, %cst {dimension_numbers = #tpu.dot_dimension_numbers<[1], [0], [0], [1], [0, 0, 1, 1], [], []>} : vector<16x160xbf16>, vector<160x128xbf16>, vector<16x128xf32> -> vector<16x128xf32>
    %c1 = arith.constant 1 : index
    %c0_4 = arith.constant 0 : index
    %c0_5 = arith.constant 0 : index
    %4 = vector.load %arg1[%c1, %c0_4, %c0_5] : memref<4x160x128xbf16, #tpu.memory_space<vmem>>, vector<1x160x128xbf16>
    %5 = vector.shape_cast %4 : vector<1x160x128xbf16> to vector<160x128xbf16>
    %cst_6 = arith.constant dense<0.000000e+00> : vector<16x128xf32>
    %6 = tpu.matmul %0, %5, %cst_6 {dimension_numbers = #tpu.dot_dimension_numbers<[1], [0], [0], [1], [0, 0, 1, 1], [], []>} : vector<16x160xbf16>, vector<160x128xbf16>, vector<16x128xf32> -> vector<16x128xf32>
    %7 = arith.maximumf %3, %6 : vector<16x128xf32>
    %c2 = arith.constant 2 : index
    %c0_7 = arith.constant 0 : index
    %c0_8 = arith.constant 0 : index
    %8 = vector.load %arg1[%c2, %c0_7, %c0_8] : memref<4x160x128xbf16, #tpu.memory_space<vmem>>, vector<1x160x128xbf16>
    %9 = vector.shape_cast %8 : vector<1x160x128xbf16> to vector<160x128xbf16>
    %cst_9 = arith.constant dense<0.000000e+00> : vector<16x128xf32>
    %10 = tpu.matmul %0, %9, %cst_9 {dimension_numbers = #tpu.dot_dimension_numbers<[1], [0], [0], [1], [0, 0, 1, 1], [], []>} : vector<16x160xbf16>, vector<160x128xbf16>, vector<16x128xf32> -> vector<16x128xf32>
    %11 = arith.maximumf %7, %10 : vector<16x128xf32>
    %c3 = arith.constant 3 : index
    %c0_10 = arith.constant 0 : index
    %c0_11 = arith.constant 0 : index
    %12 = vector.load %arg1[%c3, %c0_10, %c0_11] : memref<4x160x128xbf16, #tpu.memory_space<vmem>>, vector<1x160x128xbf16>
    %13 = vector.shape_cast %12 : vector<1x160x128xbf16> to vector<160x128xbf16>
    %cst_12 = arith.constant dense<0.000000e+00> : vector<16x128xf32>
    %14 = tpu.matmul %0, %13, %cst_12 {dimension_numbers = #tpu.dot_dimension_numbers<[1], [0], [0], [1], [0, 0, 1, 1], [], []>} : vector<16x160xbf16>, vector<160x128xbf16>, vector<16x128xf32> -> vector<16x128xf32>
    %15 = arith.maximumf %11, %14 : vector<16x128xf32>
    %c0_13 = arith.constant 0 : index
    %c0_14 = arith.constant 0 : index
    %16 = vector.load %arg3[%c0_13, %c0_14] : memref<16x1xf32, #tpu.memory_space<vmem>>, vector<16x1xf32>
    %17 = vector.broadcast %16 : vector<16x1xf32> to vector<16x128xf32>
    %18 = arith.addf %15, %17 : vector<16x128xf32>
    %cst_15 = arith.constant 0.000000e+00 : f32
    %19 = vector.broadcast %cst_15 : f32 to vector<16x128xf32>
    %20 = arith.maximumf %18, %19 : vector<16x128xf32>
    %21 = arith.truncf %20 : vector<16x128xf32> to vector<16x128xbf16>
    %c0_16 = arith.constant 0 : index
    %c0_17 = arith.constant 0 : index
    %22 = vector.load %arg4[%c0_16, %c0_17] : memref<16x128xbf16, #tpu.memory_space<vmem>>, vector<16x128xbf16>
    tpu.vector_store %arg4[%c0_16, %c0_17], %21 {strides = array<i32>} : memref<16x128xbf16, #tpu.memory_space<vmem>>, vector<16x128xbf16>,
    return
  }
  func.func @transform_0(%arg0: i32) -> (i32, i32, i32) {
    %c0_i32 = arith.constant 0 : i32
    %c0_i32_0 = arith.constant 0 : i32
    %c0_i32_1 = arith.constant 0 : i32
    return %c0_i32, %c0_i32_0, %arg0 : i32, i32, i32
  }
  func.func @transform_1(%arg0: i32) -> (i32, i32) {
    %c0_i32 = arith.constant 0 : i32
    %c0_i32_0 = arith.constant 0 : i32
    %c0_i32_1 = arith.constant 0 : i32
    return %c0_i32, %c0_i32_0 : i32, i32
  }
  func.func @transform_2(%arg0: i32) -> (i32, i32) {
    %c0_i32 = arith.constant 0 : i32
    %c0_i32_0 = arith.constant 0 : i32
    %c0_i32_1 = arith.constant 0 : i32
    return %c0_i32, %c0_i32_0 : i32, i32
  }
  func.func @transform_3(%arg0: i32) -> (i32, i32) {
    %c0_i32 = arith.constant 0 : i32
    %c0_i32_0 = arith.constant 0 : i32
    return %c0_i32, %arg0 : i32, i32
  }
}

module attributes {stable_mosaic.version = 11 : i64} {
  func.func @_mlp_kernel(%arg0: i32, %arg1: memref<512x128xbf16, #tpu.memory_space<vmem>>, %arg2: memref<128x512xbf16, #tpu.memory_space<vmem>>, %arg3: memref<128x1xf32, #tpu.memory_space<vmem>>, %arg4: memref<512x128xbf16, #tpu.memory_space<vmem>>, %arg5: memref<512x1xf32, #tpu.memory_space<vmem>>, %arg6: memref<128x512xbf16, #tpu.memory_space<vmem>>, %arg7: memref<128x1xf32, #tpu.memory_space<vmem>>, %arg8: memref<128x128xf32, #tpu.memory_space<vmem>>) attributes {dimension_semantics = [#tpu.dimension_semantics<parallel>], iteration_bounds = array<i64: 1>, scalar_prefetch = 0 : i64, scratch_operands = 0 : i64, tpu.core_type = #tpu.core_type<tc>, window_params = [{transform_indices = @transform_0, window_bounds = array<i64: 512, 128>}, {pipeline_mode = #tpu.pipeline_mode<synchronous>, transform_indices = @transform_1, window_bounds = array<i64: 128, 512>}, {pipeline_mode = #tpu.pipeline_mode<synchronous>, transform_indices = @transform_2, window_bounds = array<i64: 128, 1>}, {pipeline_mode = #tpu.pipeline_mode<synchronous>, transform_indices = @transform_3, window_bounds = array<i64: 512, 128>}, {pipeline_mode = #tpu.pipeline_mode<synchronous>, transform_indices = @transform_4, window_bounds = array<i64: 512, 1>}, {pipeline_mode = #tpu.pipeline_mode<synchronous>, transform_indices = @transform_5, window_bounds = array<i64: 128, 512>}, {pipeline_mode = #tpu.pipeline_mode<synchronous>, transform_indices = @transform_6, window_bounds = array<i64: 128, 1>}, {transform_indices = @transform_7, window_bounds = array<i64: 128, 128>}]} {
    %c0 = arith.constant 0 : index
    %c0_0 = arith.constant 0 : index
    %0 = vector.load %arg2[%c0, %c0_0] : memref<128x512xbf16, #tpu.memory_space<vmem>>, vector<128x512xbf16>
    %c0_1 = arith.constant 0 : index
    %c0_2 = arith.constant 0 : index
    %1 = vector.load %arg1[%c0_1, %c0_2] : memref<512x128xbf16, #tpu.memory_space<vmem>>, vector<512x128xbf16>
    %cst = arith.constant dense<0.000000e+00> : vector<128x128xf32>
    %2 = tpu.matmul %0, %1, %cst {dimension_numbers = #tpu.dot_dimension_numbers<[1], [0], [0], [1], [0, 0, 1, 1], [], []>} : vector<128x512xbf16>, vector<512x128xbf16>, vector<128x128xf32> -> vector<128x128xf32>
    %c0_3 = arith.constant 0 : index
    %c0_4 = arith.constant 0 : index
    %3 = vector.load %arg3[%c0_3, %c0_4] : memref<128x1xf32, #tpu.memory_space<vmem>>, vector<128x1xf32>
    %4 = vector.broadcast %3 : vector<128x1xf32> to vector<128x128xf32>
    %5 = arith.addf %2, %4 : vector<128x128xf32>
    %cst_5 = arith.constant 0.000000e+00 : f32
    %6 = vector.broadcast %cst_5 : f32 to vector<128x128xf32>
    %7 = arith.maximumf %5, %6 : vector<128x128xf32>
    %c0_6 = arith.constant 0 : index
    %c0_7 = arith.constant 0 : index
    %8 = vector.load %arg4[%c0_6, %c0_7] : memref<512x128xbf16, #tpu.memory_space<vmem>>, vector<512x128xbf16>
    %9 = arith.truncf %7 : vector<128x128xf32> to vector<128x128xbf16>
    %cst_8 = arith.constant dense<0.000000e+00> : vector<512x128xf32>
    %10 = tpu.matmul %8, %9, %cst_8 {dimension_numbers = #tpu.dot_dimension_numbers<[1], [0], [0], [1], [0, 0, 1, 1], [], []>} : vector<512x128xbf16>, vector<128x128xbf16>, vector<512x128xf32> -> vector<512x128xf32>
    %c0_9 = arith.constant 0 : index
    %c0_10 = arith.constant 0 : index
    %11 = vector.load %arg5[%c0_9, %c0_10] : memref<512x1xf32, #tpu.memory_space<vmem>>, vector<512x1xf32>
    %12 = vector.broadcast %11 : vector<512x1xf32> to vector<512x128xf32>
    %13 = arith.addf %10, %12 : vector<512x128xf32>
    %cst_11 = arith.constant 0.000000e+00 : f32
    %14 = vector.broadcast %cst_11 : f32 to vector<512x128xf32>
    %15 = arith.maximumf %13, %14 : vector<512x128xf32>
    %c0_12 = arith.constant 0 : index
    %c0_13 = arith.constant 0 : index
    %16 = vector.load %arg6[%c0_12, %c0_13] : memref<128x512xbf16, #tpu.memory_space<vmem>>, vector<128x512xbf16>
    %17 = arith.truncf %15 : vector<512x128xf32> to vector<512x128xbf16>
    %cst_14 = arith.constant dense<0.000000e+00> : vector<128x128xf32>
    %18 = tpu.matmul %16, %17, %cst_14 {dimension_numbers = #tpu.dot_dimension_numbers<[1], [0], [0], [1], [0, 0, 1, 1], [], []>} : vector<128x512xbf16>, vector<512x128xbf16>, vector<128x128xf32> -> vector<128x128xf32>
    %c0_15 = arith.constant 0 : index
    %c0_16 = arith.constant 0 : index
    %19 = vector.load %arg7[%c0_15, %c0_16] : memref<128x1xf32, #tpu.memory_space<vmem>>, vector<128x1xf32>
    %20 = vector.broadcast %19 : vector<128x1xf32> to vector<128x128xf32>
    %21 = arith.addf %18, %20 : vector<128x128xf32>
    %c0_17 = arith.constant 0 : index
    %c0_18 = arith.constant 0 : index
    %22 = vector.load %arg8[%c0_17, %c0_18] : memref<128x128xf32, #tpu.memory_space<vmem>>, vector<128x128xf32>
    tpu.vector_store %arg8[%c0_17, %c0_18], %21 {strides = array<i32>} : memref<128x128xf32, #tpu.memory_space<vmem>>, vector<128x128xf32>,
    return
  }
  func.func @transform_0(%arg0: i32) -> (i32, i32) {
    %c0_i32 = arith.constant 0 : i32
    %c0_i32_0 = arith.constant 0 : i32
    return %c0_i32, %arg0 : i32, i32
  }
  func.func @transform_1(%arg0: i32) -> (i32, i32) {
    %c0_i32 = arith.constant 0 : i32
    %c0_i32_0 = arith.constant 0 : i32
    %c0_i32_1 = arith.constant 0 : i32
    return %c0_i32, %c0_i32_0 : i32, i32
  }
  func.func @transform_2(%arg0: i32) -> (i32, i32) {
    %c0_i32 = arith.constant 0 : i32
    %c0_i32_0 = arith.constant 0 : i32
    %c0_i32_1 = arith.constant 0 : i32
    return %c0_i32, %c0_i32_0 : i32, i32
  }
  func.func @transform_3(%arg0: i32) -> (i32, i32) {
    %c0_i32 = arith.constant 0 : i32
    %c0_i32_0 = arith.constant 0 : i32
    %c0_i32_1 = arith.constant 0 : i32
    return %c0_i32, %c0_i32_0 : i32, i32
  }
  func.func @transform_4(%arg0: i32) -> (i32, i32) {
    %c0_i32 = arith.constant 0 : i32
    %c0_i32_0 = arith.constant 0 : i32
    %c0_i32_1 = arith.constant 0 : i32
    return %c0_i32, %c0_i32_0 : i32, i32
  }
  func.func @transform_5(%arg0: i32) -> (i32, i32) {
    %c0_i32 = arith.constant 0 : i32
    %c0_i32_0 = arith.constant 0 : i32
    %c0_i32_1 = arith.constant 0 : i32
    return %c0_i32, %c0_i32_0 : i32, i32
  }
  func.func @transform_6(%arg0: i32) -> (i32, i32) {
    %c0_i32 = arith.constant 0 : i32
    %c0_i32_0 = arith.constant 0 : i32
    %c0_i32_1 = arith.constant 0 : i32
    return %c0_i32, %c0_i32_0 : i32, i32
  }
  func.func @transform_7(%arg0: i32) -> (i32, i32) {
    %c0_i32 = arith.constant 0 : i32
    %c0_i32_0 = arith.constant 0 : i32
    return %c0_i32, %arg0 : i32, i32
  }
}

</mosaic_0001>

<bundles_post_ra>
// kernel: _lambda_.3
= control target key start
LH: loop header
LB: loop body
LE: loop exit
PB: predicated region body
PF: predicated region fallthrough
CT: control target
= control target key end

     0   :  { %s1121_s12 = smov 0   ;;  %s1123_s13 = smov 0   ;;  %s1363_s0 = inlined_call_operand.vmem [shape: bf16[4,80,512], index: 0, kind: input, shape index: {}]   ;;  %s1364_s1 = inlined_call_operand.vmem [shape: bf16[8,80], index: 1, kind: input, shape index: {}]   ;;  %s1365_s2 = inlined_call_operand.vmem [shape: f32[8,1], index: 2, kind: input, shape index: {}]   ;;  %s1366_s3 = inlined_call_operand.vmem [shape: bf16[8,512], index: 3, kind: output, shape index: {}]  }
   0x1   :  { %s1125_s14 = smov 0  }
   0x2 LB: > { %s798_s15 = sadd.s32 4294967295, %s1098_s14   ;;  %s1138_s16 = sadd.s32 1, %s1098_s14   ;;  %s1098_s14 = sphi %s1125_s14, %s1369_s14   ;;  %s1094_s13 = sphi %s1123_s13, %s1368_s13   ;;  %s1090_s12 = sphi %s1121_s12, %s1367_s12  }
   0x3   : > { %s17_s17 = ssub.s32 %s1098_s14, %s1138_s16  ;;  %s20_s18 = sadd.s32 1, %s1094_s13 }
   0x4   : > { %p18_p0 = scmp.eq.s32.totalorder %s17_s17, 0  ;;  %p27_p1 = scmp.ne.s32.totalorder %s1094_s13, %s1090_s12 }
   0x5   : > { %p28_p2 = scmp.eq.s32.totalorder %s1098_s14, 0  ;;  %p801_p4 = scmp.ge.s32.totalorder %s1098_s14, 2 }
   0x6   : > { %s1147_s19 = scalar_select %p18_p0, %s1094_s13, %s20_s18  }
   0x7   : > { %p29_p3 = por %p28_p2, %p27_p1  ;;  %127 = sbr.rel (%p801_p4) target bundleno = 56 (0x38), region = 24 }
   0xc   : > { %130 = sbr.rel (!%p29_p3) target bundleno = 56 (0x38), region = 28  ;;  %s132_s20 = sand.u32 (%p29_p3), 1, %s1094_s13  }
   0xd   : > { %s1007_s21 = sshll.u32 (%p29_p3), %s1098_s14, 3  ;;  %s1048_s22 = smul.u32 (%p29_p3), 320, %s132_s20 }
   0xe   : > { %s1155_s25 = scalar_lea.vmem (%p29_p3), %s1363_s0, %s1007_s21 }
   0xf   : > { %v244_v0 = vld [vmem:[%s1155_s25] sm:$0xff] (%p29_p3)  ;;  %v246_v1 = vld [vmem:[%s1155_s25 + $0x10] sm:$0xff] (%p29_p3)  ;;  %s1160_s26 = scalar_lea.vmem (%p29_p3), [#allocation2], %s1048_s22 }
  0x10   : > { %v248_v2 = vld [vmem:[%s1155_s25 + $0x20] sm:$0xff] (%p29_p3)  ;;  %245 = vst [vmem:[%s1160_s26] sm:$0xff] (%p29_p3), %v244_v0  ;;  %v250_v3 = vld [vmem:[%s1155_s25 + $0x30] sm:$0xff] (%p29_p3) }
  0x11   : > { %247 = vst [vmem:[%s1160_s26 + $0x8] sm:$0xff] %v246_v1  ;;  %v252_v4 = vld [vmem:[%s1155_s25 + $0x40] sm:$0xff]  ;;  %v254_v5 = vld [vmem:[%s1155_s25 + $0x50] sm:$0xff] }
  0x12   : > { %249 = vst [vmem:[%s1160_s26 + $0x10] sm:$0xff] %v248_v2  ;;  %v256_v6 = vld [vmem:[%s1155_s25 + $0x60] sm:$0xff]  ;;  %v258_v7 = vld [vmem:[%s1155_s25 + $0x70] sm:$0xff] }
  0x13   : > { %251 = vst [vmem:[%s1160_s26 + $0x18] sm:$0xff] %v250_v3  ;;  %v260_v8 = vld [vmem:[%s1155_s25 + $0x80] sm:$0xff]  ;;  %v262_v9 = vld [vmem:[%s1155_s25 + $0x90] sm:$0xff] }
  0x14   : > { %253 = vst [vmem:[%s1160_s26 + $0x20] sm:$0xff] %v252_v4  ;;  %v264_v10 = vld [vmem:[%s1155_s25 + $0xa0] sm:$0xff]  ;;  %v266_v11 = vld [vmem:[%s1155_s25 + $0xb0] sm:$0xff] }
  0x15   : > { %255 = vst [vmem:[%s1160_s26 + $0x28] sm:$0xff] %v254_v5  ;;  %v268_v12 = vld [vmem:[%s1155_s25 + $0xc0] sm:$0xff]  ;;  %v270_v13 = vld [vmem:[%s1155_s25 + $0xd0] sm:$0xff] }
  0x16   : > { %257 = vst [vmem:[%s1160_s26 + $0x30] sm:$0xff] %v256_v6  ;;  %v272_v14 = vld [vmem:[%s1155_s25 + $0xe0] sm:$0xff]  ;;  %v274_v15 = vld [vmem:[%s1155_s25 + $0xf0] sm:$0xff] }
  0x17   : > { %259 = vst [vmem:[%s1160_s26 + $0x38] sm:$0xff] %v258_v7  ;;  %v276_v16 = vld [vmem:[%s1155_s25 + $0x100] sm:$0xff]  ;;  %v278_v17 = vld [vmem:[%s1155_s25 + $0x110] sm:$0xff] }
  0x18   : > { %261 = vst [vmem:[%s1160_s26 + $0x40] sm:$0xff] %v260_v8  ;;  %v280_v18 = vld [vmem:[%s1155_s25 + $0x120] sm:$0xff]  ;;  %v282_v19 = vld [vmem:[%s1155_s25 + $0x130] sm:$0xff] }
  0x19   : > { %263 = vst [vmem:[%s1160_s26 + $0x48] sm:$0xff] %v262_v9  ;;  %v284_v20 = vld [vmem:[%s1155_s25 + $0x140] sm:$0xff]  ;;  %v286_v21 = vld [vmem:[%s1155_s25 + $0x150] sm:$0xff] }
  0x1a   : > { %265 = vst [vmem:[%s1160_s26 + $0x50] sm:$0xff] %v264_v10  ;;  %v288_v22 = vld [vmem:[%s1155_s25 + $0x160] sm:$0xff]  ;;  %v290_v23 = vld [vmem:[%s1155_s25 + $0x170] sm:$0xff] }
  0x1b   : > { %267 = vst [vmem:[%s1160_s26 + $0x58] sm:$0xff] %v266_v11  ;;  %v292_v24 = vld [vmem:[%s1155_s25 + $0x180] sm:$0xff]  ;;  %v294_v25 = vld [vmem:[%s1155_s25 + $0x190] sm:$0xff] }
  0x1c   : > { %269 = vst [vmem:[%s1160_s26 + $0x60] sm:$0xff] %v268_v12  ;;  %v296_v26 = vld [vmem:[%s1155_s25 + $0x1a0] sm:$0xff]  ;;  %v298_v27 = vld [vmem:[%s1155_s25 + $0x1b0] sm:$0xff] }
  0x1d   : > { %271 = vst [vmem:[%s1160_s26 + $0x68] sm:$0xff] %v270_v13  ;;  %v300_v28 = vld [vmem:[%s1155_s25 + $0x1c0] sm:$0xff]  ;;  %v302_v29 = vld [vmem:[%s1155_s25 + $0x1d0] sm:$0xff] }
  0x1e   : > { %273 = vst [vmem:[%s1160_s26 + $0x70] sm:$0xff] %v272_v14  ;;  %v304_v30 = vld [vmem:[%s1155_s25 + $0x1e0] sm:$0xff]  ;;  %v306_v31 = vld [vmem:[%s1155_s25 + $0x1f0] sm:$0xff] }
  0x1f   : > { %275 = vst [vmem:[%s1160_s26 + $0x78] sm:$0xff] %v274_v15  ;;  %v308_v32 = vld [vmem:[%s1155_s25 + $0x200] sm:$0xff]  ;;  %v310_v33 = vld [vmem:[%s1155_s25 + $0x210] sm:$0xff] }
  0x20   : > { %277 = vst [vmem:[%s1160_s26 + $0x80] sm:$0xff] %v276_v16  ;;  %v312_v34 = vld [vmem:[%s1155_s25 + $0x220] sm:$0xff]  ;;  %v314_v35 = vld [vmem:[%s1155_s25 + $0x230] sm:$0xff] }
  0x21   : > { %279 = vst [vmem:[%s1160_s26 + $0x88] sm:$0xff] %v278_v17  ;;  %v316_v36 = vld [vmem:[%s1155_s25 + $0x240] sm:$0xff]  ;;  %v318_v37 = vld [vmem:[%s1155_s25 + $0x250] sm:$0xff] }
  0x22   : > { %281 = vst [vmem:[%s1160_s26 + $0x90] sm:$0xff] %v280_v18  ;;  %v320_v38 = vld [vmem:[%s1155_s25 + $0x260] sm:$0xff]  ;;  %v322_v39 = vld [vmem:[%s1155_s25 + $0x270] sm:$0xff] }
  0x23   : > { %283 = vst [vmem:[%s1160_s26 + $0x98] sm:$0xff] %v282_v19 }
  0x24   : > { %285 = vst [vmem:[%s1160_s26 + $0xa0] sm:$0xff] %v284_v20 }
  0x25   : > { %287 = vst [vmem:[%s1160_s26 + $0xa8] sm:$0xff] %v286_v21 }
  0x26   : > { %289 = vst [vmem:[%s1160_s26 + $0xb0] sm:$0xff] %v288_v22 }
  0x27   : > { %291 = vst [vmem:[%s1160_s26 + $0xb8] sm:$0xff] %v290_v23 }
  0x28   : > { %293 = vst [vmem:[%s1160_s26 + $0xc0] sm:$0xff] %v292_v24 }
  0x29   : > { %295 = vst [vmem:[%s1160_s26 + $0xc8] sm:$0xff] %v294_v25 }
  0x2a   : > { %297 = vst [vmem:[%s1160_s26 + $0xd0] sm:$0xff] %v296_v26 }
  0x2b   : > { %299 = vst [vmem:[%s1160_s26 + $0xd8] sm:$0xff] %v298_v27 }
  0x2c   : > { %301 = vst [vmem:[%s1160_s26 + $0xe0] sm:$0xff] %v300_v28 }
  0x2d   : > { %303 = vst [vmem:[%s1160_s26 + $0xe8] sm:$0xff] %v302_v29 }
  0x2e   : > { %305 = vst [vmem:[%s1160_s26 + $0xf0] sm:$0xff] %v304_v30 }
  0x2f   : > { %307 = vst [vmem:[%s1160_s26 + $0xf8] sm:$0xff] %v306_v31 }
  0x30   : > { %309 = vst [vmem:[%s1160_s26 + $0x100] sm:$0xff] %v308_v32 }
  0x31   : > { %311 = vst [vmem:[%s1160_s26 + $0x108] sm:$0xff] %v310_v33 }
  0x32   : > { %313 = vst [vmem:[%s1160_s26 + $0x110] sm:$0xff] %v312_v34 }
  0x33   : > { %315 = vst [vmem:[%s1160_s26 + $0x118] sm:$0xff] %v314_v35 }
  0x34   : > { %317 = vst [vmem:[%s1160_s26 + $0x120] sm:$0xff] %v316_v36 }
  0x35   : > { %319 = vst [vmem:[%s1160_s26 + $0x128] sm:$0xff] %v318_v37 }
  0x36   : > { %321 = vst [vmem:[%s1160_s26 + $0x130] sm:$0xff] %v320_v38 }
  0x37   : > { %323 = vst [vmem:[%s1160_s26 + $0x138] sm:$0xff] %v322_v39 }
  0x38 PF: > { %p804_p5 = scmp.ge.s32.totalorder %s1098_s14, 1  ;;  %p328_p6 = scmp.lt.s32.totalorder %s1098_s14, 3 }
  0x3a   : > { %p329_p7 = pnand %p804_p5, %p328_p6 }
  0x3b   : > { %s335_s27 = sand.u32 (!%p329_p7), 1, %s1090_s12   ;;  %s805_s7 = sshll.u32 (!%p329_p7), %s798_s15, 1 }
  0x3c   : > { %332 = sbr.rel (%p329_p7) target bundleno = 250 (0xfa), region = 66  ;;  %p360_p8 = scmp.lt.s32.totalorder (!%p329_p7), %s805_s7, 3 }
  0x3d   : > { %s1049_s28 = smul.u32 (!%p329_p7), 320, %s335_s27 }
  0x3f   : > { %s1242_s29 = scalar_lea.vmem (!%p329_p7), [#allocation2], %s1049_s28 }
  0x41   : > { %v841_v40 = vld [vmem:[%s1242_s29 + $0x40] sm:$0xf]  ;;  %v1017_v41 = vld [vmem:[%s1242_s29 + $0x44] sm:$0xf0]  ;;  %v1016_v42 = vld [vmem:[%s1242_s29 + $0x44] sm:$0xf] }
  0x42   : > { %v842_v43 = vor.u32 %v1017_v41, %v841_v40  ;;  %v843_v44 = vld [vmem:[%s1242_s29 + $0x48] sm:$0xf0]  ;;  %v893_v45 = vld [vmem:[%s1242_s29 + $0x90] sm:$0xf]  ;;  %v1027_v46 = vld [vmem:[%s1242_s29 + $0x94] sm:$0xf0] }
  0x43   : > { %v846_v47 = vor.u32 %v1016_v42, %v843_v44  ;;  %v894_v48 = vor.u32 %v1027_v46, %v893_v45  ;;  %v1026_v49 = vld [vmem:[%s1242_s29 + $0x94] sm:$0xf]  ;;  %v895_v50 = vld [vmem:[%s1242_s29 + $0x98] sm:$0xf0]  ;;  %v833_v51 = vld [vmem:[%s1242_s29 + $0x30] sm:$0xf] }
  0x44   : > { %434 = vmatpush.bf16.msra.mxu0 %v842_v43  ;;  %v898_v52 = vor.u32 %v1026_v49, %v895_v50  ;;  %v1015_v53 = vld [vmem:[%s1242_s29 + $0x34] sm:$0xf0]  ;;  %v1014_v54 = vld [vmem:[%s1242_s29 + $0x34] sm:$0xf]  ;;  %v835_v55 = vld [vmem:[%s1242_s29 + $0x38] sm:$0xf0] }
  0x45   : > { %447 = vmatpush.bf16.msra.mxu1 %v846_v47  ;;  %521 = vmatpush.bf16.msra.mxu2 %v894_v48  ;;  %v834_v56 = vor.u32 %v1015_v53, %v833_v51  ;;  %v838_v57 = vor.u32 %v1014_v54, %v835_v55  ;;  %v885_v58 = vld [vmem:[%s1242_s29 + $0x80] sm:$0xf]  ;;  %v1025_v59 = vld [vmem:[%s1242_s29 + $0x84] sm:$0xf0]  ;;  %v1024_v60 = vld [vmem:[%s1242_s29 + $0x84] sm:$0xf] }
  0x46   : > { %534 = vmatpush.bf16.msra.mxu3 %v898_v52  ;;  %v886_v61 = vor.u32 %v1025_v59, %v885_v58  ;;  %v887_v62 = vld [vmem:[%s1242_s29 + $0x88] sm:$0xf0]  ;;  %v825_v63 = vld [vmem:[%s1242_s29 + $0x20] sm:$0xf]  ;;  %v1013_v0 = vld [vmem:[%s1242_s29 + $0x24] sm:$0xf0] }
  0x47   : > { %v890_v1 = vor.u32 %v1024_v60, %v887_v62  ;;  %v1012_v2 = vld [vmem:[%s1242_s29 + $0x24] sm:$0xf]  ;;  %v827_v3 = vld [vmem:[%s1242_s29 + $0x28] sm:$0xf0]  ;;  %v877_v4 = vld [vmem:[%s1242_s29 + $0x70] sm:$0xf]  ;;  %v826_v5 = vor.u32 %v1013_v0, %v825_v63 }
  0x48   : > { %435 = vmatpush.bf16.msra.mxu0 %v834_v56  ;;  %v1023_v6 = vld [vmem:[%s1242_s29 + $0x74] sm:$0xf0]  ;;  %v1022_v7 = vld [vmem:[%s1242_s29 + $0x74] sm:$0xf]  ;;  %v879_v8 = vld [vmem:[%s1242_s29 + $0x78] sm:$0xf0]  ;;  %v830_v9 = vor.u32 %v1012_v2, %v827_v3 }
  0x49   : > { %448 = vmatpush.bf16.msra.mxu1 %v838_v57  ;;  %522 = vmatpush.bf16.msra.mxu2 %v886_v61  ;;  %v878_v10 = vor.u32 %v1023_v6, %v877_v4  ;;  %v817_v11 = vld [vmem:[%s1242_s29 + $0x10] sm:$0xf]  ;;  %v1011_v12 = vld [vmem:[%s1242_s29 + $0x14] sm:$0xf0]  ;;  %v1010_v13 = vld [vmem:[%s1242_s29 + $0x14] sm:$0xf]  ;;  %v882_v14 = vor.u32 %v1022_v7, %v879_v8 }
  0x4a   : > { %535 = vmatpush.bf16.msra.mxu3 %v890_v1  ;;  %v819_v15 = vld [vmem:[%s1242_s29 + $0x18] sm:$0xf0]  ;;  %v869_v16 = vld [vmem:[%s1242_s29 + $0x60] sm:$0xf]  ;;  %v1021_v17 = vld [vmem:[%s1242_s29 + $0x64] sm:$0xf0]  ;;  %v818_v20 = vor.u32 %v1011_v12, %v817_v11 }
  0x4b   : > { %v1020_v18 = vld [vmem:[%s1242_s29 + $0x64] sm:$0xf]  ;;  %v871_v19 = vld [vmem:[%s1242_s29 + $0x68] sm:$0xf0]  ;;  %v809_v21 = vld [vmem:[%s1242_s29] sm:$0xf]  ;;  %v822_v23 = vor.u32 %v1010_v13, %v819_v15  ;;  %v870_v24 = vor.u32 %v1021_v17, %v869_v16 }
  0x4c   : > { %436 = vmatpush.bf16.msra.mxu0 %v826_v5  ;;  %v1009_v22 = vld [vmem:[%s1242_s29 + $0x4] sm:$0xf0]  ;;  %v1008_v25 = vld [vmem:[%s1242_s29 + $0x4] sm:$0xf]  ;;  %v811_v26 = vld [vmem:[%s1242_s29 + $0x8] sm:$0xf0]  ;;  %v874_v28 = vor.u32 %v1020_v18, %v871_v19 }
  0x4d   : > { %449 = vmatpush.bf16.msra.mxu1 %v830_v9  ;;  %523 = vmatpush.bf16.msra.mxu2 %v878_v10  ;;  %v861_v27 = vld [vmem:[%s1242_s29 + $0x50] sm:$0xf]  ;;  %v1019_v29 = vld [vmem:[%s1242_s29 + $0x54] sm:$0xf0]  ;;  %v1018_v30 = vld [vmem:[%s1242_s29 + $0x54] sm:$0xf]  ;;  %v810_v35 = vor.u32 %v1009_v22, %v809_v21  ;;  %v814_v39 = vor.u32 %v1008_v25, %v811_v26 }
  0x4e   : > { %536 = vmatpush.bf16.msra.mxu3 %v882_v14  ;;  %v863_v31 = vld [vmem:[%s1242_s29 + $0x58] sm:$0xf0]  ;;  %v945_v32 = vld [vmem:[%s1242_s29 + $0xe0] sm:$0xf]  ;;  %v1037_v33 = vld [vmem:[%s1242_s29 + $0xe4] sm:$0xf0]  ;;  %v862_v40 = vor.u32 %v1019_v29, %v861_v27 }
  0x4f   : > { %v1036_v34 = vld [vmem:[%s1242_s29 + $0xe4] sm:$0xf]  ;;  %v947_v36 = vld [vmem:[%s1242_s29 + $0xe8] sm:$0xf0]  ;;  %v997_v37 = vld [vmem:[%s1242_s29 + $0x130] sm:$0xf]  ;;  %v866_v43 = vor.u32 %v1018_v30, %v863_v31  ;;  %v946_v44 = vor.u32 %v1037_v33, %v945_v32 }
  0x50   : > { %437 = vmatpush.bf16.msra.mxu0 %v818_v20  ;;  %v1047_v38 = vld [vmem:[%s1242_s29 + $0x134] sm:$0xf0]  ;;  %v1046_v41 = vld [vmem:[%s1242_s29 + $0x134] sm:$0xf]  ;;  %v999_v42 = vld [vmem:[%s1242_s29 + $0x138] sm:$0xf0]  ;;  %v950_v45 = vor.u32 %v1036_v34, %v947_v36 }
  0x51   : > { %450 = vmatpush.bf16.msra.mxu1 %v822_v23  ;;  %524 = vmatpush.bf16.msra.mxu2 %v870_v24  ;;  %v998_v46 = vor.u32 %v1047_v38, %v997_v37  ;;  %v1295_v47 = vld [vmem:[%s1364_s1] sm:$0xf]  ;;  %v937_v48 = vld [vmem:[%s1242_s29 + $0xd0] sm:$0xf]  ;;  %v1035_v49 = vld [vmem:[%s1242_s29 + $0xd4] sm:$0xf0]  ;;  %v1002_v51 = vor.u32 %v1046_v41, %v999_v42 }
  0x52   : > { %537 = vmatpush.bf16.msra.mxu3 %v874_v28  ;;  %v1034_v50 = vld [vmem:[%s1242_s29 + $0xd4] sm:$0xf]  ;;  %v939_v52 = vld [vmem:[%s1242_s29 + $0xd8] sm:$0xf0]  ;;  %v989_v53 = vld [vmem:[%s1242_s29 + $0x120] sm:$0xf]  ;;  %v938_v57 = vor.u32 %v1035_v49, %v937_v48 }
  0x53   : > { %v1045_v54 = vld [vmem:[%s1242_s29 + $0x124] sm:$0xf0]  ;;  %vm427_vm0 = vcmask 654336   ;;  %v1044_v55 = vld [vmem:[%s1242_s29 + $0x124] sm:$0xf]  ;;  %v942_v58 = vor.u32 %v1034_v50, %v939_v52  ;;  %v1100_v16 = vmov 0  }
  0x54   : > { %438 = vmatpush.bf16.msra.mxu0 %v810_v35  ;;  %v991_v56 = vld [vmem:[%s1242_s29 + $0x128] sm:$0xf0]  ;;  %v990_v59 = vor.u32 %v1045_v54, %v989_v53  ;;  %v929_v60 = vld [vmem:[%s1242_s29 + $0xc0] sm:$0xf]  ;;  %v1033_v61 = vld [vmem:[%s1242_s29 + $0xc4] sm:$0xf0]  ;;  %1075 = vset.pattern.permute.xlu0 %v1100_v16 }
  0x55   : > { %451 = vmatpush.bf16.msra.mxu1 %v814_v39  ;;  %525 = vmatpush.bf16.msra.mxu2 %v862_v40  ;;  %v1032_v62 = vld [vmem:[%s1242_s29 + $0xc4] sm:$0xf]  ;;  %v994_v63 = vor.u32 %v1044_v55, %v991_v56  ;;  %v931_v0 = vld [vmem:[%s1242_s29 + $0xc8] sm:$0xf0]  ;;  %v981_v1 = vld [vmem:[%s1242_s29 + $0x110] sm:$0xf]  ;;  %v930_v5 = vor.u32 %v1033_v61, %v929_v60 }
  0x56   : > { %538 = vmatpush.bf16.msra.mxu3 %v866_v43  ;;  %v1043_v2 = vld [vmem:[%s1242_s29 + $0x114] sm:$0xf0]  ;;  %v1042_v3 = vld [vmem:[%s1242_s29 + $0x114] sm:$0xf]  ;;  %v983_v4 = vld [vmem:[%s1242_s29 + $0x118] sm:$0xf0]  ;;  %v934_v7 = vor.u32 %v1032_v62, %v931_v0 }
  0x57   : > { %847 = vmatmul.msk.bf16.vlgmr.msra.gmra.mxu0 %vm427_vm0, %v1295_v47  ;;  %v921_v6 = vld [vmem:[%s1242_s29 + $0xb0] sm:$0xf]  ;;  %v982_v8 = vor.u32 %v1043_v2, %v981_v1  ;;  %v1031_v9 = vld [vmem:[%s1242_s29 + $0xb4] sm:$0xf0]  ;;  %v1030_v10 = vld [vmem:[%s1242_s29 + $0xb4] sm:$0xf]  ;;  %v986_v12 = vor.u32 %v1042_v3, %v983_v4 }
  0x58   : > { %610 = vmatpush.bf16.msrb.mxu0 %v946_v44  ;;  %848 = vmatmul.msk.bf16.vlgmr.msra.gmra.mxu1 %vm427_vm0, %v1295_v47  ;;  %v724_v11 = vld [vmem:[%s1365_s2] sm:$0xff]  ;;  %v923_v13 = vld [vmem:[%s1242_s29 + $0xb8] sm:$0xf0]  ;;  %v1041_v15 = vld [vmem:[%s1242_s29 + $0x104] sm:$0xf0]  ;;  %v922_v19 = vor.u32 %v1031_v9, %v921_v6  ;;  %s1371_s7 = smov (!%p360_p8, %s805_s7), 3 }
  0x59   : > { %623 = vmatpush.bf16.msrb.mxu1 %v950_v45  ;;  %699 = vmatpush.bf16.msrb.mxu2 %v998_v46  ;;  %v973_v14 = vld [vmem:[%s1242_s29 + $0x100] sm:$0xf]  ;;  %v1040_v17 = vld [vmem:[%s1242_s29 + $0x104] sm:$0xf]  ;;  %v975_v18 = vld [vmem:[%s1242_s29 + $0x108] sm:$0xf0]  ;;  %v926_v20 = vor.u32 %v1030_v10, %v923_v13 }
  0x5a   : > { %712 = vmatpush.bf16.msrb.mxu3 %v1002_v51  ;;  %899 = vmatmul.msk.bf16.vlgmr.msra.gmra.mxu2 %vm427_vm0, %v1295_v47  ;;  %v974_v21 = vor.u32 %v1041_v15, %v973_v14  ;;  %v913_v22 = vld [vmem:[%s1242_s29 + $0xa0] sm:$0xf]  ;;  %v1029_v23 = vld [vmem:[%s1242_s29 + $0xa4] sm:$0xf0]  ;;  %v1028_v24 = vld [vmem:[%s1242_s29 + $0xa4] sm:$0xf]  ;;  %v978_v25 = vor.u32 %v1040_v17, %v975_v18 }
  0x5b   : > { %900 = vmatmul.msk.bf16.vlgmr.msra.gmra.mxu3 %vm427_vm0, %v1295_v47  ;;  %727 = vperm.xlu0 %1075, %v724_v11   ;;  %v915_v26 = vld [vmem:[%s1242_s29 + $0xa8] sm:$0xf0]  ;;  %v965_v27 = vld [vmem:[%s1242_s29 + $0xf0] sm:$0xf]  ;;  %v1039_v28 = vld [vmem:[%s1242_s29 + $0xf4] sm:$0xf0]  ;;  %v914_v31 = vor.u32 %v1029_v23, %v913_v22 }
  0x5c   : > { %611 = vmatpush.bf16.msrb.mxu0 %v938_v57  ;;  %v1038_v29 = vld [vmem:[%s1242_s29 + $0xf4] sm:$0xf]  ;;  %v967_v30 = vld [vmem:[%s1242_s29 + $0xf8] sm:$0xf0]  ;;  %v918_v32 = vor.u32 %v1028_v24, %v915_v26  ;;  %v966_v33 = vor.u32 %v1039_v28, %v965_v27  ;;  %s806_s8 = sshll.u32 %s1371_s7, 2 }
  0x5d   : > { %624 = vmatpush.bf16.msrb.mxu1 %v942_v58  ;;  %700 = vmatpush.bf16.msrb.mxu2 %v990_v59  ;;  %v970_v34 = vor.u32 %v1038_v29, %v967_v30  ;;  %s363_s11 = scalar_lea.vmem %s1366_s3, %s806_s8 }
  0x5e   : > { %713 = vmatpush.bf16.msrb.mxu3 %v994_v63 }
  0x60   : > { %612 = vmatpush.bf16.msrb.mxu0 %v930_v5 }
  0x61   : > { %625 = vmatpush.bf16.msrb.mxu1 %v934_v7  ;;  %701 = vmatpush.bf16.msrb.mxu2 %v982_v8 }
  0x62   : > { %714 = vmatpush.bf16.msrb.mxu3 %v986_v12 }
  0x64   : > { %613 = vmatpush.bf16.msrb.mxu0 %v922_v19 }
  0x65   : > { %626 = vmatpush.bf16.msrb.mxu1 %v926_v20  ;;  %702 = vmatpush.bf16.msrb.mxu2 %v974_v21 }
  0x66   : > { %715 = vmatpush.bf16.msrb.mxu3 %v978_v25 }
  0x68   : > { %614 = vmatpush.bf16.msrb.mxu0 %v914_v31 }
  0x69   : > { %627 = vmatpush.bf16.msrb.mxu1 %v918_v32  ;;  %703 = vmatpush.bf16.msrb.mxu2 %v966_v33 }
  0x6a   : > { %716 = vmatpush.bf16.msrb.mxu3 %v970_v34 }
  0x6b   : > { %951 = vmatmul.msk.bf16.vlgmr.msrb.gmra.mxu0 %vm427_vm0, %v1295_v47 }
  0x6c   : > { %952 = vmatmul.msk.bf16.vlgmr.msrb.gmra.mxu1 %vm427_vm0, %v1295_v47  ;;  %1003 = vmatmul.msk.bf16.vlgmr.msrb.gmra.mxu2 %vm427_vm0, %v1295_v47 }
  0x6d   : > { %1004 = vmatmul.msk.bf16.vlgmr.msrb.gmra.mxu3 %vm427_vm0, %v1295_v47 }
  0xcd   : > { %v728_v51 = vpop.permute.xlu0 %727 }
  0xd4   : > { %v440_v35 = vpop.f32.mrf.mxu0 }
  0xd5   : > { %v453_v36 = vpop.f32.mrf.mxu1 }
  0xdc   : > { %v442_v39 = vpop.f32.mrf.mxu0 }
  0xdd   : > { %v527_v37 = vpop.f32.mrf.mxu2  ;;  %v455_v40 = vpop.f32.mrf.mxu1 }
  0xde   : > { %v540_v38 = vpop.f32.mrf.mxu3  ;;  %v544_v45 = vmax.f32 %v440_v35, %v527_v37 }
  0xdf   : > { %v545_v46 = vmax.f32 %v453_v36, %v540_v38 }
  0xe5   : > { %v529_v41 = vpop.f32.mrf.mxu2 }
  0xe6   : > { %v542_v42 = vpop.f32.mrf.mxu3 }
  0xe8   : > { %v616_v43 = vpop.f32.mrf.mxu0 }
  0xe9   : > { %v629_v44 = vpop.f32.mrf.mxu1  ;;  %v633_v48 = vmax.f32 %v544_v45, %v616_v43 }
  0xea   : > { %v634_v49 = vmax.f32 %v545_v46, %v629_v44 }
  0xef   : > { %v705_v50 = vpop.f32.mrf.mxu2 }
  0xf0   : > { %v722_v47 = vmax.f32 %v633_v48, %v705_v50  ;;  %v718_v52 = vpop.f32.mrf.mxu3  ;;  %v618_v53 = vpop.f32.mrf.mxu0 }
  0xf1   : > { %v723_v54 = vmax.f32 %v634_v49, %v718_v52  ;;  %v631_v55 = vpop.f32.mrf.mxu1 }
  0xf2   : > { %v730_v56 = vadd.f32 %v728_v51, %v722_v47 }
  0xf3   : > { %v731_v57 = vadd.f32 %v728_v51, %v723_v54 }
  0xf4   : > { %v732_v58 = vmax.f32 %v730_v56, 0.0 }
  0xf5   : > { %v733_v59 = vmax.f32 %v731_v57, 0.0 }
  0xf7   : > { %v734_v60 = vpack.c.bf16 %v733_v59, %v732_v58  ;;  %v707_v61 = vpop.f32.mrf.mxu2 }
  0xf8   : > { %v720_v62 = vpop.f32.mrf.mxu3 }
  0xf9   : > { %735 = vst [vmem:[%s363_s11] sm:$0xff] %v734_v60 }
  0xfa PF: > { %p10_p9 = scmp.ge.s32.totalorder %s1138_s16, 4   ;;  %s1367_s12 = smov %s1094_s13 }
  0xfb   : > { %s1368_s13 = smov %s1147_s19  ;;  %s1369_s14 = smov %s1138_s16 }
  0xfc   :  { %12 = sbr.rel (!%p10_p9) target bundleno = 2 (0x2), region = 108 }

// kernel: _lambda_.4
= control target key start
LH: loop header
LB: loop body
LE: loop exit
PB: predicated region body
PF: predicated region fallthrough
CT: control target
= control target key end

     0   :  { %vm106_vm0 = vcmask 261120   ;;  %v776_v29 = vmov 0   ;;  %s948_s0 = inlined_call_operand.vmem [shape: bf16[4,160,128], index: 0, kind: input, shape index: {}]   ;;  %s949_s1 = inlined_call_operand.vmem [shape: bf16[16,160], index: 1, kind: input, shape index: {}]   ;;  %s950_s2 = inlined_call_operand.vmem [shape: f32[16,1], index: 2, kind: input, shape index: {}]   ;;  %s951_s3 = inlined_call_operand.vmem [shape: bf16[16,128], index: 3, kind: output, shape index: {}]  }
   0x1   :  { %v736_v0 = vld [vmem:[%s948_s0 + $0x38] sm:$0xff]  ;;  %v738_v1 = vld [vmem:[%s948_s0 + $0x48] sm:$0xff]  ;;  %v735_v3 = vld [vmem:[%s948_s0 + $0x30] sm:$0xff]  ;;  %775 = vset.pattern.permute.xlu0 %v776_v29 }
   0x2   :  { %v746_v2 = vld [vmem:[%s948_s0 + $0x88] sm:$0xff]  ;;  %110 = vmatpush.bf16.msra.mxu0 %v736_v0  ;;  %130 = vmatpush.bf16.msra.mxu1 %v738_v1  ;;  %v737_v4 = vld [vmem:[%s948_s0 + $0x40] sm:$0xff]  ;;  %v756_v7 = vld [vmem:[%s948_s0 + $0xd8] sm:$0xff] }
   0x3   :  { %v758_v5 = vld [vmem:[%s948_s0 + $0xe8] sm:$0xff]  ;;  %219 = vmatpush.bf16.msra.mxu2 %v746_v2  ;;  %v745_v6 = vld [vmem:[%s948_s0 + $0x80] sm:$0xff]  ;;  %v744_v11 = vld [vmem:[%s948_s0 + $0x78] sm:$0xff] }
   0x4   :  { %350 = vmatpush.bf16.msra.mxu3 %v758_v5  ;;  %v757_v8 = vld [vmem:[%s948_s0 + $0xe0] sm:$0xff]  ;;  %v766_v9 = vld [vmem:[%s948_s0 + $0x128] sm:$0xff]  ;;  %v755_v12 = vld [vmem:[%s948_s0 + $0xd0] sm:$0xff] }
   0x5   :  { %v734_v10 = vld [vmem:[%s948_s0 + $0x28] sm:$0xff]  ;;  %v727_v13 = vld [vmem:[%s949_s1 + $0x4] sm:$0xf]  ;;  %v743_v18 = vld [vmem:[%s948_s0 + $0x70] sm:$0xff] }
   0x6   :  { %111 = vmatpush.bf16.msra.mxu0 %v735_v3  ;;  %131 = vmatpush.bf16.msra.mxu1 %v737_v4  ;;  %v499_v14 = vld [vmem:[%s949_s1 + $0x8] sm:$0xf0]  ;;  %v765_v16 = vld [vmem:[%s948_s0 + $0x120] sm:$0xff]  ;;  %v764_v20 = vld [vmem:[%s948_s0 + $0x118] sm:$0xff] }
   0x7   :  { %220 = vmatpush.bf16.msra.mxu2 %v745_v6  ;;  %v842_v15 = vor.u32 %v727_v13, %v499_v14  ;;  %v733_v17 = vld [vmem:[%s948_s0 + $0x20] sm:$0xff]  ;;  %v754_v19 = vld [vmem:[%s948_s0 + $0xc8] sm:$0xff]  ;;  %v732_v21 = vld [vmem:[%s948_s0 + $0x18] sm:$0xff] }
   0x8   :  { %351 = vmatpush.bf16.msra.mxu3 %v757_v8  ;;  %v742_v22 = vld [vmem:[%s948_s0 + $0x68] sm:$0xff]  ;;  %v753_v23 = vld [vmem:[%s948_s0 + $0xc0] sm:$0xff]  ;;  %v763_v24 = vld [vmem:[%s948_s0 + $0x110] sm:$0xff] }
   0x9   :  { %543 = vmatmul.msk.bf16.vlgmr.msra.gmra.mxu1 %vm106_vm0, %v842_v15  ;;  %v731_v25 = vld [vmem:[%s948_s0 + $0x10] sm:$0xff]  ;;  %v471_v26 = vld [vmem:[%s950_s2] sm:$0xff]  ;;  %v752_v28 = vld [vmem:[%s948_s0 + $0xb8] sm:$0xff] }
   0xa   :  { %330 = vmatpush.bf16.msrb.mxu1 %v756_v7  ;;  %112 = vmatpush.bf16.msra.mxu0 %v734_v10  ;;  %v741_v27 = vld [vmem:[%s948_s0 + $0x60] sm:$0xff]  ;;  %v762_v30 = vld [vmem:[%s948_s0 + $0x108] sm:$0xff]  ;;  %v740_v32 = vld [vmem:[%s948_s0 + $0x58] sm:$0xff] }
   0xb   :  { %221 = vmatpush.bf16.msra.mxu2 %v744_v11  ;;  %665 = vmatmul.msk.bf16.vlgmr.msra.gmra.mxu3 %vm106_vm0, %v842_v15  ;;  %v730_v31 = vld [vmem:[%s948_s0 + $0x8] sm:$0xff]  ;;  %v751_v33 = vld [vmem:[%s948_s0 + $0xb0] sm:$0xff]  ;;  %v729_v34 = vld [vmem:[%s948_s0] sm:$0xff] }
   0xc   :  { %441 = vmatpush.bf16.msrb.mxu3 %v766_v9  ;;  %475 = vperm.xlu0 %775, %v471_v26   ;;  %v761_v35 = vld [vmem:[%s948_s0 + $0x100] sm:$0xff]  ;;  %v728_v37 = vld [vmem:[%s949_s1 + $0x4] sm:$0xf0]  ;;  %v739_v39 = vld [vmem:[%s948_s0 + $0x50] sm:$0xff] }
   0xd   :  { %v497_v36 = vld [vmem:[%s949_s1] sm:$0xf]  ;;  %v472_v38 = vld [vmem:[%s950_s2 + $0x8] sm:$0xff]  ;;  %v748_v41 = vld [vmem:[%s948_s0 + $0x98] sm:$0xff] }
   0xe   :  { %331 = vmatpush.bf16.msrb.mxu1 %v755_v12  ;;  %113 = vmatpush.bf16.msra.mxu0 %v733_v17  ;;  %v750_v40 = vld [vmem:[%s948_s0 + $0xa8] sm:$0xff]  ;;  %v768_v42 = vld [vmem:[%s948_s0 + $0x138] sm:$0xff]  ;;  %v498_v43 = vor.u32 %v728_v37, %v497_v36  ;;  %v749_v45 = vld [vmem:[%s948_s0 + $0xa0] sm:$0xff] }
   0xf   :  { %222 = vmatpush.bf16.msra.mxu2 %v743_v18  ;;  %v760_v44 = vld [vmem:[%s948_s0 + $0xf8] sm:$0xff]  ;;  %v747_v46 = vld [vmem:[%s948_s0 + $0x90] sm:$0xff] }
  0x10   :  { %442 = vmatpush.bf16.msrb.mxu3 %v765_v16  ;;  %v767_v47 = vld [vmem:[%s948_s0 + $0x130] sm:$0xff] }
  0x11   :  { %v759_v48 = vld [vmem:[%s948_s0 + $0xf0] sm:$0xff] }
  0x12   :  { %332 = vmatpush.bf16.msrb.mxu1 %v754_v19  ;;  %114 = vmatpush.bf16.msra.mxu0 %v732_v21 }
  0x13   :  { %223 = vmatpush.bf16.msra.mxu2 %v742_v22 }
  0x14   :  { %443 = vmatpush.bf16.msrb.mxu3 %v764_v20  ;;  %480 = vperm.xlu0 %775, %v472_v38  }
  0x16   :  { %333 = vmatpush.bf16.msrb.mxu1 %v753_v23  ;;  %115 = vmatpush.bf16.msra.mxu0 %v731_v25 }
  0x17   :  { %224 = vmatpush.bf16.msra.mxu2 %v741_v27 }
  0x18   :  { %444 = vmatpush.bf16.msrb.mxu3 %v763_v24 }
  0x1a   :  { %334 = vmatpush.bf16.msrb.mxu1 %v752_v28  ;;  %116 = vmatpush.bf16.msra.mxu0 %v730_v31 }
  0x1b   :  { %225 = vmatpush.bf16.msra.mxu2 %v740_v32 }
  0x1c   :  { %445 = vmatpush.bf16.msrb.mxu3 %v762_v30 }
  0x1e   :  { %335 = vmatpush.bf16.msrb.mxu1 %v751_v33  ;;  %117 = vmatpush.bf16.msra.mxu0 %v729_v34 }
  0x1f   :  { %226 = vmatpush.bf16.msra.mxu2 %v739_v39 }
  0x20   :  { %446 = vmatpush.bf16.msrb.mxu3 %v761_v35 }
  0x21   :  { %118 = vmatmul.bf16.vlgmr.msra.gmra.mxu0 %v498_v43 }
  0x22   :  { %336 = vmatpush.bf16.msrb.mxu1 %v750_v40  ;;  %461 = vmatpush.bf16.msrb.mxu0 %v768_v42 }
  0x23   :  { %239 = vmatpush.bf16.msrb.mxu2 %v748_v41 }
  0x24   :  { %447 = vmatpush.bf16.msrb.mxu3 %v760_v44  ;;  %227 = vmatmul.bf16.vlgmr.msra.gmra.mxu2 %v498_v43 }
  0x26   :  { %337 = vmatpush.bf16.msrb.mxu1 %v749_v45  ;;  %462 = vmatpush.bf16.msrb.mxu0 %v767_v47 }
  0x27   :  { %240 = vmatpush.bf16.msrb.mxu2 %v747_v46 }
  0x28   :  { %448 = vmatpush.bf16.msrb.mxu3 %v759_v48 }
  0x29   :  { %338 = vmatmul.bf16.vlgmr.msrb.gmra.mxu1 %v498_v43 }
  0x2b   :  { %449 = vmatmul.bf16.vlgmr.msrb.gmra.mxu3 %v498_v43 }
  0x31   :  { %726 = vmatmul.msk.bf16.vlgmr.msrb.gmra.mxu0 %vm106_vm0, %v842_v15 }
  0x34   :  { %604 = vmatmul.msk.bf16.vlgmr.msrb.gmra.mxu2 %vm106_vm0, %v842_v15 }
  0x7e   :  { %v476_v1 = vpop.permute.xlu0 %475 }
  0x86   :  { %v133_v49 = vpop.f32.mrf.mxu1  ;;  %v481_v17 = vpop.permute.xlu0 %480 }
  0x8e   :  { %v353_v50 = vpop.f32.mrf.mxu3  ;;  %v135_v53 = vpop.f32.mrf.mxu1 }
  0x96   :  { %v355_v54 = vpop.f32.mrf.mxu3 }
  0x9e   :  { %v119_v51 = vpop.f32.mrf.mxu0 }
  0x9f   :  { %v134_v61 = vadd.f32 %v133_v49, %v119_v51 }
  0xa6   :  { %v121_v55 = vpop.f32.mrf.mxu0  ;;  %v339_v57 = vpop.f32.mrf.mxu1 }
  0xa7   :  { %v228_v52 = vpop.f32.mrf.mxu2  ;;  %v354_v0 = vadd.f32 %v353_v50, %v339_v57  ;;  %v136_v6 = vadd.f32 %v135_v53, %v121_v55 }
  0xae   :  { %v450_v58 = vpop.f32.mrf.mxu3  ;;  %v464_v59 = vpop.f32.mrf.mxu0 }
  0xaf   :  { %v230_v56 = vpop.f32.mrf.mxu2  ;;  %v465_v2 = vadd.f32 %v464_v59, %v450_v58  ;;  %v341_v4 = vpop.f32.mrf.mxu1 }
  0xb0   :  { %v356_v10 = vadd.f32 %v355_v54, %v341_v4 }
  0xb6   :  { %v452_v8 = vpop.f32.mrf.mxu3  ;;  %v466_v9 = vpop.f32.mrf.mxu0 }
  0xb7   :  { %v242_v60 = vpop.f32.mrf.mxu2  ;;  %v467_v13 = vadd.f32 %v466_v9, %v452_v8 }
  0xb8   :  { %v243_v62 = vadd.f32 %v242_v60, %v228_v52 }
  0xba   :  { %v247_v63 = vmax.f32 %v134_v61, %v243_v62 }
  0xbc   :  { %v358_v3 = vmax.f32 %v247_v63, %v354_v0 }
  0xbe   :  { %v469_v11 = vmax.f32 %v358_v3, %v465_v2 }
  0xbf   :  { %v244_v5 = vpop.f32.mrf.mxu2 }
  0xc0   :  { %v245_v7 = vadd.f32 %v244_v5, %v230_v56  ;;  %v483_v15 = vadd.f32 %v476_v1, %v469_v11 }
  0xc2   :  { %v248_v12 = vmax.f32 %v136_v6, %v245_v7  ;;  %v485_v19 = vmax.f32 %v483_v15, 0.0 }
  0xc4   :  { %v359_v14 = vmax.f32 %v248_v12, %v356_v10 }
  0xc6   :  { %v470_v16 = vmax.f32 %v359_v14, %v467_v13 }
  0xc8   :  { %v484_v18 = vadd.f32 %v481_v17, %v470_v16 }
  0xca   :  { %v486_v20 = vmax.f32 %v484_v18, 0.0 }
  0xcc   :  { %v772_v21 = vpack.c.bf16 %v486_v20, %v485_v19 }
  0xce   :  { %773 = vst [vmem:[%s951_s3] sm:$0xff] %v772_v21  }

// kernel: _lambda_.5
= control target key start
LH: loop header
LB: loop body
LE: loop exit
PB: predicated region body
PF: predicated region fallthrough
CT: control target
= control target key end

     0   :  { %v2851_v1 = vmov 0   ;;  %s4171_s0 = inlined_call_operand.vmem [shape: bf16[512,128], index: 0, kind: input, shape index: {}]   ;;  %s4172_s2 = inlined_call_operand.vmem [shape: f32[128,1], index: 2, kind: input, shape index: {}]   ;;  %s4173_s1 = inlined_call_operand.vmem [shape: bf16[128,512], index: 1, kind: input, shape index: {}]   ;;  %s4174_s4 = inlined_call_operand.vmem [shape: f32[512,1], index: 4, kind: input, shape index: {}]   ;;  %s4175_s6 = inlined_call_operand.vmem [shape: f32[128,1], index: 6, kind: input, shape index: {}]   ;;  %s4176_s3 = inlined_call_operand.vmem [shape: bf16[512,128], index: 3, kind: input, shape index: {}]   ;;  %s4177_s5 = inlined_call_operand.vmem [shape: bf16[128,512], index: 5, kind: input, shape index: {}]   ;;  %s4178_s7 = inlined_call_operand.vmem [shape: f32[128,128], index: 7, kind: output, shape index: {}]  }
   0x1   :  { %v2750_v0 = vld [vmem:[%s4171_s0 + $0x38] sm:$0xff]  ;;  %2848 = vset.pattern.permute.xlu0 %v2851_v1  ;;  %2849 = vset.pattern.permute.xlu1 %v2851_v1  ;;  %v2749_v3 = vld [vmem:[%s4171_s0 + $0x30] sm:$0xff]  ;;  %v2748_v6 = vld [vmem:[%s4171_s0 + $0x28] sm:$0xff] }
   0x2   :  { %v2758_v2 = vld [vmem:[%s4171_s0 + $0x78] sm:$0xff]  ;;  %2850 = vset.pattern.permute.xlu2 %v2851_v1  ;;  %570 = vmatpush.bf16.msra.mxu2 %v2750_v0  ;;  %v136_v4 = vld [vmem:[%s4172_s2 + $0x70] sm:$0xff]  ;;  %v134_v7 = vld [vmem:[%s4172_s2 + $0x60] sm:$0xff] }
   0x3   :  { %619 = vmatpush.bf16.msra.mxu1 %v2758_v2  ;;  %v2757_v5 = vld [vmem:[%s4171_s0 + $0x70] sm:$0xff]  ;;  %210 = vperm.xlu0 %2848, %v136_v4   ;;  %v2756_v8 = vld [vmem:[%s4171_s0 + $0x68] sm:$0xff]  ;;  %v137_v9 = vld [vmem:[%s4172_s2 + $0x78] sm:$0xff] }
   0x4   :  { %200 = vperm.xlu1 %2849, %v134_v7   ;;  %v132_v10 = vld [vmem:[%s4172_s2 + $0x50] sm:$0xff]  ;;  %v2747_v11 = vld [vmem:[%s4171_s0 + $0x20] sm:$0xff]  ;;  %v135_v13 = vld [vmem:[%s4172_s2 + $0x68] sm:$0xff] }
   0x5   :  { %190 = vperm.xlu2 %2850, %v132_v10   ;;  %v2755_v12 = vld [vmem:[%s4171_s0 + $0x60] sm:$0xff]  ;;  %v2746_v14 = vld [vmem:[%s4171_s0 + $0x18] sm:$0xff]  ;;  %v2745_v18 = vld [vmem:[%s4171_s0 + $0x10] sm:$0xff] }
   0x6   :  { %571 = vmatpush.bf16.msra.mxu2 %v2749_v3  ;;  %v2754_v15 = vld [vmem:[%s4171_s0 + $0x58] sm:$0xff]  ;;  %v130_v16 = vld [vmem:[%s4172_s2 + $0x40] sm:$0xff]  ;;  %v2753_v19 = vld [vmem:[%s4171_s0 + $0x50] sm:$0xff] }
   0x7   :  { %620 = vmatpush.bf16.msra.mxu1 %v2757_v5  ;;  %v133_v17 = vld [vmem:[%s4172_s2 + $0x58] sm:$0xff]  ;;  %v131_v20 = vld [vmem:[%s4172_s2 + $0x48] sm:$0xff]  ;;  %v128_v23 = vld [vmem:[%s4172_s2 + $0x30] sm:$0xff] }
   0x8   :  { %v2744_v21 = vld [vmem:[%s4171_s0 + $0x8] sm:$0xff]  ;;  %v129_v24 = vld [vmem:[%s4172_s2 + $0x38] sm:$0xff]  ;;  %v2743_v25 = vld [vmem:[%s4171_s0] sm:$0xff] }
   0x9   :  { %v2752_v22 = vld [vmem:[%s4171_s0 + $0x48] sm:$0xff]  ;;  %v2201_v26 = vld [vmem:[%s4173_s1] sm:$0xf]  ;;  %v2713_v27 = vld [vmem:[%s4173_s1 + $0xc] sm:$0xf0] }
   0xa   :  { %572 = vmatpush.bf16.msra.mxu2 %v2748_v6  ;;  %v2751_v28 = vld [vmem:[%s4171_s0 + $0x40] sm:$0xff]  ;;  %v2203_v30 = vld [vmem:[%s4173_s1 + $0x10] sm:$0xf0]  ;;  %v2202_v32 = vor.u32 %v2713_v27, %v2201_v26  ;;  %v127_v35 = vld [vmem:[%s4172_s2 + $0x28] sm:$0xff] }
   0xb   :  { %621 = vmatpush.bf16.msra.mxu1 %v2756_v8  ;;  %215 = vperm.xlu0 %2848, %v137_v9   ;;  %v2711_v29 = vld [vmem:[%s4173_s1 + $0x4] sm:$0xf]  ;;  %v124_v34 = vld [vmem:[%s4172_s2 + $0x10] sm:$0xff]  ;;  %v125_v36 = vld [vmem:[%s4172_s2 + $0x18] sm:$0xff] }
   0xc   :  { %205 = vperm.xlu1 %2849, %v135_v13   ;;  %v126_v31 = vld [vmem:[%s4172_s2 + $0x20] sm:$0xff]  ;;  %v2206_v33 = vor.u32 %v2711_v29, %v2203_v30  ;;  %v123_v38 = vld [vmem:[%s4172_s2 + $0x8] sm:$0xff]  ;;  %v2717_v40 = vld [vmem:[%s4173_s1 + $0x2c] sm:$0xf0] }
   0xd   :  { %195 = vperm.xlu2 %2850, %v133_v17   ;;  %v122_v37 = vld [vmem:[%s4172_s2] sm:$0xff]  ;;  %v2219_v42 = vld [vmem:[%s4173_s1 + $0x30] sm:$0xf0]  ;;  %v857_v47 = vld [vmem:[%s4174_s4 + $0x18] sm:$0xff] }
   0xe   :  { %573 = vmatpush.bf16.msra.mxu2 %v2747_v11  ;;  %v2217_v39 = vld [vmem:[%s4173_s1 + $0x20] sm:$0xf]  ;;  %v2715_v41 = vld [vmem:[%s4173_s1 + $0x24] sm:$0xf]  ;;  %v856_v46 = vld [vmem:[%s4174_s4 + $0x10] sm:$0xff] }
   0xf   :  { %622 = vmatpush.bf16.msra.mxu1 %v2755_v12  ;;  %v854_v43 = vld [vmem:[%s4174_s4] sm:$0xff]  ;;  %v2218_v44 = vor.u32 %v2717_v40, %v2217_v39  ;;  %v2222_v45 = vor.u32 %v2715_v41, %v2219_v42  ;;  %v868_v48 = vld [vmem:[%s4174_s4 + $0x70] sm:$0xff]  ;;  %v869_v53 = vld [vmem:[%s4174_s4 + $0x78] sm:$0xff] }
  0x10   :  { %v2233_v49 = vld [vmem:[%s4173_s1 + $0x40] sm:$0xf]  ;;  %v2721_v50 = vld [vmem:[%s4173_s1 + $0x4c] sm:$0xf0]  ;;  %v2719_v51 = vld [vmem:[%s4173_s1 + $0x44] sm:$0xf] }
  0x11   :  { %v2235_v52 = vld [vmem:[%s4173_s1 + $0x50] sm:$0xf0]  ;;  %v2234_v54 = vor.u32 %v2721_v50, %v2233_v49  ;;  %v867_v56 = vld [vmem:[%s4174_s4 + $0x68] sm:$0xff]  ;;  %v862_v59 = vld [vmem:[%s4174_s4 + $0x40] sm:$0xff] }
  0x12   :  { %574 = vmatpush.bf16.msra.mxu2 %v2746_v14  ;;  %v2238_v55 = vor.u32 %v2719_v51, %v2235_v52  ;;  %v855_v57 = vld [vmem:[%s4174_s4 + $0x8] sm:$0xff]  ;;  %v864_v58 = vld [vmem:[%s4174_s4 + $0x50] sm:$0xff]  ;;  %v2249_v60 = vld [vmem:[%s4173_s1 + $0x60] sm:$0xf] }
  0x13   :  { %623 = vmatpush.bf16.msra.mxu1 %v2754_v15  ;;  %180 = vperm.xlu0 %2848, %v130_v16   ;;  %v2725_v61 = vld [vmem:[%s4173_s1 + $0x6c] sm:$0xf0]  ;;  %v2723_v62 = vld [vmem:[%s4173_s1 + $0x64] sm:$0xf]  ;;  %v2251_v63 = vld [vmem:[%s4173_s1 + $0x70] sm:$0xf0] }
  0x14   :  { %185 = vperm.xlu1 %2849, %v131_v20   ;;  %v863_v0 = vld [vmem:[%s4174_s4 + $0x48] sm:$0xff]  ;;  %v2250_v1 = vor.u32 %v2725_v61, %v2249_v60  ;;  %v2254_v2 = vor.u32 %v2723_v62, %v2251_v63  ;;  %v861_v3 = vld [vmem:[%s4174_s4 + $0x38] sm:$0xff]  ;;  %v858_v4 = vld [vmem:[%s4174_s4 + $0x20] sm:$0xff] }
  0x15   :  { %170 = vperm.xlu2 %2850, %v128_v23   ;;  %v2774_v5 = vld [vmem:[%s4171_s0 + $0xf8] sm:$0xff]  ;;  %v859_v6 = vld [vmem:[%s4174_s4 + $0x28] sm:$0xff]  ;;  %v2773_v7 = vld [vmem:[%s4171_s0 + $0xf0] sm:$0xff] }
  0x16   :  { %575 = vmatpush.bf16.msra.mxu2 %v2745_v18  ;;  %717 = vmatpush.bf16.msra.mxu3 %v2774_v5  ;;  %v866_v8 = vld [vmem:[%s4174_s4 + $0x60] sm:$0xff]  ;;  %v871_v9 = vld [vmem:[%s4174_s4 + $0x88] sm:$0xff]  ;;  %v2729_v11 = vld [vmem:[%s4173_s1 + $0x8c] sm:$0xf0] }
  0x17   :  { %624 = vmatpush.bf16.msra.mxu1 %v2753_v19  ;;  %v2265_v10 = vld [vmem:[%s4173_s1 + $0x80] sm:$0xf]  ;;  %v2727_v12 = vld [vmem:[%s4173_s1 + $0x84] sm:$0xf]  ;;  %v2267_v13 = vld [vmem:[%s4173_s1 + $0x90] sm:$0xf0] }
  0x18   :  { %v872_v14 = vld [vmem:[%s4174_s4 + $0x90] sm:$0xff]  ;;  %v2266_v15 = vor.u32 %v2729_v11, %v2265_v10  ;;  %v2270_v16 = vor.u32 %v2727_v12, %v2267_v13  ;;  %v2766_v17 = vld [vmem:[%s4171_s0 + $0xb8] sm:$0xff]  ;;  %v874_v18 = vld [vmem:[%s4174_s4 + $0xa0] sm:$0xff] }
  0x19   :  { %v865_v19 = vld [vmem:[%s4174_s4 + $0x58] sm:$0xff]  ;;  %v2772_v20 = vld [vmem:[%s4171_s0 + $0xe8] sm:$0xff]  ;;  %v2771_v23 = vld [vmem:[%s4171_s0 + $0xe0] sm:$0xff] }
  0x1a   :  { %576 = vmatpush.bf16.msra.mxu2 %v2744_v21  ;;  %718 = vmatpush.bf16.msra.mxu3 %v2773_v7  ;;  %v2765_v21 = vld [vmem:[%s4171_s0 + $0xb0] sm:$0xff]  ;;  %v877_v26 = vld [vmem:[%s4174_s4 + $0xb8] sm:$0xff]  ;;  %v2731_v30 = vld [vmem:[%s4173_s1 + $0xa4] sm:$0xf] }
  0x1b   :  { %625 = vmatpush.bf16.msra.mxu1 %v2752_v22  ;;  %175 = vperm.xlu0 %2848, %v129_v24   ;;  %v875_v22 = vld [vmem:[%s4174_s4 + $0xa8] sm:$0xff]  ;;  %v860_v24 = vld [vmem:[%s4174_s4 + $0x30] sm:$0xff]  ;;  %v2770_v27 = vld [vmem:[%s4171_s0 + $0xd8] sm:$0xff] }
  0x1c   :  { %160 = vperm.xlu1 %2849, %v126_v31   ;;  %v2733_v29 = vld [vmem:[%s4173_s1 + $0xac] sm:$0xf0]  ;;  %v2283_v31 = vld [vmem:[%s4173_s1 + $0xb0] sm:$0xf0]  ;;  %v870_v39 = vld [vmem:[%s4174_s4 + $0x80] sm:$0xff] }
  0x1d   :  { %165 = vperm.xlu2 %2850, %v127_v35   ;;  %v2768_v40 = vld [vmem:[%s4171_s0 + $0xc8] sm:$0xff]  ;;  %v2761_v41 = vld [vmem:[%s4171_s0 + $0x90] sm:$0xff]  ;;  %v2297_v50 = vld [vmem:[%s4173_s1 + $0xc0] sm:$0xf] }
  0x1e   :  { %577 = vmatpush.bf16.msra.mxu2 %v2743_v25  ;;  %719 = vmatpush.bf16.msra.mxu3 %v2772_v20  ;;  %v2764_v25 = vld [vmem:[%s4171_s0 + $0xa8] sm:$0xff]  ;;  %v900_v42 = vld [vmem:[%s4174_s4 + $0x170] sm:$0xff]  ;;  %v897_v10 = vld [vmem:[%s4174_s4 + $0x158] sm:$0xff] }
  0x1f   :  { %626 = vmatpush.bf16.msra.mxu1 %v2751_v28  ;;  %v2281_v28 = vld [vmem:[%s4173_s1 + $0xa0] sm:$0xf]  ;;  %v2737_v51 = vld [vmem:[%s4173_s1 + $0xcc] sm:$0xf0]  ;;  %v2315_v7 = vld [vmem:[%s4173_s1 + $0xf0] sm:$0xf0] }
  0x20   :  { %v2282_v35 = vor.u32 %v2733_v29, %v2281_v28  ;;  %v876_v60 = vld [vmem:[%s4174_s4 + $0xb0] sm:$0xff]  ;;  %v917_v13 = vld [vmem:[%s4174_s4 + $0x1f8] sm:$0xff]  ;;  %v895_v20 = vld [vmem:[%s4174_s4 + $0x148] sm:$0xff] }
  0x21   :  { %578 = vmatmul.bf16.vlgmr.msra.gmra.mxu2 %v2202_v32  ;;  %v2763_v32 = vld [vmem:[%s4171_s0 + $0xa0] sm:$0xff]  ;;  %v880_v62 = vld [vmem:[%s4174_s4 + $0xd0] sm:$0xff] }
  0x22   :  { %627 = vmatmul.bf16.vlgmr.msra.gmra.mxu1 %v2206_v33  ;;  %668 = vmatpush.bf16.msrb.mxu2 %v2766_v17  ;;  %v878_v33 = vld [vmem:[%s4174_s4 + $0xc0] sm:$0xff]  ;;  %v884_v63 = vld [vmem:[%s4174_s4 + $0xf0] sm:$0xff] }
  0x23   :  { %150 = vperm.xlu0 %2848, %v124_v34   ;;  %720 = vmatpush.bf16.msra.mxu3 %v2771_v23  ;;  %v2769_v34 = vld [vmem:[%s4171_s0 + $0xd0] sm:$0xff]  ;;  %v898_v17 = vld [vmem:[%s4174_s4 + $0x160] sm:$0xff]  ;;  %v2209_v23 = vld [vmem:[%s4173_s1 + $0x8] sm:$0xf] }
  0x24   :  { %155 = vperm.xlu1 %2849, %v125_v36   ;;  %v2286_v36 = vor.u32 %v2731_v30, %v2283_v31  ;;  %v2741_v5 = vld [vmem:[%s4173_s1 + $0xec] sm:$0xf0]  ;;  %v881_v30 = vld [vmem:[%s4174_s4 + $0xd8] sm:$0xff] }
  0x25   :  { %140 = vperm.xlu2 %2850, %v122_v37   ;;  %v2762_v37 = vld [vmem:[%s4171_s0 + $0x98] sm:$0xff]  ;;  %v892_v29 = vld [vmem:[%s4174_s4 + $0x130] sm:$0xff] }
  0x26   :  { %669 = vmatpush.bf16.msrb.mxu2 %v2765_v21  ;;  %v2243_v21 = vld [vmem:[%s4173_s1 + $0x58] sm:$0xf0] }
  0x27   :  { %721 = vmatpush.bf16.msra.mxu3 %v2770_v27 }
  0x2a   :  { %670 = vmatpush.bf16.msrb.mxu2 %v2764_v25 }
  0x2b   :  { %145 = vperm.xlu0 %2848, %v123_v38   ;;  %722 = vmatpush.bf16.msra.mxu3 %v2769_v34  ;;  %v885_v38 = vld [vmem:[%s4174_s4 + $0xf8] sm:$0xff] }
  0x2c   :  { %920 = vperm.xlu1 %2849, %v854_v43   ;;  %v2767_v43 = vld [vmem:[%s4171_s0 + $0xc0] sm:$0xff]  ;;  %v893_v34 = vld [vmem:[%s4174_s4 + $0x138] sm:$0xff] }
  0x2d   :  { %925 = vperm.xlu2 %2850, %v855_v57   ;;  %v2298_v57 = vor.u32 %v2737_v51, %v2297_v50  ;;  %v910_v51 = vld [vmem:[%s4174_s4 + $0x1c0] sm:$0xff] }
  0x2e   :  { %671 = vmatpush.bf16.msrb.mxu2 %v2763_v32 }
  0x2f   :  { %723 = vmatpush.bf16.msra.mxu3 %v2768_v40  ;;  %v913_v40 = vld [vmem:[%s4174_s4 + $0x1d8] sm:$0xff] }
  0x31   :  { %583 = vmatmul.bf16.gmra.mxu2 %v2218_v44  ;;  %v2712_v44 = vld [vmem:[%s4173_s1 + $0xc] sm:$0xf] }
  0x32   :  { %632 = vmatmul.bf16.gmra.mxu1 %v2222_v45  ;;  %672 = vmatpush.bf16.msrb.mxu2 %v2762_v37  ;;  %v2211_v45 = vld [vmem:[%s4173_s1 + $0x18] sm:$0xf0] }
  0x33   :  { %930 = vperm.xlu0 %2848, %v856_v46   ;;  %v873_v46 = vld [vmem:[%s4174_s4 + $0x98] sm:$0xff]  ;;  %724 = vmatpush.bf16.msra.mxu3 %v2767_v43  ;;  %v2214_v49 = vor.u32 %v2712_v44, %v2211_v45  ;;  %v2225_v44 = vld [vmem:[%s4173_s1 + $0x28] sm:$0xf] }
  0x34   :  { %935 = vperm.xlu1 %2849, %v857_v47   ;;  %v2760_v47 = vld [vmem:[%s4171_s0 + $0x88] sm:$0xff]  ;;  %v2718_v45 = vld [vmem:[%s4173_s1 + $0x34] sm:$0xf0] }
  0x35   :  { %940 = vperm.xlu2 %2850, %v858_v4   ;;  %v2313_v4 = vld [vmem:[%s4173_s1 + $0xe0] sm:$0xf] }
  0x36   :  { %673 = vmatpush.bf16.msrb.mxu2 %v2761_v41  ;;  %725 = vmatmul.bf16.vlgmr.msra.gmra.mxu3 %v2214_v49  ;;  %v2259_v41 = vld [vmem:[%s4173_s1 + $0x78] sm:$0xf0] }
  0x3a   :  { %674 = vmatpush.bf16.msrb.mxu2 %v2760_v47  ;;  %v2226_v47 = vor.u32 %v2718_v45, %v2225_v44  ;;  %v2736_v44 = vld [vmem:[%s4173_s1 + $0xcc] sm:$0xf] }
  0x3b   :  { %990 = vperm.xlu0 %2848, %v868_v48   ;;  %v882_v48 = vld [vmem:[%s4174_s4 + $0xe0] sm:$0xff]  ;;  %v1728_v45 = vld [vmem:[%s4175_s6 + $0x8] sm:$0xff] }
  0x3c   :  { %995 = vperm.xlu1 %2849, %v869_v53   ;;  %v2735_v53 = vld [vmem:[%s4173_s1 + $0xc4] sm:$0xf] }
  0x3d   :  { %980 = vperm.xlu2 %2850, %v866_v8  }
  0x41   :  { %588 = vmatmul.bf16.gmra.mxu2 %v2234_v54  ;;  %v2299_v54 = vld [vmem:[%s4173_s1 + $0xd0] sm:$0xf0] }
  0x42   :  { %637 = vmatmul.bf16.gmra.mxu1 %v2238_v55  ;;  %v2759_v55 = vld [vmem:[%s4171_s0 + $0x80] sm:$0xff] }
  0x43   :  { %985 = vperm.xlu0 %2848, %v867_v56   ;;  %v883_v56 = vld [vmem:[%s4174_s4 + $0xe8] sm:$0xff]  ;;  %675 = vmatpush.bf16.msrb.mxu2 %v2759_v55 }
  0x44   :  { %970 = vperm.xlu1 %2849, %v864_v58   ;;  %v2302_v58 = vor.u32 %v2735_v53, %v2299_v54  ;;  %v894_v53 = vld [vmem:[%s4174_s4 + $0x140] sm:$0xff] }
  0x45   :  { %975 = vperm.xlu2 %2850, %v865_v19  }
  0x4b   :  { %960 = vperm.xlu0 %2848, %v862_v59   ;;  %v899_v59 = vld [vmem:[%s4174_s4 + $0x168] sm:$0xff] }
  0x4c   :  { %965 = vperm.xlu1 %2849, %v863_v0   ;;  %v2716_v0 = vld [vmem:[%s4173_s1 + $0x2c] sm:$0xf] }
  0x4d   :  { %950 = vperm.xlu2 %2850, %v860_v24   ;;  %v2714_v24 = vld [vmem:[%s4173_s1 + $0x14] sm:$0xf0] }
  0x4e   :  { %v2210_v25 = vor.u32 %v2714_v24, %v2209_v23  ;;  %v907_v23 = vld [vmem:[%s4174_s4 + $0x1a8] sm:$0xff]  ;;  %v2291_v24 = vld [vmem:[%s4173_s1 + $0xb8] sm:$0xf0] }
  0x51   :  { %593 = vmatmul.bf16.gmra.mxu2 %v2250_v1  ;;  %v896_v1 = vld [vmem:[%s4174_s4 + $0x150] sm:$0xff] }
  0x52   :  { %642 = vmatmul.bf16.gmra.mxu1 %v2254_v2  ;;  %v2227_v2 = vld [vmem:[%s4173_s1 + $0x38] sm:$0xf0] }
  0x53   :  { %955 = vperm.xlu0 %2848, %v861_v3   ;;  %v2230_v3 = vor.u32 %v2716_v0, %v2227_v2  ;;  %v2275_v0 = vld [vmem:[%s4173_s1 + $0x98] sm:$0xf0] }
  0x54   :  { %945 = vperm.xlu1 %2849, %v859_v6   ;;  %v2739_v6 = vld [vmem:[%s4173_s1 + $0xe4] sm:$0xf] }
  0x55   :  { %1000 = vperm.xlu2 %2850, %v870_v39   ;;  %730 = vmatmul.bf16.gmra.mxu3 %v2230_v3  ;;  %v2318_v12 = vor.u32 %v2739_v6, %v2315_v7  ;;  %v2724_v39 = vld [vmem:[%s4173_s1 + $0x6c] sm:$0xf]  ;;  %v2241_v3 = vld [vmem:[%s4173_s1 + $0x48] sm:$0xf]  ;;  %v908_v7 = vld [vmem:[%s4174_s4 + $0x1b0] sm:$0xff] }
  0x5b   :  { %1005 = vperm.xlu0 %2848, %v871_v9   ;;  %v2314_v9 = vor.u32 %v2741_v5, %v2313_v4  ;;  %v2722_v4 = vld [vmem:[%s4173_s1 + $0x54] sm:$0xf0] }
  0x5c   :  { %1010 = vperm.xlu1 %2849, %v872_v14   ;;  %v901_v14 = vld [vmem:[%s4174_s4 + $0x178] sm:$0xff]  ;;  %v2242_v6 = vor.u32 %v2722_v4, %v2241_v3  ;;  %v2740_v4 = vld [vmem:[%s4173_s1 + $0xec] sm:$0xf] }
  0x5d   :  { %1015 = vperm.xlu2 %2850, %v873_v46   ;;  %v905_v3 = vld [vmem:[%s4174_s4 + $0x198] sm:$0xff] }
  0x5f   :  { %v3198_v52 = vpop.permute.xlu2 %190 }
  0x61   :  { %598 = vmatmul.bf16.gmra.mxu2 %v2266_v15  ;;  %v879_v15 = vld [vmem:[%s4174_s4 + $0xc8] sm:$0xff] }
  0x62   :  { %647 = vmatmul.bf16.gmra.mxu1 %v2270_v16 }
  0x63   :  { %1020 = vperm.xlu0 %2848, %v874_v18   ;;  %v2720_v18 = vld [vmem:[%s4173_s1 + $0x4c] sm:$0xf] }
  0x64   :  { %1025 = vperm.xlu1 %2849, %v875_v22   ;;  %v2246_v22 = vor.u32 %v2720_v18, %v2243_v21  ;;  %v891_v21 = vld [vmem:[%s4174_s4 + $0x128] sm:$0xff] }
  0x65   :  { %1030 = vperm.xlu2 %2850, %v876_v60   ;;  %v915_v60 = vld [vmem:[%s4174_s4 + $0x1e8] sm:$0xff] }
  0x66   :  { %735 = vmatmul.bf16.gmra.mxu3 %v2246_v22  ;;  %v2732_v22 = vld [vmem:[%s4173_s1 + $0xac] sm:$0xf] }
  0x67   :  { %v3218_v61 = vpop.permute.xlu2 %195 }
  0x6b   :  { %1035 = vperm.xlu0 %2848, %v877_v26   ;;  %v914_v26 = vld [vmem:[%s4174_s4 + $0x1e0] sm:$0xff] }
  0x6c   :  { %1040 = vperm.xlu1 %2849, %v878_v33  }
  0x6d   :  { %1070 = vperm.xlu2 %2850, %v884_v63   ;;  %v889_v63 = vld [vmem:[%s4174_s4 + $0x118] sm:$0xff] }
  0x6f   :  { %v3252_v11 = vpop.permute.xlu2 %170 }
  0x71   :  { %603 = vmatmul.bf16.gmra.mxu2 %v2282_v35 }
  0x72   :  { %652 = vmatmul.bf16.gmra.mxu1 %v2286_v36 }
  0x73   :  { %1075 = vperm.xlu0 %2848, %v885_v38   ;;  %v916_v38 = vld [vmem:[%s4174_s4 + $0x1f0] sm:$0xff] }
  0x74   :  { %1150 = vperm.xlu1 %2849, %v900_v42   ;;  %v2262_v42 = vor.u32 %v2724_v39, %v2259_v41 }
  0x75   :  { %v3247_v8 = vpop.permute.xlu0 %210  ;;  %1155 = vperm.xlu2 %2850, %v901_v14  }
  0x76   :  { %v3299_v35 = vpop.permute.xlu1 %200  ;;  %740 = vmatmul.bf16.gmra.mxu3 %v2262_v42  ;;  %v909_v42 = vld [vmem:[%s4174_s4 + $0x1b8] sm:$0xff] }
  0x77   :  { %v3271_v19 = vpop.permute.xlu2 %165 }
  0x7b   :  { %1060 = vperm.xlu0 %2848, %v882_v48   ;;  %v890_v48 = vld [vmem:[%s4174_s4 + $0x120] sm:$0xff] }
  0x7c   :  { %1065 = vperm.xlu1 %2849, %v883_v56  }
  0x7d   :  { %v3263_v16 = vpop.permute.xlu0 %215  ;;  %1140 = vperm.xlu2 %2850, %v898_v17   ;;  %v887_v17 = vld [vmem:[%s4174_s4 + $0x108] sm:$0xff] }
  0x7e   :  { %v3330_v50 = vpop.permute.xlu1 %205 }
  0x7f   :  { %v141_v31 = vpop.permute.xlu2 %140 }
  0x81   :  { %608 = vmatmul.bf16.gmra.mxu2 %v2298_v57  ;;  %v911_v57 = vld [vmem:[%s4174_s4 + $0x1c8] sm:$0xff] }
  0x82   :  { %657 = vmatmul.bf16.gmra.mxu1 %v2302_v58 }
  0x83   :  { %1145 = vperm.xlu0 %2848, %v899_v59  }
  0x84   :  { %1050 = vperm.xlu1 %2849, %v880_v62   ;;  %v2728_v62 = vld [vmem:[%s4173_s1 + $0x8c] sm:$0xf] }
  0x85   :  { %v3288_v28 = vpop.permute.xlu0 %180  ;;  %1055 = vperm.xlu2 %2850, %v881_v30  }
  0x86   :  { %v3357_v2 = vpop.permute.xlu1 %185 }
  0x8b   :  { %1130 = vperm.xlu0 %2848, %v896_v1   ;;  %v2278_v1 = vor.u32 %v2728_v62, %v2275_v0  ;;  %v1732_v0 = vld [vmem:[%s4175_s6 + $0x28] sm:$0xff] }
  0x8c   :  { %1135 = vperm.xlu1 %2849, %v897_v10   ;;  %v886_v10 = vld [vmem:[%s4174_s4 + $0x100] sm:$0xff] }
  0x8d   :  { %v3317_v43 = vpop.permute.xlu0 %175  ;;  %1230 = vperm.xlu2 %2850, %v916_v38   ;;  %745 = vmatmul.bf16.gmra.mxu3 %v2278_v1 }
  0x91   :  { %613 = vmatmul.bf16.gmra.mxu2 %v2314_v9 }
  0x92   :  { %662 = vmatmul.bf16.gmra.mxu1 %v2318_v12  ;;  %v912_v12 = vld [vmem:[%s4174_s4 + $0x1d0] sm:$0xff] }
  0x93   :  { %1235 = vperm.xlu0 %2848, %v917_v13   ;;  %v161_v13 = vpop.permute.xlu1 %160 }
  0x94   :  { %1045 = vperm.xlu1 %2849, %v879_v15  }
  0x95   :  { %1120 = vperm.xlu2 %2850, %v894_v53   ;;  %v151_v54 = vpop.permute.xlu0 %150 }
  0x9b   :  { %1125 = vperm.xlu0 %2848, %v895_v20  }
  0x9c   :  { %1220 = vperm.xlu1 %2849, %v914_v26   ;;  %v2257_v26 = vld [vmem:[%s4173_s1 + $0x68] sm:$0xf] }
  0x9d   :  { %1225 = vperm.xlu2 %2850, %v915_v60  }
  0x9f   :  { %v628_v27 = vpop.f32.mrf.mxu1 }
  0xa1   :  { %676 = vmatmul.bf16.vlgmr.msrb.gmra.mxu2 %v2210_v25  ;;  %v2294_v25 = vor.u32 %v2732_v22, %v2291_v24  ;;  %v1738_v22 = vld [vmem:[%s4175_s6 + $0x58] sm:$0xff]  ;;  %v1740_v24 = vld [vmem:[%s4175_s6 + $0x68] sm:$0xff] }
  0xa3   :  { %1110 = vperm.xlu0 %2848, %v892_v29   ;;  %750 = vmatmul.bf16.gmra.mxu3 %v2294_v25  ;;  %v2305_v25 = vld [vmem:[%s4173_s1 + $0xc8] sm:$0xf] }
  0xa4   :  { %v579_v32 = vpop.f32.mrf.mxu2  ;;  %1115 = vperm.xlu1 %2849, %v893_v34   ;;  %v888_v34 = vld [vmem:[%s4174_s4 + $0x110] sm:$0xff] }
  0xa5   :  { %v580_v33 = vadd.f32 %v579_v32, %v141_v31  ;;  %1210 = vperm.xlu2 %2850, %v912_v12   ;;  %v904_v31 = vld [vmem:[%s4174_s4 + $0x190] sm:$0xff] }
  0xa7   :  { %v3301_v36 = vadd.f32 %v628_v27, %v580_v33  ;;  %v3303_v37 = vpop.f32.mrf.mxu1  ;;  %v2726_v27 = vld [vmem:[%s4173_s1 + $0x74] sm:$0xf0]  ;;  %v902_v33 = vld [vmem:[%s4174_s4 + $0x180] sm:$0xff] }
  0xa8   :  { %v2258_v30 = vor.u32 %v2726_v27, %v2257_v26  ;;  %v2738_v26 = vld [vmem:[%s4173_s1 + $0xd4] sm:$0xf0] }
  0xab   :  { %1215 = vperm.xlu0 %2848, %v913_v40   ;;  %v903_v40 = vld [vmem:[%s4174_s4 + $0x188] sm:$0xff] }
  0xac   :  { %v3325_v46 = vpop.f32.mrf.mxu2  ;;  %1100 = vperm.xlu1 %2849, %v890_v48  }
  0xad   :  { %1105 = vperm.xlu2 %2850, %v891_v21  }
  0xaf   :  { %v633_v49 = vpop.f32.mrf.mxu1 }
  0xb1   :  { %681 = vmatmul.bf16.gmra.mxu2 %v2226_v47 }
  0xb3   :  { %1200 = vperm.xlu0 %2848, %v910_v51   ;;  %v2730_v51 = vld [vmem:[%s4173_s1 + $0x94] sm:$0xf0] }
  0xb4   :  { %v584_v55 = vpop.f32.mrf.mxu2  ;;  %1205 = vperm.xlu1 %2849, %v911_v57   ;;  %v906_v57 = vld [vmem:[%s4174_s4 + $0x1a0] sm:$0xff] }
  0xb5   :  { %v585_v56 = vadd.f32 %v584_v55, %v151_v54  ;;  %1090 = vperm.xlu2 %2850, %v888_v34   ;;  %v1729_v55 = vld [vmem:[%s4175_s6 + $0x10] sm:$0xff] }
  0xb7   :  { %v3341_v58 = vadd.f32 %v633_v49, %v585_v56  ;;  %v3343_v59 = vpop.f32.mrf.mxu1  ;;  %v2273_v49 = vld [vmem:[%s4173_s1 + $0x88] sm:$0xf]  ;;  %v1731_v56 = vld [vmem:[%s4175_s6 + $0x20] sm:$0xff] }
  0xb8   :  { %v2274_v54 = vor.u32 %v2730_v51, %v2273_v49  ;;  %v1742_v49 = vld [vmem:[%s4175_s6 + $0x78] sm:$0xff] }
  0xb9   :  { %v726_v34 = vpop.f32.mrf.mxu3 }
  0xbb   :  { %1095 = vperm.xlu0 %2848, %v889_v63  }
  0xbc   :  { %v3365_v5 = vpop.f32.mrf.mxu2  ;;  %1190 = vperm.xlu1 %2849, %v908_v7  }
  0xbd   :  { %1195 = vperm.xlu2 %2850, %v909_v42  }
  0xbf   :  { %v638_v9 = vpop.f32.mrf.mxu1 }
  0xc1   :  { %686 = vmatmul.bf16.gmra.mxu2 %v2242_v6  ;;  %v1734_v6 = vld [vmem:[%s4175_s6 + $0x38] sm:$0xff] }
  0xc3   :  { %1080 = vperm.xlu0 %2848, %v886_v10   ;;  %v2734_v10 = vld [vmem:[%s4173_s1 + $0xb4] sm:$0xf0] }
  0xc4   :  { %v589_v14 = vpop.f32.mrf.mxu2  ;;  %1085 = vperm.xlu1 %2849, %v887_v17   ;;  %v1727_v17 = vld [vmem:[%s4175_s6] sm:$0xff] }
  0xc5   :  { %v590_v15 = vadd.f32 %v589_v14, %v161_v13  ;;  %1180 = vperm.xlu2 %2850, %v906_v57   ;;  %v1735_v14 = vld [vmem:[%s4175_s6 + $0x40] sm:$0xff] }
  0xc7   :  { %v3379_v18 = vadd.f32 %v638_v9, %v590_v15  ;;  %v3381_v20 = vpop.f32.mrf.mxu1  ;;  %v2289_v9 = vld [vmem:[%s4173_s1 + $0xa8] sm:$0xf]  ;;  %v1737_v15 = vld [vmem:[%s4175_s6 + $0x50] sm:$0xff] }
  0xc8   :  { %v2290_v13 = vor.u32 %v2734_v10, %v2289_v9 }
  0xcb   :  { %1185 = vperm.xlu0 %2848, %v907_v23   ;;  %v1730_v23 = vld [vmem:[%s4175_s6 + $0x18] sm:$0xff] }
  0xcc   :  { %v3401_v29 = vpop.f32.mrf.mxu2  ;;  %1170 = vperm.xlu1 %2849, %v904_v31   ;;  %v1741_v31 = vld [vmem:[%s4175_s6 + $0x70] sm:$0xff] }
  0xcd   :  { %1175 = vperm.xlu2 %2850, %v905_v3  }
  0xcf   :  { %v643_v32 = vpop.f32.mrf.mxu1 }
  0xd1   :  { %691 = vmatmul.bf16.gmra.mxu2 %v2258_v30  ;;  %v2306_v30 = vor.u32 %v2738_v26, %v2305_v25 }
  0xd3   :  { %1160 = vperm.xlu0 %2848, %v902_v33  }
  0xd4   :  { %v594_v38 = vpop.f32.mrf.mxu2  ;;  %1165 = vperm.xlu1 %2849, %v903_v40   ;;  %v2742_v40 = vld [vmem:[%s4173_s1 + $0xf4] sm:$0xf0] }
  0xd5   :  { %v595_v39 = vadd.f32 %v594_v38, %v3252_v11  ;;  %v2307_v11 = vld [vmem:[%s4173_s1 + $0xd8] sm:$0xf0]  ;;  %1745 = vperm.xlu2 %2850, %v1727_v17   ;;  %v1736_v38 = vld [vmem:[%s4175_s6 + $0x48] sm:$0xff] }
  0xd6   :  { %v2310_v47 = vor.u32 %v2736_v44, %v2307_v11  ;;  %v728_v11 = vpop.f32.mrf.mxu3 }
  0xd7   :  { %v3416_v41 = vadd.f32 %v643_v32, %v595_v39  ;;  %v3430_v48 = vpop.f32.mrf.mxu1  ;;  %v1733_v32 = vld [vmem:[%s4175_s6 + $0x30] sm:$0xff]  ;;  %v2321_v39 = vld [vmem:[%s4173_s1 + $0xe8] sm:$0xf] }
  0xd8   :  { %755 = vmatmul.bf16.gmra.mxu3 %v2310_v47  ;;  %v2322_v44 = vor.u32 %v2742_v40, %v2321_v39 }
  0xdb   :  { %1750 = vperm.xlu0 %2848, %v1728_v45   ;;  %v1739_v45 = vld [vmem:[%s4175_s6 + $0x60] sm:$0xff] }
  0xdc   :  { %v3438_v53 = vpop.f32.mrf.mxu2  ;;  %1755 = vperm.xlu1 %2849, %v1729_v55   ;;  %v146_v55 = vpop.permute.xlu0 %145 }
  0xdd   :  { %1760 = vperm.xlu2 %2850, %v1730_v23  }
  0xdf   :  { %v648_v62 = vpop.f32.mrf.mxu1 }
  0xe1   :  { %696 = vmatmul.bf16.gmra.mxu2 %v2274_v54  ;;  %v731_v54 = vpop.f32.mrf.mxu3 }
  0xe3   :  { %1765 = vperm.xlu0 %2848, %v1731_v56  }
  0xe4   :  { %v599_v60 = vpop.f32.mrf.mxu2  ;;  %1770 = vperm.xlu1 %2849, %v1732_v0  }
  0xe5   :  { %v600_v63 = vadd.f32 %v599_v60, %v3288_v28  ;;  %v2323_v28 = vld [vmem:[%s4173_s1 + $0xf8] sm:$0xf0]  ;;  %1775 = vperm.xlu2 %2850, %v1733_v32  }
  0xe6   :  { %v2326_v7 = vor.u32 %v2740_v4, %v2323_v28 }
  0xe7   :  { %v3453_v1 = vadd.f32 %v648_v62, %v600_v63  ;;  %v582_v62 = vadd.f32 %v3325_v46, %v146_v55 }
  0xe8   :  { %760 = vmatmul.bf16.gmra.mxu3 %v2326_v7 }
  0xe9   :  { %v733_v60 = vpop.f32.mrf.mxu3  ;;  %v631_v0 = vadd.f32 %v3303_v37, %v582_v62 }
  0xeb   :  { %1780 = vperm.xlu0 %2848, %v1734_v6  }
  0xec   :  { %v3473_v12 = vpop.f32.mrf.mxu2  ;;  %1785 = vperm.xlu1 %2849, %v1735_v14  }
  0xed   :  { %1790 = vperm.xlu2 %2850, %v1736_v38  }
  0xf1   :  { %701 = vmatmul.bf16.gmra.mxu2 %v2290_v13  ;;  %v736_v28 = vpop.f32.mrf.mxu3 }
  0xf3   :  { %1795 = vperm.xlu0 %2848, %v1737_v15   ;;  %v156_v15 = vpop.permute.xlu1 %155 }
  0xf4   :  { %v3484_v21 = vpop.f32.mrf.mxu2  ;;  %1800 = vperm.xlu1 %2849, %v1738_v22  }
  0xf5   :  { %1805 = vperm.xlu2 %2850, %v1739_v45  }
  0xf9   :  { %v738_v22 = vpop.f32.mrf.mxu3 }
  0xfb   :  { %1810 = vperm.xlu0 %2848, %v1740_v24  }
  0xfc   :  { %v3501_v27 = vpop.f32.mrf.mxu2  ;;  %1815 = vperm.xlu1 %2849, %v1741_v31  }
  0xfd   :  { %1820 = vperm.xlu2 %2850, %v1742_v49  }
 0x101   :  { %706 = vmatmul.bf16.gmra.mxu2 %v2306_v30  ;;  %v741_v32 = vpop.f32.mrf.mxu3 }
 0x104   :  { %v3509_v33 = vpop.f32.mrf.mxu2 }
 0x10c   :  { %v3520_v42 = vpop.f32.mrf.mxu2 }
 0x111   :  { %711 = vmatmul.bf16.gmra.mxu2 %v2322_v44 }
 0x114   :  { %v3525_v47 = vpop.f32.mrf.mxu2 }
 0x11c   :  { %v3530_v51 = vpop.f32.mrf.mxu2 }
 0x124   :  { %v677_v56 = vpop.f32.mrf.mxu2 }
 0x125   :  { %v678_v57 = vadd.f32 %v677_v56, %v3301_v36  ;;  %v587_v36 = vadd.f32 %v3365_v5, %v156_v15 }
 0x127   :  { %v727_v63 = vadd.f32 %v726_v34, %v678_v57  ;;  %v636_v46 = vadd.f32 %v3343_v59, %v587_v36  ;;  %v743_v59 = vpop.f32.mrf.mxu3 }
 0x129   :  { %v766_v7 = vmax.f32 %v727_v63, 0.0 }
 0x12c   :  { %v679_v3 = vpop.f32.mrf.mxu2 }
 0x12d   :  { %v680_v4 = vadd.f32 %v679_v3, %v631_v0 }
 0x12f   :  { %v729_v6 = vadd.f32 %v728_v11, %v680_v4  ;;  %v746_v57 = vpop.f32.mrf.mxu3 }
 0x131   :  { %v767_v9 = vmax.f32 %v729_v6, 0.0 }
 0x133   :  { %v3535_v10 = vpack.c.bf16 %v767_v9, %v766_v7 }
 0x134   :  { %v682_v13 = vpop.f32.mrf.mxu2 }
 0x135   :  { %v683_v14 = vadd.f32 %v682_v13, %v3341_v58  ;;  %v592_v58 = vadd.f32 %v3401_v29, %v3271_v19  ;;  %v650_v29 = vpop.f32.mrf.mxu1 }
 0x137   :  { %v732_v17 = vadd.f32 %v731_v54, %v683_v14  ;;  %v641_v5 = vadd.f32 %v3381_v20, %v592_v58  ;;  %v748_v3 = vpop.f32.mrf.mxu3 }
 0x139   :  { %v768_v25 = vmax.f32 %v732_v17, 0.0 }
 0x13c   :  { %v684_v23 = vpop.f32.mrf.mxu2 }
 0x13d   :  { %v685_v37 = vadd.f32 %v684_v23, %v636_v46 }
 0x13f   :  { %v734_v24 = vadd.f32 %v733_v60, %v685_v37 }
 0x141   :  { %v769_v26 = vmax.f32 %v734_v24, 0.0  ;;  %v615_v24 = vadd.f32 %v3525_v47, %v3247_v8  ;;  %v605_v8 = vadd.f32 %v3484_v21, %v3198_v52 }
 0x143   :  { %v3540_v30 = vpack.c.bf16 %v769_v26, %v768_v25  ;;  %v612_v26 = vadd.f32 %v3520_v42, %v3330_v50  ;;  %v602_v50 = vadd.f32 %v3473_v12, %v3357_v2 }
 0x144   :  { %v687_v31 = vpop.f32.mrf.mxu2 }
 0x145   :  { %v688_v34 = vadd.f32 %v687_v31, %v3379_v18  ;;  %v597_v18 = vadd.f32 %v3438_v53, %v3317_v43  ;;  %v751_v53 = vpop.f32.mrf.mxu3  ;;  %v610_v31 = vadd.f32 %v3509_v33, %v3299_v35 }
 0x147   :  { %v737_v38 = vadd.f32 %v736_v28, %v688_v34  ;;  %v646_v19 = vadd.f32 %v3430_v48, %v597_v18  ;;  %v617_v34 = vadd.f32 %v3530_v51, %v3263_v16 }
 0x149   :  { %v770_v45 = vmax.f32 %v737_v38, 0.0  ;;  %v607_v38 = vadd.f32 %v3501_v27, %v3218_v61 }
 0x14c   :  { %v689_v39 = vpop.f32.mrf.mxu2 }
 0x14d   :  { %v690_v40 = vadd.f32 %v689_v39, %v641_v5  ;;  %v753_v48 = vpop.f32.mrf.mxu3 }
 0x14f   :  { %v739_v44 = vadd.f32 %v738_v22, %v690_v40 }
 0x151   :  { %v771_v11 = vmax.f32 %v739_v44, 0.0 }
 0x153   :  { %v3546_v49 = vpack.c.bf16 %v771_v11, %v770_v45 }
 0x154   :  { %v692_v54 = vpop.f32.mrf.mxu2 }
 0x155   :  { %v693_v55 = vadd.f32 %v692_v54, %v3416_v41  ;;  %v653_v41 = vpop.f32.mrf.mxu1  ;;  %v651_v54 = vadd.f32 %v650_v29, %v602_v50 }
 0x156   :  { %v654_v45 = vadd.f32 %v653_v41, %v605_v8 }
 0x157   :  { %v742_v56 = vadd.f32 %v741_v32, %v693_v55 }
 0x159   :  { %v772_v63 = vmax.f32 %v742_v56, 0.0 }
 0x15b   :  { %v756_v36 = vpop.f32.mrf.mxu3 }
 0x15c   :  { %v694_v20 = vpop.f32.mrf.mxu2 }
 0x15d   :  { %v695_v60 = vadd.f32 %v694_v20, %v646_v19  ;;  %v655_v9 = vpop.f32.mrf.mxu1 }
 0x15e   :  { %v656_v33 = vadd.f32 %v655_v9, %v607_v38  ;;  %v2779_v9 = vld [vmem:[%s4176_s3 + $0x20] sm:$0xff] }
 0x15f   :  { %v744_v62 = vadd.f32 %v743_v59, %v695_v60  ;;  %v2783_v38 = vld [vmem:[%s4176_s3 + $0x40] sm:$0xff] }
 0x161   :  { %v773_v0 = vmax.f32 %v744_v62, 0.0 }
 0x163   :  { %v3552_v4 = vpack.c.bf16 %v773_v0, %v772_v63  ;;  %v758_v46 = vpop.f32.mrf.mxu3 }
 0x164   :  { %v697_v6 = vpop.f32.mrf.mxu2 }
 0x165   :  { %v698_v28 = vadd.f32 %v697_v6, %v3453_v1  ;;  %v658_v14 = vpop.f32.mrf.mxu1 }
 0x166   :  { %v659_v47 = vadd.f32 %v658_v14, %v610_v31  ;;  %v2804_v14 = vld [vmem:[%s4176_s3 + $0xe8] sm:$0xff] }
 0x167   :  { %v3555_v7 = vadd.f32 %v746_v57, %v698_v28 }
 0x169   :  { %v774_v28 = vmax.f32 %v3555_v7, 0.0  ;;  %v2799_v7 = vld [vmem:[%s4176_s3 + $0xc0] sm:$0xff] }
 0x16b   :  { %v761_v1 = vpop.f32.mrf.mxu3 }
 0x16c   :  { %v699_v43 = vpop.f32.mrf.mxu2 }
 0x16d   :  { %v660_v17 = vpop.f32.mrf.mxu1  ;;  %v700_v56 = vadd.f32 %v699_v43, %v651_v54  ;;  %v2778_v43 = vld [vmem:[%s4176_s3 + $0x18] sm:$0xff] }
 0x16e   :  { %v661_v5 = vadd.f32 %v660_v17, %v612_v26  ;;  %v2805_v17 = vld [vmem:[%s4176_s3 + $0xf0] sm:$0xff] }
 0x16f   :  { %v749_v60 = vadd.f32 %v748_v3, %v700_v56  ;;  %v2775_v3 = vld [vmem:[%s4176_s3] sm:$0xff] }
 0x171   :  { %v775_v6 = vmax.f32 %v749_v60, 0.0  ;;  %v2785_v60 = vld [vmem:[%s4176_s3 + $0x50] sm:$0xff] }
 0x173   :  { %v763_v51 = vpop.f32.mrf.mxu3  ;;  %v850_v41 = vpack.c.bf16 %v775_v6, %v774_v28 }
 0x174   :  { %v702_v13 = vpop.f32.mrf.mxu2 }
 0x175   :  { %v663_v37 = vpop.f32.mrf.mxu1  ;;  %v703_v55 = vadd.f32 %v702_v13, %v654_v45  ;;  %v2803_v13 = vld [vmem:[%s4176_s3 + $0xe0] sm:$0xff] }
 0x176   :  { %v664_v32 = vadd.f32 %v663_v37, %v615_v24 }
 0x177   :  { %v752_v2 = vadd.f32 %v751_v53, %v703_v55  ;;  %v2802_v53 = vld [vmem:[%s4176_s3 + $0xd8] sm:$0xff] }
 0x179   :  { %v776_v0 = vmax.f32 %v752_v2, 0.0 }
 0x17c   :  { %v704_v15 = vpop.f32.mrf.mxu2 }
 0x17d   :  { %v665_v58 = vpop.f32.mrf.mxu1  ;;  %v705_v11 = vadd.f32 %v704_v15, %v656_v33  ;;  %v921_v15 = vpop.permute.xlu1 %920 }
 0x17e   :  { %v666_v40 = vadd.f32 %v665_v58, %v617_v34 }
 0x17f   :  { %v754_v57 = vadd.f32 %v753_v48, %v705_v11  ;;  %v2780_v48 = vld [vmem:[%s4176_s3 + $0x28] sm:$0xff] }
 0x180   :  { %v2784_v11 = vld [vmem:[%s4176_s3 + $0x48] sm:$0xff] }
 0x181   :  { %v777_v62 = vmax.f32 %v754_v57, 0.0 }
 0x183   :  { %v851_v29 = vpack.c.bf16 %v777_v62, %v776_v0 }
 0x184   :  { %v707_v22 = vpop.f32.mrf.mxu2 }
 0x185   :  { %v708_v42 = vadd.f32 %v707_v22, %v659_v47  ;;  %v926_v22 = vpop.permute.xlu2 %925 }
 0x187   :  { %v757_v18 = vadd.f32 %v756_v36, %v708_v42  ;;  %v2781_v36 = vld [vmem:[%s4176_s3 + $0x30] sm:$0xff] }
 0x189   :  { %v778_v12 = vmax.f32 %v757_v18, 0.0 }
 0x18c   :  { %v709_v23 = vpop.f32.mrf.mxu2 }
 0x18d   :  { %v710_v59 = vadd.f32 %v709_v23, %v661_v5  ;;  %v931_v23 = vpop.permute.xlu0 %930  ;;  %v941_v37 = vpop.permute.xlu2 %940 }
 0x18f   :  { %v759_v61 = vadd.f32 %v758_v46, %v710_v59  ;;  %v936_v46 = vpop.permute.xlu1 %935 }
 0x191   :  { %v779_v19 = vmax.f32 %v759_v61, 0.0 }
 0x193   :  { %v852_v63 = vpack.c.bf16 %v779_v19, %v778_v12 }
 0x194   :  { %v712_v25 = vpop.f32.mrf.mxu2 }
 0x195   :  { %v713_v39 = vadd.f32 %v712_v25, %v664_v32  ;;  %v2806_v25 = vld [vmem:[%s4176_s3 + $0xf8] sm:$0xff]  ;;  %v3630_v26 = vpop.permute.xlu0 %990  ;;  %v3632_v31 = vpop.permute.xlu2 %980 }
 0x197   :  { %v762_v44 = vadd.f32 %v761_v1, %v713_v39  ;;  %v3622_v24 = vpop.permute.xlu1 %995  ;;  %v2782_v1 = vld [vmem:[%s4176_s3 + $0x38] sm:$0xff] }
 0x199   :  { %v780_v52 = vmax.f32 %v762_v44, 0.0 }
 0x19c   :  { %v714_v35 = vpop.f32.mrf.mxu2 }
 0x19d   :  { %v715_v16 = vadd.f32 %v714_v35, %v666_v40  ;;  %v3636_v34 = vpop.permute.xlu0 %985  ;;  %v3638_v58 = vpop.permute.xlu2 %975 }
 0x19f   :  { %v764_v27 = vadd.f32 %v763_v51, %v715_v16  ;;  %v3634_v32 = vpop.permute.xlu1 %970 }
 0x1a1   :  { %v781_v21 = vmax.f32 %v764_v27, 0.0 }
 0x1a3   :  { %v853_v20 = vpack.c.bf16 %v781_v21, %v780_v52 }
 0x1a5   :  { %1430 = vmatpush.bf16.msra.mxu0 %v853_v20  ;;  %2839 = vmatpush.bf16.msrb.mxu3 %v853_v20  ;;  %v3645_v8 = vpop.permute.xlu0 %960  ;;  %v951_v50 = vpop.permute.xlu2 %950 }
 0x1a7   :  { %v3643_v39 = vpop.permute.xlu1 %965 }
 0x1a9   :  { %1431 = vmatpush.bf16.msra.mxu0 %v852_v63  ;;  %2840 = vmatpush.bf16.msrb.mxu3 %v852_v63 }
 0x1ad   :  { %1432 = vmatpush.bf16.msra.mxu0 %v851_v29  ;;  %2841 = vmatpush.bf16.msrb.mxu3 %v851_v29  ;;  %v956_v45 = vpop.permute.xlu0 %955  ;;  %v3656_v27 = vpop.permute.xlu2 %1000 }
 0x1af   :  { %v946_v44 = vpop.permute.xlu1 %945 }
 0x1b1   :  { %1433 = vmatpush.bf16.msra.mxu0 %v850_v41  ;;  %2842 = vmatpush.bf16.msrb.mxu3 %v850_v41 }
 0x1b5   :  { %1434 = vmatpush.bf16.msra.mxu0 %v3552_v4  ;;  %2843 = vmatpush.bf16.msrb.mxu3 %v3552_v4  ;;  %v2777_v4 = vld [vmem:[%s4176_s3 + $0x10] sm:$0xff]  ;;  %v3662_v21 = vpop.permute.xlu0 %1005  ;;  %v3664_v20 = vpop.permute.xlu2 %1015 }
 0x1b7   :  { %v3660_v55 = vpop.permute.xlu1 %1010 }
 0x1b9   :  { %1435 = vmatpush.bf16.msra.mxu0 %v3546_v49  ;;  %2844 = vmatpush.bf16.msrb.mxu3 %v3546_v49  ;;  %v2776_v49 = vld [vmem:[%s4176_s3 + $0x8] sm:$0xff] }
 0x1bd   :  { %1436 = vmatpush.bf16.msra.mxu0 %v3540_v30  ;;  %2845 = vmatpush.bf16.msrb.mxu3 %v3540_v30  ;;  %v2800_v30 = vld [vmem:[%s4176_s3 + $0xc8] sm:$0xff]  ;;  %v3675_v0 = vpop.permute.xlu0 %1020  ;;  %v3679_v29 = vpop.permute.xlu2 %1030 }
 0x1bf   :  { %v3673_v63 = vpop.permute.xlu1 %1025 }
 0x1c1   :  { %1437 = vmatpush.bf16.msra.mxu0 %v3535_v10  ;;  %2846 = vmatpush.bf16.msrb.mxu3 %v3535_v10  ;;  %v2801_v10 = vld [vmem:[%s4176_s3 + $0xd0] sm:$0xff] }
 0x1c4   :  { %1438 = vmatmul.bf16.vlgmr.msra.gmra.mxu0 %v2775_v3  ;;  %1558 = vmatmul.bf16.vlgmr.msrb.gmra.mxu3 %v2799_v7 }
 0x1c7   :  { %v3681_v7 = vpop.permute.xlu1 %1040 }
 0x1c8   :  { %4179 = vst [vmem:[#allocation2_spill] sm:$0xff] %v3681_v7 }
 0x1d4   :  { %1443 = vmatmul.bf16.gmra.mxu0 %v2776_v49  ;;  %1563 = vmatmul.bf16.gmra.mxu3 %v2800_v30 }
 0x1e4   :  { %1448 = vmatmul.bf16.gmra.mxu0 %v2777_v4  ;;  %1568 = vmatmul.bf16.gmra.mxu3 %v2801_v10  ;;  %v3683_v4 = vpop.permute.xlu0 %1035 }
 0x1f4   :  { %1453 = vmatmul.bf16.gmra.mxu0 %v2778_v43  ;;  %1573 = vmatmul.bf16.gmra.mxu3 %v2802_v53  ;;  %v2786_v53 = vld [vmem:[%s4176_s3 + $0x58] sm:$0xff] }
 0x204   :  { %1458 = vmatmul.bf16.gmra.mxu0 %v2779_v9  ;;  %1578 = vmatmul.bf16.gmra.mxu3 %v2803_v13  ;;  %v3692_v13 = vpop.permute.xlu2 %1070 }
 0x214   :  { %1463 = vmatmul.bf16.gmra.mxu0 %v2780_v48  ;;  %1583 = vmatmul.bf16.gmra.mxu3 %v2804_v14  ;;  %v3694_v48 = vpop.permute.xlu1 %1150 }
 0x215   :  { %4180 = vst [vmem:[#allocation3_spill] sm:$0xff] %v3694_v48 }
 0x224   :  { %1468 = vmatmul.bf16.gmra.mxu0 %v2781_v36  ;;  %1588 = vmatmul.bf16.gmra.mxu3 %v2805_v17 }
 0x234   :  { %1473 = vmatmul.bf16.gmra.mxu0 %v2782_v1  ;;  %1593 = vmatmul.bf16.gmra.mxu3 %v2806_v25  ;;  %v3704_v25 = vpop.permute.xlu1 %1065 }
 0x241   :  { %v1439_v5 = vpop.f32.mrf.mxu0 }
 0x242   :  { %v1440_v40 = vadd.f32 %v1439_v5, %v921_v15  ;;  %v3698_v15 = vpop.permute.xlu0 %1075  ;;  %v2787_v5 = vld [vmem:[%s4176_s3 + $0x60] sm:$0xff] }
 0x244   :  { %1478 = vmatmul.bf16.gmra.mxu0 %v2783_v38  ;;  %v1599_v33 = vmax.f32 %v1440_v40, 0.0 }
 0x247   :  { %v3647_v47 = vpop.f32.mrf.mxu3 }
 0x249   :  { %v1441_v59 = vpop.f32.mrf.mxu0 }
 0x24a   :  { %v1442_v35 = vadd.f32 %v1441_v59, %v926_v22  ;;  %v3711_v59 = vpop.permute.xlu0 %1060 }
 0x24c   :  { %v1600_v42 = vmax.f32 %v1442_v35, 0.0 }
 0x24e   :  { %v3649_v16 = vpack.c.bf16 %v1600_v42, %v1599_v33  ;;  %v3715_v33 = vpop.permute.xlu1 %1050 }
 0x24f   :  { %v3651_v51 = vpop.f32.mrf.mxu3  ;;  %4183 = vst [vmem:[#allocation6_spill] sm:$0xff] %v3715_v33 }
 0x251   :  { %v1444_v61 = vpop.f32.mrf.mxu0 }
 0x252   :  { %v1445_v18 = vadd.f32 %v1444_v61, %v931_v23 }
 0x254   :  { %1483 = vmatmul.bf16.gmra.mxu0 %v2784_v11  ;;  %v1601_v57 = vmax.f32 %v1445_v18, 0.0  ;;  %v2788_v11 = vld [vmem:[%s4176_s3 + $0x68] sm:$0xff] }
 0x256   :  { %v3726_v18 = vpop.permute.xlu1 %1135 }
 0x257   :  { %v3658_v54 = vpop.f32.mrf.mxu3  ;;  %4185 = vst [vmem:[#allocation8_spill] sm:$0xff] %v3726_v18 }
 0x259   :  { %v1446_v52 = vpop.f32.mrf.mxu0 }
 0x25a   :  { %v1447_v56 = vadd.f32 %v1446_v52, %v936_v46  ;;  %v3700_v46 = vpop.permute.xlu2 %1155 }
 0x25b   :  { %4181 = vst [vmem:[#allocation4_spill] sm:$0xff] %v3700_v46 }
 0x25c   :  { %v1602_v19 = vmax.f32 %v1447_v56, 0.0 }
 0x25e   :  { %v3666_v2 = vpack.c.bf16 %v1602_v19, %v1601_v57 }
 0x25f   :  { %v3668_v12 = vpop.f32.mrf.mxu3 }
 0x261   :  { %v1449_v62 = vpop.f32.mrf.mxu0 }
 0x262   :  { %v1450_v28 = vadd.f32 %v1449_v62, %v941_v37 }
 0x264   :  { %1488 = vmatmul.bf16.gmra.mxu0 %v2785_v60  ;;  %v1603_v49 = vmax.f32 %v1450_v28, 0.0  ;;  %v3734_v60 = vpop.permute.xlu1 %1045 }
 0x265   :  { %4187 = vst [vmem:[#allocation10_spill] sm:$0xff] %v3734_v60 }
 0x267   :  { %v3677_v6 = vpop.f32.mrf.mxu3 }
 0x269   :  { %v1451_v41 = vpop.f32.mrf.mxu0 }
 0x26a   :  { %v1452_v3 = vadd.f32 %v1451_v41, %v946_v44  ;;  %v3719_v44 = vpop.permute.xlu0 %1145  ;;  %v2789_v41 = vld [vmem:[%s4176_s3 + $0x70] sm:$0xff] }
 0x26b   :  { %4184 = vst [vmem:[#allocation7_spill] sm:$0xff] %v3719_v44 }
 0x26c   :  { %v1604_v30 = vmax.f32 %v1452_v3, 0.0 }
 0x26e   :  { %v3685_v10 = vpack.c.bf16 %v1604_v30, %v1603_v49  ;;  %v3745_v30 = vpop.permute.xlu1 %1220 }
 0x26f   :  { %v3687_v43 = vpop.f32.mrf.mxu3 }
 0x271   :  { %v1454_v9 = vpop.f32.mrf.mxu0 }
 0x272   :  { %v1455_v36 = vadd.f32 %v1454_v9, %v951_v50  ;;  %v3713_v50 = vpop.permute.xlu2 %1140  ;;  %v3730_v56 = vpop.permute.xlu0 %1130 }
 0x273   :  { %4182 = vst [vmem:[#allocation5_spill] sm:$0xff] %v3713_v50 }
 0x274   :  { %1493 = vmatmul.bf16.gmra.mxu0 %v2786_v53  ;;  %v1605_v23 = vmax.f32 %v1455_v36, 0.0  ;;  %4186 = vst [vmem:[#allocation9_spill] sm:$0xff] %v3730_v56 }
 0x277   :  { %v3696_v14 = vpop.f32.mrf.mxu3 }
 0x279   :  { %v1456_v17 = vpop.f32.mrf.mxu0 }
 0x27a   :  { %v1457_v22 = vadd.f32 %v1456_v17, %v956_v45  ;;  %v3721_v45 = vpop.permute.xlu2 %1055  ;;  %v3738_v28 = vpop.permute.xlu0 %1235 }
 0x27c   :  { %v1606_v37 = vmax.f32 %v1457_v22, 0.0  ;;  %v2790_v22 = vld [vmem:[%s4176_s3 + $0x78] sm:$0xff] }
 0x27e   :  { %v3702_v1 = vpack.c.bf16 %v1606_v37, %v1605_v23  ;;  %v3754_v37 = vpop.permute.xlu1 %1115 }
 0x27f   :  { %v3706_v38 = vpop.f32.mrf.mxu3  ;;  %4190 = vst [vmem:[#allocation13_spill] sm:$0xff] %v3754_v37 }
 0x281   :  { %v1459_v40 = vpop.f32.mrf.mxu0 }
 0x282   :  { %v3732_v19 = vpop.permute.xlu2 %1230  ;;  %v3749_v36 = vpop.permute.xlu0 %1125 }
 0x283   :  { %4189 = vst [vmem:[#allocation12_spill] sm:$0xff] %v3749_v36 }
 0x284   :  { %1498 = vmatmul.bf16.gmra.mxu0 %v2787_v5 }
 0x286   :  { %v3765_v50 = vpop.permute.xlu1 %1100 }
 0x287   :  { %v3717_v42 = vpop.f32.mrf.mxu3 }
 0x289   :  { %v1461_v35 = vpop.f32.mrf.mxu0 }
 0x28a   :  { %v3743_v49 = vpop.permute.xlu2 %1120 }
 0x28b   :  { %4188 = vst [vmem:[#allocation11_spill] sm:$0xff] %v3743_v49 }
 0x28f   :  { %v3728_v52 = vpop.f32.mrf.mxu3 }
 0x291   :  { %v1464_v61 = vpop.f32.mrf.mxu0 }
 0x292   :  { %v1226_v17 = vpop.permute.xlu2 %1225  ;;  %v1465_v33 = vadd.f32 %v1464_v61, %v3634_v32 }
 0x294   :  { %1503 = vmatmul.bf16.gmra.mxu0 %v2788_v11  ;;  %v3758_v11 = vpop.permute.xlu0 %1110 }
 0x295   :  { %4191 = vst [vmem:[#allocation14_spill] sm:$0xff] %v3758_v11 }
 0x297   :  { %v3736_v62 = vpop.f32.mrf.mxu3 }
 0x299   :  { %v1466_v57 = vpop.f32.mrf.mxu0 }
 0x29a   :  { %v1467_v11 = vadd.f32 %v1466_v57, %v3638_v58  ;;  %v1609_v58 = vmax.f32 %v1465_v33, 0.0 }
 0x29c   :  { %v1216_v7 = vpop.permute.xlu0 %1215 }
 0x29f   :  { %v3747_v53 = vpop.f32.mrf.mxu3 }
 0x2a1   :  { %v1469_v3 = vpop.f32.mrf.mxu0 }
 0x2a2   :  { %v1470_v46 = vadd.f32 %v1469_v3, %v3632_v31  ;;  %v1462_v31 = vadd.f32 %v1461_v35, %v3643_v39  ;;  %v1610_v3 = vmax.f32 %v1467_v11, 0.0 }
 0x2a4   :  { %1508 = vmatmul.bf16.gmra.mxu0 %v2789_v41  ;;  %v3760_v41 = vpop.permute.xlu2 %1210  ;;  %v1608_v32 = vmax.f32 %v1462_v31, 0.0  ;;  %v1700_v61 = vpack.c.bf16 %v1610_v3, %v1609_v58  ;;  %v1201_v57 = vpop.permute.xlu0 %1200 }
 0x2a7   :  { %v3756_v5 = vpop.f32.mrf.mxu3 }
 0x2a9   :  { %v1471_v9 = vpop.f32.mrf.mxu0 }
 0x2aa   :  { %v1472_v36 = vadd.f32 %v1471_v9, %v3636_v34 }
 0x2af   :  { %v1591_v44 = vpop.f32.mrf.mxu3 }
 0x2b0   :  { %v1592_v31 = vadd.f32 %v1591_v44, %v1226_v17 }
 0x2b1   :  { %v1474_v23 = vpop.f32.mrf.mxu0 }
 0x2b2   :  { %v1475_v49 = vadd.f32 %v1474_v23, %v3630_v26  ;;  %v1611_v26 = vmax.f32 %v1470_v46, 0.0 }
 0x2b4   :  { %1513 = vmatmul.bf16.gmra.mxu0 %v2790_v22  ;;  %v1613_v48 = vmax.f32 %v1475_v49, 0.0  ;;  %v1612_v22 = vmax.f32 %v1472_v36, 0.0  ;;  %v1460_v49 = vadd.f32 %v1459_v40, %v3645_v8 }
 0x2b7   :  { %v1594_v46 = vpop.f32.mrf.mxu3 }
 0x2b9   :  { %v1476_v56 = vpop.f32.mrf.mxu0 }
 0x2ba   :  { %v1477_v18 = vadd.f32 %v1476_v56, %v3622_v24  ;;  %v2791_v24 = vld [vmem:[%s4176_s3 + $0x80] sm:$0xff]  ;;  %v3773_v56 = vpop.permute.xlu2 %1105 }
 0x2bc   :  { %v1614_v37 = vmax.f32 %v1477_v18, 0.0  ;;  %v1701_v18 = vpack.c.bf16 %v1612_v22, %v1611_v26  ;;  %v3787_v26 = vpop.permute.xlu0 %1095 }
 0x2be   :  { %v1702_v60 = vpack.c.bf16 %v1614_v37, %v1613_v48  ;;  %v1206_v48 = vpop.permute.xlu1 %1205 }
 0x2bf   :  { %v1596_v11 = vpop.f32.mrf.mxu3 }
 0x2c0   :  { %1983 = vmatpush.bf16.msrb.mxu1 %v1702_v60  ;;  %v1607_v60 = vmax.f32 %v1460_v49, 0.0 }
 0x2c1   :  { %v1479_v34 = vpop.f32.mrf.mxu0 }
 0x2c2   :  { %v1480_v9 = vadd.f32 %v1479_v34, %v3656_v27  ;;  %v1699_v39 = vpack.c.bf16 %v1608_v32, %v1607_v60  ;;  %v3779_v35 = vpop.permute.xlu2 %1090  ;;  %v2792_v27 = vld [vmem:[%s4176_s3 + $0x88] sm:$0xff] }
 0x2c4   :  { %1518 = vmatmul.bf16.gmra.mxu0 %v2791_v24  ;;  %1984 = vmatpush.bf16.msrb.mxu1 %v1701_v18  ;;  %v1615_v37 = vmax.f32 %v1480_v9, 0.0  ;;  %v1595_v24 = vadd.f32 %v1594_v46, %v3732_v19  ;;  %v3806_v46 = vpop.permute.xlu0 %1080 }
 0x2c6   :  { %v1191_v33 = vpop.permute.xlu1 %1190  ;;  %v1661_v49 = vmax.f32 %v1595_v24, 0.0 }
 0x2c8   :  { %1985 = vmatpush.bf16.msrb.mxu1 %v1700_v61 }
 0x2c9   :  { %v1481_v36 = vpop.f32.mrf.mxu0 }
 0x2ca   :  { %v1482_v23 = vadd.f32 %v1481_v36, %v3662_v21  ;;  %v1597_v21 = vadd.f32 %v1596_v11, %v3738_v28  ;;  %v1196_v34 = vpop.permute.xlu2 %1195  ;;  %v2809_v28 = vld [vmem:[%s4177_s5 + $0xc] sm:$0xf0] }
 0x2cc   :  { %v1616_v8 = vmax.f32 %v1482_v23, 0.0  ;;  %1986 = vmatpush.bf16.msrb.mxu1 %v1699_v39  ;;  %v1662_v3 = vmax.f32 %v1597_v21, 0.0  ;;  %v2793_v23 = vld [vmem:[%s4176_s3 + $0x90] sm:$0xff]  ;;  %v1580_v39 = vadd.f32 %v3717_v42, %v1201_v57  ;;  %v2601_v57 = vld [vmem:[%s4177_s5 + $0x20] sm:$0xf] }
 0x2ce   :  { %v3781_v40 = vpack.c.bf16 %v1616_v8, %v1615_v37  ;;  %v3802_v58 = vpop.permute.xlu1 %1085  ;;  %v1726_v17 = vpack.c.bf16 %v1662_v3, %v1661_v49 }
 0x2d0   :  { %1987 = vmatpush.bf16.msrb.mxu1 %v3702_v1  ;;  %v2585_v1 = vld [vmem:[%s4177_s5] sm:$0xf] }
 0x2d1   :  { %v1484_v22 = vpop.f32.mrf.mxu0  ;;  %v2586_v32 = vor.u32 %v2809_v28, %v2585_v1 }
 0x2d2   :  { %v1485_v18 = vadd.f32 %v1484_v22, %v3660_v55  ;;  %v1587_v55 = vadd.f32 %v3747_v53, %v1216_v7  ;;  %v1181_v53 = vpop.permute.xlu2 %1180 }
 0x2d4   :  { %1523 = vmatmul.bf16.gmra.mxu0 %v2792_v27  ;;  %1988 = vmatpush.bf16.msrb.mxu1 %v3685_v10  ;;  %v1590_v10 = vadd.f32 %v3756_v5, %v3745_v30  ;;  %v1617_v61 = vmax.f32 %v1485_v18, 0.0  ;;  %v1585_v30 = vadd.f32 %v3736_v62, %v3760_v41  ;;  %v1658_v36 = vmax.f32 %v1587_v55, 0.0  ;;  %v1186_v27 = vpop.permute.xlu0 %1185 }
 0x2d5   :  { %v1577_v62 = vadd.f32 %v3706_v38, %v1196_v34  ;;  %v1572_v22 = vadd.f32 %v3687_v43, %v1186_v27  ;;  %v2813_v38 = vld [vmem:[%s4177_s5 + $0x2c] sm:$0xf0]  ;;  %v1570_v34 = vadd.f32 %v3677_v6, %v1181_v53  ;;  %v2649_v27 = vld [vmem:[%s4177_s5 + $0x80] sm:$0xf] }
 0x2d6   :  { %v1659_v5 = vmax.f32 %v1590_v10, 0.0  ;;  %v1171_v11 = vpop.permute.xlu1 %1170  ;;  %v2602_v1 = vor.u32 %v2813_v38, %v2601_v57  ;;  %v2665_v38 = vld [vmem:[%s4177_s5 + $0xa0] sm:$0xf] }
 0x2d7   :  { %v1654_v21 = vmax.f32 %v1577_v62, 0.0  ;;  %v1652_v18 = vmax.f32 %v1572_v22, 0.0  ;;  %v1565_v49 = vadd.f32 %v3658_v54, %v1171_v11  ;;  %v2825_v22 = vld [vmem:[%s4177_s5 + $0x8c] sm:$0xf0] }
 0x2d8   :  { %1989 = vmatpush.bf16.msrb.mxu1 %v3666_v2  ;;  %v1660_v2 = vmax.f32 %v1592_v31, 0.0 }
 0x2d9   :  { %v1486_v19 = vpop.f32.mrf.mxu0 }
 0x2da   :  { %v1487_v44 = vadd.f32 %v1486_v19, %v3664_v20  ;;  %v1582_v20 = vadd.f32 %v3728_v52, %v1206_v48  ;;  %v1725_v7 = vpack.c.bf16 %v1660_v2, %v1659_v5  ;;  %v1575_v52 = vadd.f32 %v3696_v14, %v1191_v33  ;;  %v1176_v31 = vpop.permute.xlu2 %1175 }
 0x2db   :  { %v1655_v48 = vmax.f32 %v1580_v39, 0.0  ;;  %v1567_v3 = vadd.f32 %v3668_v12, %v1176_v31  ;;  %v1651_v19 = vmax.f32 %v1570_v34, 0.0  ;;  %v2794_v12 = vld [vmem:[%s4176_s3 + $0x98] sm:$0xff]  ;;  %v2829_v34 = vld [vmem:[%s4177_s5 + $0xac] sm:$0xf0] }
 0x2dc   :  { %v1618_v60 = vmax.f32 %v1487_v44, 0.0  ;;  %1990 = vmatpush.bf16.msrb.mxu1 %v3649_v16  ;;  %v1657_v16 = vmax.f32 %v1585_v30, 0.0  ;;  %v1656_v41 = vmax.f32 %v1582_v20, 0.0  ;;  %v1653_v14 = vmax.f32 %v1575_v52, 0.0  ;;  %v2796_v52 = vld [vmem:[%s4176_s3 + $0xa8] sm:$0xff]  ;;  %v2798_v31 = vld [vmem:[%s4176_s3 + $0xb8] sm:$0xff] }
 0x2dd   :  { %v1650_v2 = vmax.f32 %v1567_v3, 0.0 }
 0x2de   :  { %v3811_v9 = vpack.c.bf16 %v1618_v60, %v1617_v61  ;;  %v1724_v8 = vpack.c.bf16 %v1658_v36, %v1657_v16  ;;  %v1723_v24 = vpack.c.bf16 %v1656_v41, %v1655_v48  ;;  %v1166_v44 = vpop.permute.xlu1 %1165  ;;  %v1649_v61 = vmax.f32 %v1565_v49, 0.0  ;;  %v2617_v36 = vld [vmem:[%s4177_s5 + $0x40] sm:$0xf] }
 0x2df   :  { %1991 = vmatmul.bf16.vlgmr.msrb.gmra.mxu1 %v2586_v32  ;;  %v1562_v6 = vadd.f32 %v3651_v51, %v1166_v44  ;;  %v2633_v41 = vld [vmem:[%s4177_s5 + $0x60] sm:$0xf] }
 0x2e0   :  { %2130 = vmatpush.bf16.msra.mxu1 %v1726_v17  ;;  %v1721_v17 = vpack.c.bf16 %v1652_v18, %v1651_v19  ;;  %v1720_v30 = vpack.c.bf16 %v1650_v2, %v1649_v61  ;;  %v2681_v18 = vld [vmem:[%s4177_s5 + $0xc0] sm:$0xf] }
 0x2e1   :  { %v1489_v37 = vpop.f32.mrf.mxu0  ;;  %v1648_v54 = vmax.f32 %v1562_v6, 0.0 }
 0x2e2   :  { %v1490_v42 = vadd.f32 %v1489_v37, %v3675_v0  ;;  %v1722_v0 = vpack.c.bf16 %v1654_v21, %v1653_v14 }
 0x2e4   :  { %2131 = vmatpush.bf16.msra.mxu1 %v1725_v7  ;;  %1528 = vmatmul.bf16.gmra.mxu0 %v2793_v23  ;;  %v1619_v28 = vmax.f32 %v1490_v42, 0.0  ;;  %v2817_v7 = vld [vmem:[%s4177_s5 + $0x4c] sm:$0xf0] }
 0x2e5   :  { %v2618_v23 = vor.u32 %v2817_v7, %v2617_v36  ;;  %v2797_v42 = vld [vmem:[%s4176_s3 + $0xb0] sm:$0xff]  ;;  %v2697_v7 = vld [vmem:[%s4177_s5 + $0xe0] sm:$0xf] }
 0x2e8   :  { %2132 = vmatpush.bf16.msra.mxu1 %v1724_v8 }
 0x2e9   :  { %v1491_v33 = vpop.f32.mrf.mxu0 }
 0x2ea   :  { %v1492_v43 = vadd.f32 %v1491_v33, %v3673_v63  ;;  %v1161_v63 = vpop.permute.xlu0 %1160  ;;  %v2666_v33 = vor.u32 %v2829_v34, %v2665_v38 }
 0x2eb   :  { %v1560_v32 = vadd.f32 %v3647_v47, %v1161_v63  ;;  %v4192_v63 = vld [vmem:[#allocation6_spill] sm:$0xff] }
 0x2ec   :  { %2133 = vmatpush.bf16.msra.mxu1 %v1723_v24  ;;  %v1620_v10 = vmax.f32 %v1492_v43, 0.0  ;;  %v2650_v24 = vor.u32 %v2825_v22, %v2649_v27  ;;  %v2811_v22 = vld [vmem:[%s4177_s5 + $0x24] sm:$0xf] }
 0x2ed   :  { %v1647_v5 = vmax.f32 %v1560_v32, 0.0 }
 0x2ee   :  { %v3832_v55 = vpack.c.bf16 %v1620_v10, %v1619_v28 }
 0x2ef   :  { %1996 = vmatmul.bf16.gmra.mxu1 %v2602_v1  ;;  %v1719_v20 = vpack.c.bf16 %v1648_v54, %v1647_v5 }
 0x2f0   :  { %2134 = vmatpush.bf16.msra.mxu1 %v1722_v0  ;;  %v2833_v0 = vld [vmem:[%s4177_s5 + $0xcc] sm:$0xf0] }
 0x2f1   :  { %v1494_v60 = vpop.f32.mrf.mxu0  ;;  %v2682_v49 = vor.u32 %v2833_v0, %v2681_v18 }
 0x2f2   :  { %v1495_v51 = vadd.f32 %v1494_v60, %v3679_v29  ;;  %v2795_v29 = vld [vmem:[%s4176_s3 + $0xa0] sm:$0xff] }
 0x2f3   :  { %v4193_v60 = vld [vmem:[#allocation10_spill] sm:$0xff] }
 0x2f4   :  { %2135 = vmatpush.bf16.msra.mxu1 %v1721_v17  ;;  %1533 = vmatmul.bf16.gmra.mxu0 %v2794_v12  ;;  %v1621_v39 = vmax.f32 %v1495_v51, 0.0 }
 0x2f8   :  { %2136 = vmatpush.bf16.msra.mxu1 %v1720_v30 }
 0x2f9   :  { %v1496_v47 = vpop.f32.mrf.mxu0 }
 0x2fa   :  { %v1497_v53 = vadd.f32 %v1496_v47, %v3683_v4  ;;  %v2821_v4 = vld [vmem:[%s4177_s5 + $0x6c] sm:$0xf0] }
 0x2fb   :  { %v2634_v11 = vor.u32 %v2821_v4, %v2633_v41  ;;  %v2837_v47 = vld [vmem:[%s4177_s5 + $0xec] sm:$0xf0] }
 0x2fc   :  { %2137 = vmatpush.bf16.msra.mxu1 %v1719_v20  ;;  %v1622_v16 = vmax.f32 %v1497_v53, 0.0 }
 0x2fe   :  { %v3847_v37 = vpack.c.bf16 %v1622_v16, %v1621_v39  ;;  %v2698_v16 = vor.u32 %v2837_v47, %v2697_v7  ;;  %v4198_v7 = vld [vmem:[#allocation7_spill] sm:$0xff] }
 0x2ff   :  { %2001 = vmatmul.bf16.gmra.mxu1 %v2618_v23 }
 0x301   :  { %v1499_v62 = vpop.f32.mrf.mxu0 }
 0x304   :  { %1538 = vmatmul.bf16.gmra.mxu0 %v2795_v29 }
 0x309   :  { %v1501_v8 = vpop.f32.mrf.mxu0 }
 0x30a   :  { %v1502_v54 = vadd.f32 %v1501_v8, %v4193_v60  ;;  %v2587_v8 = vld [vmem:[%s4177_s5 + $0x10] sm:$0xf0]  ;;  %v2827_v60 = vld [vmem:[%s4177_s5 + $0xa4] sm:$0xf] }
 0x30f   :  { %2006 = vmatmul.bf16.gmra.mxu1 %v2634_v11 }
 0x311   :  { %v1504_v48 = vpop.f32.mrf.mxu0 }
 0x312   :  { %v1505_v12 = vadd.f32 %v1504_v48, %v4192_v63 }
 0x314   :  { %1543 = vmatmul.bf16.gmra.mxu0 %v2796_v52  ;;  %v1625_v20 = vmax.f32 %v1505_v12, 0.0 }
 0x319   :  { %v1506_v21 = vpop.f32.mrf.mxu0 }
 0x31f   :  { %2011 = vmatmul.bf16.gmra.mxu1 %v2650_v24 }
 0x321   :  { %v1509_v57 = vpop.f32.mrf.mxu0 }
 0x322   :  { %v1510_v19 = vadd.f32 %v1509_v57, %v3711_v59  ;;  %v1624_v59 = vmax.f32 %v1502_v54, 0.0  ;;  %v2667_v54 = vld [vmem:[%s4177_s5 + $0xb0] sm:$0xf0] }
 0x324   :  { %1548 = vmatmul.bf16.gmra.mxu0 %v2797_v42  ;;  %v1627_v32 = vmax.f32 %v1510_v19, 0.0  ;;  %v2635_v19 = vld [vmem:[%s4177_s5 + $0x70] sm:$0xf0] }
 0x329   :  { %v1511_v14 = vpop.f32.mrf.mxu0 }
 0x32a   :  { %v1512_v28 = vadd.f32 %v1511_v14, %v3704_v25  ;;  %v4195_v14 = vld [vmem:[#allocation14_spill] sm:$0xff] }
 0x32c   :  { %v1628_v2 = vmax.f32 %v1512_v28, 0.0 }
 0x32e   :  { %v1709_v30 = vpack.c.bf16 %v1628_v2, %v1627_v32  ;;  %v2823_v2 = vld [vmem:[%s4177_s5 + $0x84] sm:$0xf] }
 0x32f   :  { %2016 = vmatmul.bf16.gmra.mxu1 %v2666_v33  ;;  %v2815_v33 = vld [vmem:[%s4177_s5 + $0x44] sm:$0xf] }
 0x331   :  { %v1514_v43 = vpop.f32.mrf.mxu0 }
 0x332   :  { %v1515_v3 = vadd.f32 %v1514_v43, %v3692_v13  ;;  %v1507_v13 = vadd.f32 %v1506_v21, %v3721_v45  ;;  %v2603_v21 = vld [vmem:[%s4177_s5 + $0x30] sm:$0xf0] }
 0x333   :  { %v2606_v42 = vor.u32 %v2811_v22, %v2603_v21  ;;  %v4203_v21 = vld [vmem:[#allocation12_spill] sm:$0xff] }
 0x334   :  { %1553 = vmatmul.bf16.gmra.mxu0 %v2798_v31  ;;  %v1629_v44 = vmax.f32 %v1515_v3, 0.0  ;;  %v1626_v25 = vmax.f32 %v1507_v13, 0.0  ;;  %v2619_v31 = vld [vmem:[%s4177_s5 + $0x50] sm:$0xf0]  ;;  %v4196_v3 = vld [vmem:[#allocation13_spill] sm:$0xff] }
 0x335   :  { %v2622_v18 = vor.u32 %v2815_v33, %v2619_v31 }
 0x336   :  { %v1708_v51 = vpack.c.bf16 %v1626_v25, %v1625_v20  ;;  %v4197_v20 = vld [vmem:[#allocation3_spill] sm:$0xff] }
 0x339   :  { %v1516_v1 = vpop.f32.mrf.mxu0 }
 0x33a   :  { %v1517_v10 = vadd.f32 %v1516_v1, %v3698_v15  ;;  %v4194_v15 = vld [vmem:[#allocation2_spill] sm:$0xff] }
 0x33b   :  { %v1500_v5 = vadd.f32 %v1499_v62, %v4194_v15 }
 0x33c   :  { %v1630_v6 = vmax.f32 %v1517_v10, 0.0 }
 0x33d   :  { %v1623_v36 = vmax.f32 %v1500_v5, 0.0 }
 0x33e   :  { %v1710_v17 = vpack.c.bf16 %v1630_v6, %v1629_v44 }
 0x33f   :  { %2021 = vmatmul.bf16.gmra.mxu1 %v2682_v49  ;;  %v1707_v23 = vpack.c.bf16 %v1624_v59, %v1623_v36  ;;  %v2819_v49 = vld [vmem:[%s4177_s5 + $0x64] sm:$0xf]  ;;  %v2683_v36 = vld [vmem:[%s4177_s5 + $0xd0] sm:$0xf0] }
 0x340   :  { %2032 = vmatpush.bf16.msra.mxu2 %v1710_v17  ;;  %v2638_v6 = vor.u32 %v2819_v49, %v2635_v19  ;;  %v2651_v17 = vld [vmem:[%s4177_s5 + $0x90] sm:$0xf0]  ;;  %v2593_v19 = vld [vmem:[%s4177_s5 + $0x8] sm:$0xf] }
 0x341   :  { %v1519_v61 = vpop.f32.mrf.mxu0  ;;  %v2654_v12 = vor.u32 %v2823_v2, %v2651_v17  ;;  %v2609_v17 = vld [vmem:[%s4177_s5 + $0x28] sm:$0xf] }
 0x342   :  { %v1520_v45 = vadd.f32 %v1519_v61, %v3806_v46 }
 0x344   :  { %2033 = vmatpush.bf16.msra.mxu2 %v1709_v30  ;;  %v1631_v29 = vmax.f32 %v1520_v45, 0.0  ;;  %v2670_v30 = vor.u32 %v2827_v60, %v2667_v54 }
 0x348   :  { %2034 = vmatpush.bf16.msra.mxu2 %v1708_v51  ;;  %v2831_v51 = vld [vmem:[%s4177_s5 + $0xc4] sm:$0xf] }
 0x349   :  { %v1521_v53 = vpop.f32.mrf.mxu0 }
 0x34a   :  { %v1522_v39 = vadd.f32 %v1521_v53, %v3802_v58  ;;  %v2807_v58 = vld [vmem:[%s4177_s5 + $0x4] sm:$0xf]  ;;  %v4199_v53 = vld [vmem:[#allocation4_spill] sm:$0xff] }
 0x34b   :  { %v2590_v48 = vor.u32 %v2807_v58, %v2587_v8  ;;  %v2808_v58 = vld [vmem:[%s4177_s5 + $0xc] sm:$0xf]  ;;  %v2595_v8 = vld [vmem:[%s4177_s5 + $0x18] sm:$0xf0] }
 0x34c   :  { %v1632_v62 = vmax.f32 %v1522_v39, 0.0  ;;  %2035 = vmatpush.bf16.msra.mxu2 %v1707_v23  ;;  %v2686_v39 = vor.u32 %v2831_v51, %v2683_v36  ;;  %v2659_v51 = vld [vmem:[%s4177_s5 + $0x98] sm:$0xf0] }
 0x34e   :  { %v3901_v41 = vpack.c.bf16 %v1632_v62, %v1631_v29  ;;  %v4200_v29 = vld [vmem:[#allocation5_spill] sm:$0xff] }
 0x34f   :  { %2026 = vmatmul.bf16.gmra.mxu1 %v2698_v16 }
 0x350   :  { %2036 = vmatpush.bf16.msra.mxu2 %v3847_v37 }
 0x351   :  { %v1524_v46 = vpop.f32.mrf.mxu0 }
 0x352   :  { %v1525_v4 = vadd.f32 %v1524_v46, %v3779_v35 }
 0x354   :  { %2037 = vmatpush.bf16.msra.mxu2 %v3832_v55  ;;  %v1633_v37 = vmax.f32 %v1525_v4, 0.0 }
 0x358   :  { %2038 = vmatpush.bf16.msra.mxu2 %v3811_v9 }
 0x359   :  { %v1526_v11 = vpop.f32.mrf.mxu0 }
 0x35a   :  { %v1527_v52 = vadd.f32 %v1526_v11, %v3787_v26  ;;  %v4201_v11 = vld [vmem:[#allocation8_spill] sm:$0xff] }
 0x35c   :  { %v1634_v27 = vmax.f32 %v1527_v52, 0.0  ;;  %2039 = vmatpush.bf16.msra.mxu2 %v3781_v40  ;;  %v3949_v61 = vpop.f32.mrf.mxu1 }
 0x35e   :  { %v3915_v55 = vpack.c.bf16 %v1634_v27, %v1633_v37  ;;  %v2598_v27 = vor.u32 %v2808_v58, %v2595_v8  ;;  %v2826_v58 = vld [vmem:[%s4177_s5 + $0x94] sm:$0xf0] }
 0x35f   :  { %2040 = vmatmul.bf16.vlgmr.msra.gmra.mxu2 %v2590_v48 }
 0x360   :  { %2138 = vmatmul.bf16.vlgmr.msra.gmra.mxu1 %v2598_v27  ;;  %v2673_v27 = vld [vmem:[%s4177_s5 + $0xa8] sm:$0xf] }
 0x361   :  { %v1529_v35 = vpop.f32.mrf.mxu0 }
 0x362   :  { %v1530_v9 = vadd.f32 %v1529_v35, %v3765_v50  ;;  %v4202_v35 = vld [vmem:[#allocation9_spill] sm:$0xff] }
 0x364   :  { %v1635_v57 = vmax.f32 %v1530_v9, 0.0  ;;  %v3957_v5 = vpop.f32.mrf.mxu1 }
 0x369   :  { %v1531_v26 = vpop.f32.mrf.mxu0 }
 0x36a   :  { %v1532_v24 = vadd.f32 %v1531_v26, %v3773_v56 }
 0x36c   :  { %v1636_v40 = vmax.f32 %v1532_v24, 0.0  ;;  %v3968_v16 = vpop.f32.mrf.mxu1 }
 0x36e   :  { %v3925_v38 = vpack.c.bf16 %v1636_v40, %v1635_v57  ;;  %v4204_v57 = vld [vmem:[#allocation11_spill] sm:$0xff] }
 0x36f   :  { %2045 = vmatmul.bf16.gmra.mxu2 %v2606_v42 }
 0x371   :  { %v1534_v34 = vpop.f32.mrf.mxu0 }
 0x372   :  { %v1535_v50 = vadd.f32 %v1534_v34, %v4195_v14 }
 0x374   :  { %v1637_v0 = vmax.f32 %v1535_v50, 0.0  ;;  %v3981_v14 = vpop.f32.mrf.mxu1 }
 0x379   :  { %v1536_v43 = vpop.f32.mrf.mxu0 }
 0x37a   :  { %v1537_v56 = vadd.f32 %v1536_v43, %v4196_v3  ;;  %v2835_v43 = vld [vmem:[%s4177_s5 + $0xe4] sm:$0xf]  ;;  %v2699_v3 = vld [vmem:[%s4177_s5 + $0xf0] sm:$0xf0] }
 0x37c   :  { %v1638_v1 = vmax.f32 %v1537_v56, 0.0  ;;  %v3995_v49 = vpop.f32.mrf.mxu1 }
 0x37e   :  { %v3935_v28 = vpack.c.bf16 %v1638_v1, %v1637_v0  ;;  %v2812_v0 = vld [vmem:[%s4177_s5 + $0x2c] sm:$0xf]  ;;  %v2611_v1 = vld [vmem:[%s4177_s5 + $0x38] sm:$0xf0] }
 0x37f   :  { %2050 = vmatmul.bf16.gmra.mxu2 %v2622_v18  ;;  %v2702_v18 = vor.u32 %v2835_v43, %v2699_v3  ;;  %v2705_v43 = vld [vmem:[%s4177_s5 + $0xe8] sm:$0xf]  ;;  %v2838_v3 = vld [vmem:[%s4177_s5 + $0xf4] sm:$0xf0] }
 0x381   :  { %v1539_v10 = vpop.f32.mrf.mxu0 }
 0x382   :  { %v1540_v40 = vadd.f32 %v1539_v10, %v4204_v57  ;;  %v2614_v10 = vor.u32 %v2812_v0, %v2611_v1  ;;  %v2689_v57 = vld [vmem:[%s4177_s5 + $0xc8] sm:$0xf] }
 0x384   :  { %v1639_v31 = vmax.f32 %v1540_v40, 0.0  ;;  %2143 = vmatmul.bf16.gmra.mxu1 %v2614_v10  ;;  %v2834_v40 = vld [vmem:[%s4177_s5 + $0xd4] sm:$0xf0] }
 0x389   :  { %v1541_v44 = vpop.f32.mrf.mxu0 }
 0x38a   :  { %v1542_v26 = vadd.f32 %v1541_v44, %v4203_v21  ;;  %v2810_v44 = vld [vmem:[%s4177_s5 + $0x14] sm:$0xf0]  ;;  %v2836_v21 = vld [vmem:[%s4177_s5 + $0xec] sm:$0xf] }
 0x38c   :  { %v1640_v50 = vmax.f32 %v1542_v26, 0.0  ;;  %v2707_v26 = vld [vmem:[%s4177_s5 + $0xf8] sm:$0xf0] }
 0x38e   :  { %v1715_v56 = vpack.c.bf16 %v1640_v50, %v1639_v31 }
 0x38f   :  { %2055 = vmatmul.bf16.gmra.mxu2 %v2638_v6  ;;  %v4006_v6 = vpop.f32.mrf.mxu1 }
 0x391   :  { %v1544_v13 = vpop.f32.mrf.mxu0 }
 0x392   :  { %v1545_v9 = vadd.f32 %v1544_v13, %v4202_v35  ;;  %v2594_v13 = vor.u32 %v2810_v44, %v2593_v19  ;;  %v2830_v35 = vld [vmem:[%s4177_s5 + $0xb4] sm:$0xf0]  ;;  %v1746_v19 = vpop.permute.xlu2 %1745 }
 0x394   :  { %v1641_v34 = vmax.f32 %v1545_v9, 0.0 }
 0x397   :  { %v4015_v2 = vpop.f32.mrf.mxu1 }
 0x399   :  { %v1546_v63 = vpop.f32.mrf.mxu0 }
 0x39a   :  { %v1547_v52 = vadd.f32 %v1546_v63, %v4201_v11  ;;  %v2832_v11 = vld [vmem:[%s4177_s5 + $0xcc] sm:$0xf] }
 0x39c   :  { %v1642_v24 = vmax.f32 %v1547_v52, 0.0  ;;  %v2691_v52 = vld [vmem:[%s4177_s5 + $0xd8] sm:$0xf0] }
 0x39e   :  { %v1716_v33 = vpack.c.bf16 %v1642_v24, %v1641_v34  ;;  %v2710_v24 = vor.u32 %v2836_v21, %v2707_v26  ;;  %v2690_v34 = vor.u32 %v2834_v40, %v2689_v57 }
 0x39f   :  { %2060 = vmatmul.bf16.gmra.mxu2 %v2654_v12  ;;  %v2820_v12 = vld [vmem:[%s4177_s5 + $0x6c] sm:$0xf]  ;;  %v4029_v54 = vpop.f32.mrf.mxu1 }
 0x3a1   :  { %v1549_v32 = vpop.f32.mrf.mxu0 }
 0x3a2   :  { %v1550_v62 = vadd.f32 %v1549_v32, %v4200_v29  ;;  %v2643_v32 = vld [vmem:[%s4177_s5 + $0x78] sm:$0xf0] }
 0x3a3   :  { %v2646_v60 = vor.u32 %v2820_v12, %v2643_v32  ;;  %v2675_v29 = vld [vmem:[%s4177_s5 + $0xb8] sm:$0xf0] }
 0x3a4   :  { %v1643_v22 = vmax.f32 %v1550_v62, 0.0 }
 0x3a9   :  { %v1551_v25 = vpop.f32.mrf.mxu0 }
 0x3aa   :  { %v1552_v47 = vadd.f32 %v1551_v25, %v4198_v7  ;;  %v4031_v25 = vpop.f32.mrf.mxu1  ;;  %v2641_v7 = vld [vmem:[%s4177_s5 + $0x68] sm:$0xf] }
 0x3ac   :  { %v1644_v48 = vmax.f32 %v1552_v47, 0.0  ;;  %v2822_v47 = vld [vmem:[%s4177_s5 + $0x74] sm:$0xf0] }
 0x3ae   :  { %v1717_v42 = vpack.c.bf16 %v1644_v48, %v1643_v22  ;;  %v2694_v48 = vor.u32 %v2832_v11, %v2691_v52  ;;  %v2674_v22 = vor.u32 %v2830_v35, %v2673_v27 }
 0x3af   :  { %2065 = vmatmul.bf16.gmra.mxu2 %v2670_v30  ;;  %v2625_v30 = vld [vmem:[%s4177_s5 + $0x48] sm:$0xf] }
 0x3b1   :  { %v1554_v15 = vpop.f32.mrf.mxu0 }
 0x3b2   :  { %v1555_v59 = vadd.f32 %v1554_v15, %v4197_v20  ;;  %v2818_v15 = vld [vmem:[%s4177_s5 + $0x54] sm:$0xf0] }
 0x3b3   :  { %v2626_v20 = vor.u32 %v2818_v15, %v2625_v30 }
 0x3b4   :  { %v1645_v46 = vmax.f32 %v1555_v59, 0.0  ;;  %v2824_v59 = vld [vmem:[%s4177_s5 + $0x8c] sm:$0xf] }
 0x3b5   :  { %v2662_v36 = vor.u32 %v2824_v59, %v2659_v51  ;;  %v1756_v59 = vpop.permute.xlu1 %1755 }
 0x3b9   :  { %v1556_v45 = vpop.f32.mrf.mxu0 }
 0x3ba   :  { %v1557_v23 = vadd.f32 %v1556_v45, %v4199_v53  ;;  %v4045_v45 = vpop.f32.mrf.mxu1  ;;  %v2642_v53 = vor.u32 %v2822_v47, %v2641_v7 }
 0x3bc   :  { %v1646_v4 = vmax.f32 %v1557_v23, 0.0 }
 0x3bd   :  { %v1771_v26 = vpop.permute.xlu1 %1770 }
 0x3be   :  { %v1718_v37 = vpack.c.bf16 %v1646_v4, %v1645_v46  ;;  %v2657_v4 = vld [vmem:[%s4177_s5 + $0x88] sm:$0xf]  ;;  %v2005_v57 = vadd.f32 %v4006_v6, %v1771_v26 }
 0x3bf   :  { %2070 = vmatmul.bf16.gmra.mxu2 %v2686_v39  ;;  %v2828_v39 = vld [vmem:[%s4177_s5 + $0xac] sm:$0xf]  ;;  %v2658_v8 = vor.u32 %v2826_v58, %v2657_v4 }
 0x3c0   :  { %2081 = vmatpush.bf16.msra.mxu3 %v1718_v37  ;;  %v2678_v62 = vor.u32 %v2828_v39, %v2675_v29  ;;  %v1761_v39 = vpop.permute.xlu2 %1760 }
 0x3c1   :  { %v2000_v29 = vadd.f32 %v3981_v14, %v1761_v39 }
 0x3c2   :  { %v4053_v23 = vpop.f32.mrf.mxu1 }
 0x3c4   :  { %2082 = vmatpush.bf16.msra.mxu3 %v1717_v42 }
 0x3c8   :  { %2083 = vmatpush.bf16.msra.mxu3 %v1716_v33 }
 0x3ca   :  { %v4061_v46 = vpop.f32.mrf.mxu1 }
 0x3cc   :  { %2084 = vmatpush.bf16.msra.mxu3 %v1715_v56 }
 0x3cf   :  { %2075 = vmatmul.bf16.gmra.mxu2 %v2702_v18  ;;  %v2706_v18 = vor.u32 %v2838_v3, %v2705_v43  ;;  %v1776_v43 = vpop.permute.xlu2 %1775 }
 0x3d0   :  { %2085 = vmatpush.bf16.msra.mxu3 %v3935_v28  ;;  %v2816_v28 = vld [vmem:[%s4177_s5 + $0x4c] sm:$0xf]  ;;  %v2008_v3 = vadd.f32 %v4015_v2, %v1776_v43 }
 0x3d2   :  { %v4075_v37 = vpop.f32.mrf.mxu1 }
 0x3d4   :  { %2086 = vmatpush.bf16.msra.mxu3 %v3925_v38 }
 0x3d8   :  { %2087 = vmatpush.bf16.msra.mxu3 %v3915_v55  ;;  %v2627_v55 = vld [vmem:[%s4177_s5 + $0x58] sm:$0xf0] }
 0x3d9   :  { %v2630_v38 = vor.u32 %v2816_v28, %v2627_v55 }
 0x3da   :  { %v4083_v9 = vpop.f32.mrf.mxu1 }
 0x3db   :  { %2148 = vmatmul.bf16.gmra.mxu1 %v2630_v38 }
 0x3dc   :  { %2088 = vmatpush.bf16.msra.mxu3 %v3901_v41  ;;  %v2814_v41 = vld [vmem:[%s4177_s5 + $0x34] sm:$0xf0] }
 0x3dd   :  { %v2610_v63 = vor.u32 %v2814_v41, %v2609_v17 }
 0x3df   :  { %2089 = vmatmul.bf16.vlgmr.msra.gmra.mxu3 %v2594_v13  ;;  %v1993_v13 = vadd.f32 %v3949_v61, %v1746_v19  ;;  %v1998_v61 = vadd.f32 %v3968_v16, %v1756_v59 }
 0x3e2   :  { %v4091_v42 = vpop.f32.mrf.mxu1  ;;  %v2041_v33 = vpop.f32.mrf.mxu2 }
 0x3e3   :  { %v2042_v28 = vadd.f32 %v2041_v33, %v1993_v13 }
 0x3ea   :  { %v4099_v50 = vpop.f32.mrf.mxu1  ;;  %v2043_v56 = vpop.f32.mrf.mxu2 }
 0x3eb   :  { %2153 = vmatmul.bf16.gmra.mxu1 %v2646_v60 }
 0x3ef   :  { %2094 = vmatmul.bf16.gmra.mxu3 %v2610_v63  ;;  %v1751_v63 = vpop.permute.xlu0 %1750 }
 0x3f0   :  { %v1995_v12 = vadd.f32 %v3957_v5, %v1751_v63 }
 0x3f2   :  { %v2139_v31 = vpop.f32.mrf.mxu1  ;;  %v2046_v1 = vpop.f32.mrf.mxu2  ;;  %v2044_v60 = vadd.f32 %v2043_v56, %v1995_v12 }
 0x3f7   :  { %v1766_v52 = vpop.permute.xlu0 %1765 }
 0x3fa   :  { %v2141_v0 = vpop.f32.mrf.mxu1  ;;  %v2048_v44 = vpop.f32.mrf.mxu2 }
 0x3fb   :  { %2158 = vmatmul.bf16.gmra.mxu1 %v2662_v36  ;;  %v2047_v36 = vadd.f32 %v2046_v1, %v1998_v61  ;;  %v2049_v4 = vadd.f32 %v2048_v44, %v2000_v29 }
 0x3ff   :  { %2099 = vmatmul.bf16.gmra.mxu3 %v2626_v20 }
 0x402   :  { %v2144_v10 = vpop.f32.mrf.mxu1  ;;  %v2051_v32 = vpop.f32.mrf.mxu2 }
 0x40a   :  { %v2146_v17 = vpop.f32.mrf.mxu1  ;;  %v2053_v7 = vpop.f32.mrf.mxu2 }
 0x40b   :  { %2163 = vmatmul.bf16.gmra.mxu1 %v2678_v62  ;;  %v2054_v40 = vadd.f32 %v2053_v7, %v2005_v57 }
 0x40f   :  { %2104 = vmatmul.bf16.gmra.mxu3 %v2642_v53 }
 0x41b   :  { %2168 = vmatmul.bf16.gmra.mxu1 %v2694_v48  ;;  %v2003_v48 = vadd.f32 %v3995_v49, %v1766_v52 }
 0x41d   :  { %v2052_v27 = vadd.f32 %v2051_v32, %v2003_v48 }
 0x41f   :  { %2109 = vmatmul.bf16.gmra.mxu3 %v2658_v8  ;;  %v2056_v8 = vpop.f32.mrf.mxu2 }
 0x42b   :  { %2173 = vmatmul.bf16.gmra.mxu1 %v2710_v24  ;;  %v2058_v24 = vpop.f32.mrf.mxu2 }
 0x42f   :  { %2114 = vmatmul.bf16.gmra.mxu3 %v2674_v22 }
 0x433   :  { %v2061_v56 = vpop.f32.mrf.mxu2 }
 0x43f   :  { %2119 = vmatmul.bf16.gmra.mxu3 %v2690_v34 }
 0x44f   :  { %2124 = vmatmul.bf16.gmra.mxu3 %v2706_v18  ;;  %v2057_v18 = vadd.f32 %v2056_v8, %v2008_v3 }
 0x458   :  { %v2149_v51 = vpop.f32.mrf.mxu1 }
 0x460   :  { %v2151_v62 = vpop.f32.mrf.mxu1 }
 0x462   :  { %v2090_v55 = vpop.f32.mrf.mxu3 }
 0x463   :  { %v2091_v38 = vadd.f32 %v2090_v55, %v2042_v28  ;;  %v2063_v28 = vpop.f32.mrf.mxu2 }
 0x465   :  { %v2140_v41 = vadd.f32 %v2139_v31, %v2091_v38 }
 0x467   :  { %2179 = vst [vmem:[%s4178_s7] sm:$0xff] %v2140_v41 }
 0x468   :  { %v2154_v14 = vpop.f32.mrf.mxu1 }
 0x46a   :  { %v2092_v30 = vpop.f32.mrf.mxu3 }
 0x46b   :  { %v2093_v15 = vadd.f32 %v2092_v30, %v2044_v60  ;;  %v2066_v60 = vpop.f32.mrf.mxu2 }
 0x46d   :  { %v2142_v20 = vadd.f32 %v2141_v0, %v2093_v15  ;;  %v1791_v15 = vpop.permute.xlu2 %1790 }
 0x46f   :  { %2180 = vst [vmem:[%s4178_s7 + $0x8] sm:$0xff] %v2142_v20  ;;  %v2015_v20 = vadd.f32 %v4045_v45, %v1791_v15 }
 0x470   :  { %v2156_v33 = vpop.f32.mrf.mxu1 }
 0x471   :  { %v2064_v59 = vadd.f32 %v2063_v28, %v2015_v20 }
 0x472   :  { %v2095_v5 = vpop.f32.mrf.mxu3 }
 0x473   :  { %v2096_v47 = vadd.f32 %v2095_v5, %v2047_v36  ;;  %v2068_v5 = vpop.f32.mrf.mxu2 }
 0x475   :  { %v2145_v53 = vadd.f32 %v2144_v10, %v2096_v47  ;;  %v1781_v10 = vpop.permute.xlu0 %1780  ;;  %v1806_v48 = vpop.permute.xlu2 %1805 }
 0x476   :  { %v2010_v44 = vadd.f32 %v4029_v54, %v1781_v10 }
 0x477   :  { %2181 = vst [vmem:[%s4178_s7 + $0x10] sm:$0xff] %v2145_v53 }
 0x478   :  { %v2159_v19 = vpop.f32.mrf.mxu1  ;;  %v2059_v13 = vadd.f32 %v2058_v24, %v2010_v44 }
 0x47a   :  { %v2097_v58 = vpop.f32.mrf.mxu3 }
 0x47b   :  { %v2098_v16 = vadd.f32 %v2097_v58, %v2049_v4 }
 0x47d   :  { %v2147_v11 = vadd.f32 %v2146_v17, %v2098_v16  ;;  %v1786_v17 = vpop.permute.xlu1 %1785  ;;  %v1796_v7 = vpop.permute.xlu0 %1795 }
 0x47e   :  { %v2013_v41 = vadd.f32 %v4031_v25, %v1786_v17  ;;  %v2018_v47 = vadd.f32 %v4053_v23, %v1796_v7  ;;  %v2071_v16 = vpop.f32.mrf.mxu2 }
 0x47f   :  { %2182 = vst [vmem:[%s4178_s7 + $0x18] sm:$0xff] %v2147_v11 }
 0x480   :  { %v2161_v63 = vpop.f32.mrf.mxu1  ;;  %v2062_v12 = vadd.f32 %v2061_v56, %v2013_v41  ;;  %v2067_v53 = vadd.f32 %v2066_v60, %v2018_v47 }
 0x482   :  { %v2100_v35 = vpop.f32.mrf.mxu3 }
 0x483   :  { %v2101_v22 = vadd.f32 %v2100_v35, %v2052_v27  ;;  %v2023_v35 = vadd.f32 %v4075_v37, %v1806_v48 }
 0x485   :  { %v2150_v21 = vadd.f32 %v2149_v51, %v2101_v22  ;;  %v1801_v4 = vpop.permute.xlu1 %1800  ;;  %v1811_v24 = vpop.permute.xlu0 %1810 }
 0x486   :  { %v2020_v58 = vadd.f32 %v4061_v46, %v1801_v4  ;;  %v2073_v22 = vpop.f32.mrf.mxu2  ;;  %v2025_v57 = vadd.f32 %v4083_v9, %v1811_v24 }
 0x487   :  { %2183 = vst [vmem:[%s4178_s7 + $0x20] sm:$0xff] %v2150_v21 }
 0x488   :  { %v2164_v25 = vpop.f32.mrf.mxu1  ;;  %v2069_v8 = vadd.f32 %v2068_v5, %v2020_v58 }
 0x48a   :  { %v2102_v34 = vpop.f32.mrf.mxu3 }
 0x48b   :  { %v2103_v49 = vadd.f32 %v2102_v34, %v2054_v40  ;;  %v2074_v34 = vadd.f32 %v2073_v22, %v2025_v57 }
 0x48d   :  { %v2152_v31 = vadd.f32 %v2151_v62, %v2103_v49  ;;  %v1816_v43 = vpop.permute.xlu1 %1815 }
 0x48e   :  { %v2028_v3 = vadd.f32 %v4091_v42, %v1816_v43 }
 0x48f   :  { %2184 = vst [vmem:[%s4178_s7 + $0x28] sm:$0xff] %v2152_v31 }
 0x490   :  { %v2166_v29 = vpop.f32.mrf.mxu1 }
 0x492   :  { %v2105_v0 = vpop.f32.mrf.mxu3 }
 0x493   :  { %v2106_v6 = vadd.f32 %v2105_v0, %v2057_v18 }
 0x495   :  { %v2155_v1 = vadd.f32 %v2154_v14, %v2106_v6  ;;  %v2072_v14 = vadd.f32 %v2071_v16, %v2023_v35 }
 0x497   :  { %2185 = vst [vmem:[%s4178_s7 + $0x30] sm:$0xff] %v2155_v1  ;;  %v1821_v1 = vpop.permute.xlu2 %1820 }
 0x498   :  { %v2169_v27 = vpop.f32.mrf.mxu1 }
 0x49a   :  { %v2107_v2 = vpop.f32.mrf.mxu3 }
 0x49b   :  { %v2108_v55 = vadd.f32 %v2107_v2, %v2059_v13 }
 0x49d   :  { %v2157_v38 = vadd.f32 %v2156_v33, %v2108_v55  ;;  %v2076_v33 = vpop.f32.mrf.mxu2 }
 0x49e   :  { %v2077_v56 = vadd.f32 %v2076_v33, %v2028_v3 }
 0x49f   :  { %2186 = vst [vmem:[%s4178_s7 + $0x38] sm:$0xff] %v2157_v38 }
 0x4a0   :  { %v2171_v40 = vpop.f32.mrf.mxu1 }
 0x4a2   :  { %v2110_v32 = vpop.f32.mrf.mxu3 }
 0x4a3   :  { %v2111_v54 = vadd.f32 %v2110_v32, %v2062_v12 }
 0x4a5   :  { %v2160_v30 = vadd.f32 %v2159_v19, %v2111_v54  ;;  %v2078_v10 = vpop.f32.mrf.mxu2  ;;  %v2030_v19 = vadd.f32 %v4099_v50, %v1821_v1 }
 0x4a7   :  { %2187 = vst [vmem:[%s4178_s7 + $0x40] sm:$0xff] %v2160_v30  ;;  %v2079_v44 = vadd.f32 %v2078_v10, %v2030_v19 }
 0x4a8   :  { %v2174_v9 = vpop.f32.mrf.mxu1 }
 0x4aa   :  { %v2112_v51 = vpop.f32.mrf.mxu3 }
 0x4ab   :  { %v2113_v61 = vadd.f32 %v2112_v51, %v2064_v59 }
 0x4ad   :  { %v2162_v36 = vadd.f32 %v2161_v63, %v2113_v61 }
 0x4af   :  { %2188 = vst [vmem:[%s4178_s7 + $0x48] sm:$0xff] %v2162_v36 }
 0x4b0   :  { %v2176_v28 = vpop.f32.mrf.mxu1 }
 0x4b2   :  { %v2115_v39 = vpop.f32.mrf.mxu3 }
 0x4b3   :  { %v2116_v45 = vadd.f32 %v2115_v39, %v2067_v53 }
 0x4b5   :  { %v2165_v62 = vadd.f32 %v2164_v25, %v2116_v45 }
 0x4b7   :  { %2189 = vst [vmem:[%s4178_s7 + $0x50] sm:$0xff] %v2165_v62 }
 0x4ba   :  { %v2117_v11 = vpop.f32.mrf.mxu3 }
 0x4bb   :  { %v2118_v23 = vadd.f32 %v2117_v11, %v2069_v8 }
 0x4bd   :  { %v2167_v52 = vadd.f32 %v2166_v29, %v2118_v23 }
 0x4bf   :  { %2190 = vst [vmem:[%s4178_s7 + $0x58] sm:$0xff] %v2167_v52 }
 0x4c2   :  { %v2120_v46 = vpop.f32.mrf.mxu3 }
 0x4c3   :  { %v2121_v21 = vadd.f32 %v2120_v46, %v2072_v14 }
 0x4c5   :  { %v2170_v26 = vadd.f32 %v2169_v27, %v2121_v21 }
 0x4c7   :  { %2191 = vst [vmem:[%s4178_s7 + $0x60] sm:$0xff] %v2170_v26 }
 0x4ca   :  { %v2122_v49 = vpop.f32.mrf.mxu3 }
 0x4cb   :  { %v2123_v37 = vadd.f32 %v2122_v49, %v2074_v34 }
 0x4cd   :  { %v2172_v31 = vadd.f32 %v2171_v40, %v2123_v37 }
 0x4cf   :  { %2192 = vst [vmem:[%s4178_s7 + $0x68] sm:$0xff] %v2172_v31 }
 0x4d2   :  { %v2125_v18 = vpop.f32.mrf.mxu3 }
 0x4d3   :  { %v2126_v0 = vadd.f32 %v2125_v18, %v2077_v56 }
 0x4d5   :  { %v2175_v6 = vadd.f32 %v2174_v9, %v2126_v0 }
 0x4d7   :  { %2193 = vst [vmem:[%s4178_s7 + $0x70] sm:$0xff] %v2175_v6 }
 0x4da   :  { %v2127_v13 = vpop.f32.mrf.mxu3 }
 0x4db   :  { %v2128_v42 = vadd.f32 %v2127_v13, %v2079_v44 }
 0x4dd   :  { %v2177_v2 = vadd.f32 %v2176_v28, %v2128_v42 }
 0x4df   :  { %2194 = vst [vmem:[%s4178_s7 + $0x78] sm:$0xff] %v2177_v2 }

</bundles_post_ra>
